<compile_context>
chip_gen: v6e
topology: v6e:2x2x1
jax: 0.10.0
libtpu: 0.0.40
codegen_flags: <defaults>
</compile_context>

<pallas_src>
import math
from functools import partial

import numpy as np
import jax
import jax.numpy as jnp
from jax import lax
from jax.experimental import pallas as pl
from jax.experimental.pallas import tpu as pltpu

_BN_EPS = 1e-5


def _cdiv(a, b):
    return (a + b - 1) // b


def _round_up(a, b):
    return _cdiv(a, b) * b


# ---------------------------------------------------------------------------
# Kernel 1: stem conv (+ folded BN + ReLU) as a W-banded matmul.
#   out[rb, ow*Cout+co] = sum_{it,ih} X2[rb + it*Hp + ih, :] @ band[it*kh+ih]
# where X2 has rows=(n, dp, hp) and cols=(wp, c).  True outputs live at base
# rows rb = (n*Dp + od*st)*Hp + oh*sh; other rows are discarded by the wrapper.
# ---------------------------------------------------------------------------
def _wband_conv_kernel(x_ref, w_ref, b_ref, o_ref, *, offs, tm, win):
    # x_ref : (rows, Wp*Cin) bf16 -- whole (tiny) padded activation, DMA'd once
    # w_ref : (G, Wp*Cin, wo*Cout) bf16 banded weights (one slab per (kt,kh) tap)
    # b_ref : (1, wo*Cout) f32   (folded BN bias, tiled over wo)
    # o_ref : (tm, wo*Cout) bf16, tile i covers output base rows [i*tm, (i+1)*tm)
    i = pl.program_id(0)
    row0 = pl.multiple_of(i * tm, 16)
    xwin = x_ref[pl.ds(row0, win), :]          # aligned dynamic-start window load
    ncols = o_ref.shape[-1]
    acc = jnp.zeros((tm, ncols), jnp.float32)
    for g, off in enumerate(offs):             # static unroll over kt*kh taps
        xg = xwin[off:off + tm, :]             # static slice of the loaded value
        acc = acc + jnp.dot(xg, w_ref[g], preferred_element_type=jnp.float32)
    out = jnp.maximum(acc + b_ref[...], 0.0)   # fused bias + ReLU, f32 epilogue
    o_ref[...] = out.astype(o_ref.dtype)


def conv3d_wband(x, band_w, bias, offs, ksize, stride, padding):
    """3-D conv (+BN scale folded, +bias +ReLU) on NDHWC bf16 activations."""
    n, d, h, w_, c = x.shape
    kt, kh, kw = ksize
    st, sh, sw = stride
    pt, ph, pw = padding
    dp, hp, wpw = d + 2 * pt, h + 2 * ph, w_ + 2 * pw
    do = (d + 2 * pt - kt) // st + 1
    ho = (h + 2 * ph - kh) // sh + 1
    wo = (w_ + 2 * pw - kw) // sw + 1
    g, kdim, ncols = band_w.shape
    assert g == kt * kh and kdim == wpw * c, (band_w.shape, (kt * kh, wpw * c))
    cout = ncols // wo

    xp = jnp.pad(x, ((0, 0), (pt, pt), (ph, ph), (pw, pw), (0, 0)))
    rows = n * dp * hp
    x2 = xp.reshape(rows, wpw * c)

    max_off = max(offs)
    # >= 2 (here 4) grid steps so v7x can use both TensorCores; tm multiple of 16.
    tm = min(512, max(16, _round_up(_cdiv(rows, 4), 16)))
    rows_p = _round_up(rows, tm)
    win = tm + _round_up(max_off, 8)
    rows_need = rows_p - tm + win
    x2 = jnp.pad(x2, ((0, rows_need - rows), (0, 0)))

    out = pl.pallas_call(
        partial(_wband_conv_kernel, offs=offs, tm=tm, win=win),
        out_shape=jax.ShapeDtypeStruct((rows_p, ncols), jnp.bfloat16),
        grid_spec=pltpu.PrefetchScalarGridSpec(
            num_scalar_prefetch=0,
            grid=(rows_p // tm,),
            in_specs=[
                pl.BlockSpec((rows_need, wpw * c), lambda i: (0, 0)),     # whole x
                pl.BlockSpec((g, wpw * c, ncols), lambda i: (0, 0, 0)),   # weights
                pl.BlockSpec((1, ncols), lambda i: (0, 0)),               # bias
            ],
            out_specs=pl.BlockSpec((tm, ncols), lambda i: (i, 0)),
        ),
        compiler_params=pltpu.CompilerParams(
            dimension_semantics=("parallel",)),
    )(x2, band_w, bias.astype(jnp.float32))

    # Extract the true outputs: rows at (n, od*st, oh*sh); cols are (ow, cout).
    out = out[:rows].reshape(n, dp, hp, wo, cout)
    out = out[:, 0:(do - 1) * st + 1:st, 0:(ho - 1) * sh + 1:sh, :, :]
    return out


# ---------------------------------------------------------------------------
# Kernel 2: layer1..layer4 + avgpool + fc fused into one kernel.
# The convs were precomputed (at init) into exact dense matrices over the
# flattened (position, channel) space; residual adds stay in f32 in VMEM.
# ---------------------------------------------------------------------------
def _tail_kernel(*refs, has_down):
    x_ref, o_ref = refs[0], refs[-1]
    wrefs = refs[1:-1]
    pos = [0]

    def nxt():
        r = wrefs[pos[0]]
        pos[0] += 1
        return r

    def lin(hh, e_ref, b_ref):
        return jnp.dot(hh.astype(jnp.bfloat16), e_ref[...],
                       preferred_element_type=jnp.float32) + b_ref[...]

    h = x_ref[...].astype(jnp.float32)
    for hd in has_down:                                   # static unroll
        e1, b1 = nxt(), nxt()
        a = jnp.maximum(lin(h, e1, b1), 0.0)              # conv1 + bn1 + relu
        if hd:
            eds, bds = nxt(), nxt()
            res = lin(h, eds, bds)                        # downsample shortcut
        else:
            res = h                                       # identity shortcut
        e2, b2 = nxt(), nxt()
        h = jnp.maximum(lin(a, e2, b2) + res, 0.0)        # conv2+bn2 + add + relu
    efc, bfc = nxt(), nxt()
    o_ref[...] = lin(h, efc, bfc)                         # avgpool+fc, f32 logits


def tail_forward(tail_arrays, has_down, x_flat):
    n = x_flat.shape[0]
    num_classes = tail_arrays[-1].shape[1]
    in_specs = [pl.BlockSpec(x_flat.shape, lambda i: (0, 0))]
    for a in tail_arrays:
        in_specs.append(pl.BlockSpec(a.shape, lambda i: (0, 0)))
    return pl.pallas_call(
        partial(_tail_kernel, has_down=has_down),
        out_shape=jax.ShapeDtypeStruct((n, num_classes), jnp.float32),
        grid_spec=pltpu.PrefetchScalarGridSpec(
            num_scalar_prefetch=0,
            grid=(1,),
            in_specs=in_specs,
            out_specs=pl.BlockSpec((n, num_classes), lambda i: (0, 0)),
        ),
        compiler_params=pltpu.CompilerParams(
            dimension_semantics=("arbitrary",)),
    )(x_flat, *tail_arrays)


def maxpool3d(x, k=3, s=2, p=1):
    # TODO(synk): MaxPool3d via lax.reduce_window; no Pallas win at these sizes.
    return lax.reduce_window(
        x, jnp.asarray(-jnp.inf, x.dtype), lax.max,
        window_dimensions=(1, k, k, k, 1),
        window_strides=(1, s, s, s, 1),
        padding=((0, 0), (p, p), (p, p), (p, p), (0, 0)))


# ---------------------------------------------------------------------------
# Parameter construction (deterministic, mirrors PyTorch __init__).
# ---------------------------------------------------------------------------
def _bn_init(c):
    # eval-mode BN at init: weight=1, bias=0, running_mean=0, running_var=1
    return (np.ones((c,), np.float32), np.zeros((c,), np.float32),
            np.zeros((c,), np.float32), np.ones((c,), np.float32))


def _bn_scale_bias(bn):
    gamma, beta, mean, var = bn
    scale = gamma / np.sqrt(var + _BN_EPS)
    return scale, beta - mean * scale


def _kaiming_conv(key, cout, cin, ksize):
    fan_out = cout * ksize[0] * ksize[1] * ksize[2]
    std = math.sqrt(2.0 / fan_out)
    w = std * jax.random.normal(key, (cout, cin) + tuple(ksize), jnp.float32)
    return np.asarray(w)


def _stem_band(wt, bn, in_spatial, ksize, stride, pad):
    """Banded weights: (kt*kh, Wp*Cin, wo*Cout) with BN scale folded in."""
    cout, cin, kt, kh, kw = wt.shape
    D, H, W = in_spatial
    sd, sh, sw = stride
    pd, ph, pw = pad
    Dp, Hp, Wp = D + 2 * pd, H + 2 * ph, W + 2 * pw
    do = (D + 2 * pd - kt) // sd + 1
    ho = (H + 2 * ph - kh) // sh + 1
    wo = (W + 2 * pw - kw) // sw + 1
    scale, bias = _bn_scale_bias(bn)
    wf = wt * scale[:, None, None, None, None]
    band = np.zeros((kt * kh, Wp * cin, wo * cout), np.float32)
    for it in range(kt):
        for ih in range(kh):
            g = it * kh + ih
            for ow in range(wo):
                for iw in range(kw):
                    wp = ow * sw + iw
                    band[g, wp * cin:(wp + 1) * cin,
                         ow * cout:(ow + 1) * cout] = wf[:, :, it, ih, iw].T
    b_eff = np.tile(bias, wo)
    offs = tuple(it * Hp + ih for it in range(kt) for ih in range(kh))
    return band, b_eff, offs, (do, ho, wo)


def _conv_eff(wt, bn, in_spatial, stride, pad):
    """Exact dense matrix of a small 3-D conv over flattened (pos, ch) space."""
    cout, cin, kt, kh, kw = wt.shape
    D, H, W = in_spatial
    sd, sh, sw = stride
    pd, ph, pw = pad
    do = (D + 2 * pd - kt) // sd + 1
    ho = (H + 2 * ph - kh) // sh + 1
    wo = (W + 2 * pw - kw) // sw + 1
    scale, bias = _bn_scale_bias(bn)
    wf = wt * scale[:, None, None, None, None]
    E = np.zeros((D * H * W * cin, do * ho * wo * cout), np.float32)
    for od in range(do):
        for oh in range(ho):
            for ow in range(wo):
                oc = ((od * ho + oh) * wo + ow) * cout
                for it in range(kt):
                    di = od * sd - pd + it
                    if di < 0 or di >= D:
                        continue
                    for ihh in range(kh):
                        hi = oh * sh - ph + ihh
                        if hi < 0 or hi >= H:
                            continue
                        for iww in range(kw):
                            wi = ow * sw - pw + iww
                            if wi < 0 or wi >= W:
                                continue
                            ic = ((di * H + hi) * W + wi) * cin
                            E[ic:ic + cin, oc:oc + cout] = wf[:, :, it, ihh, iww].T
    b = np.tile(bias, do * ho * wo)
    return E, b, (do, ho, wo)


def make_model(key, channels=3, block_inplanes=(4, 8, 16, 32),
               layers=(1, 1, 1, 1), conv1_t_size=3, conv1_t_stride=1,
               num_classes=10, input_spatial=(8, 16, 16)):
    keys = iter(jax.random.split(key, 64))
    params, config = {}, {}
    in_planes = block_inplanes[0]

    # ---- stem (conv1 + bn1 + relu) in banded-W form ------------------------
    stem_k = (conv1_t_size, 7, 7)
    stem_s = (conv1_t_stride, 2, 2)
    stem_p = (conv1_t_size // 2, 3, 3)
    w = _kaiming_conv(next(keys), in_planes, channels, stem_k)
    band, b_eff, offs, stem_sp = _stem_band(w, _bn_init(in_planes),
                                            input_spatial, stem_k, stem_s, stem_p)
    params["stem_w"] = jnp.asarray(band, jnp.bfloat16)
    params["stem_b"] = jnp.asarray(b_eff.reshape(1, -1), jnp.float32)
    config["stem"] = {"ksize": stem_k, "stride": stem_s, "pad": stem_p,
                      "offs": offs}

    # ---- maxpool(3, 2, 1) output spatial -----------------------------------
    sp = tuple((s + 2 - 3) // 2 + 1 for s in stem_sp)

    # ---- layer1..layer4 + avgpool + fc as effective matrices ---------------
    tail, has_down = [], []
    cin = in_planes
    for planes, nblocks, stride in zip(block_inplanes, layers, (1, 2, 2, 2)):
        for bi in range(nblocks):
            s = stride if bi == 0 else 1
            hd = (s != 1) or (cin != planes)
            w1 = _kaiming_conv(next(keys), planes, cin, (3, 3, 3))
            e1, b1, sp1 = _conv_eff(w1, _bn_init(planes), sp, (s,) * 3, (1,) * 3)
            w2 = _kaiming_conv(next(keys), planes, planes, (3, 3, 3))
            e2, b2, sp2 = _conv_eff(w2, _bn_init(planes), sp1, (1,) * 3, (1,) * 3)
            block_arrays = [jnp.asarray(e1, jnp.bfloat16),
                            jnp.asarray(b1.reshape(1, -1), jnp.float32)]
            if hd:
                wd = _kaiming_conv(next(keys), planes, cin, (1, 1, 1))
                ed, bd, spd = _conv_eff(wd, _bn_init(planes), sp, (s,) * 3,
                                        (0,) * 3)
                assert spd == sp1, (spd, sp1)
                block_arrays += [jnp.asarray(ed, jnp.bfloat16),
                                 jnp.asarray(bd.reshape(1, -1), jnp.float32)]
            block_arrays += [jnp.asarray(e2, jnp.bfloat16),
                             jnp.asarray(b2.reshape(1, -1), jnp.float32)]
            tail += block_arrays
            has_down.append(hd)
            sp, cin = sp2, planes

    feat = block_inplanes[3]
    npos = sp[0] * sp[1] * sp[2]
    bound = 1.0 / math.sqrt(feat)
    fc_w = np.asarray(jax.random.uniform(next(keys), (num_classes, feat),
                                         jnp.float32, -bound, bound))
    fc_b = np.asarray(jax.random.uniform(next(keys), (num_classes,),
                                         jnp.float32, -bound, bound))
    efc = np.zeros((npos * feat, num_classes), np.float32)
    for p in range(npos):          # AdaptiveAvgPool3d((1,1,1)) folded into FC
        efc[p * feat:(p + 1) * feat, :] = fc_w.T / npos
    tail += [jnp.asarray(efc, jnp.bfloat16),
             jnp.asarray(fc_b.reshape(1, -1), jnp.float32)]

    params["tail"] = tail
    config["tail_has_down"] = tuple(has_down)
    return config, params


# ---------------------------------------------------------------------------
# Forward pass (mirrors ResNet.forward), NDHWC / bf16 internally.
# ---------------------------------------------------------------------------
def resnet_forward(config, params, x):
    # NCDHW f32 (PyTorch layout) -> NDHWC bf16, once.
    x = jnp.transpose(x, (0, 2, 3, 4, 1)).astype(jnp.bfloat16)

    st = config["stem"]
    x = conv3d_wband(x, params["stem_w"], params["stem_b"], st["offs"],
                     st["ksize"], st["stride"], st["pad"])
    x = maxpool3d(x, 3, 2, 1)

    n = x.shape[0]
    x_flat = x.reshape(n, -1)                         # (N, D*H*W*C), pos-major
    return tail_forward(params["tail"], config["tail_has_down"], x_flat)


if __name__ == "__main__":
    key = jax.random.PRNGKey(0)
    pkey, xkey = jax.random.split(key)

    config, params = make_model(pkey, channels=3,
                                block_inplanes=(4, 8, 16, 32),
                                layers=(1, 1, 1, 1),
                                conv1_t_size=3, conv1_t_stride=1,
                                num_classes=10, input_spatial=(8, 16, 16))
    # NCDHW input, matching PyTorch
    x = jax.random.normal(xkey, (2, 3, 8, 16, 16), jnp.float32)

    fwd = jax.jit(partial(resnet_forward, config))
    out = jax.block_until_ready(fwd(params, x))
    assert out.shape == (2, 10), out.shape
    assert bool(jnp.all(jnp.isfinite(out)))
    print("KERNEL_OK")
</pallas_src>

<mosaic_0001>
module attributes {stable_mosaic.version = 11 : i64} {
  func.func @_wband_conv_kernel(%arg0: i32, %arg1: memref<504x66xbf16, #tpu.memory_space<vmem>>, %arg2: memref<21x66x32xbf16, #tpu.memory_space<vmem>>, %arg3: memref<1x32xf32, #tpu.memory_space<vmem>>, %arg4: memref<112x32xbf16, #tpu.memory_space<vmem>>) attributes {dimension_semantics = [#tpu.dimension_semantics<parallel>], iteration_bounds = array<i64: 4>, scalar_prefetch = 0 : i64, scratch_operands = 0 : i64, tpu.core_type = #tpu.core_type<tc>, window_params = [{pipeline_mode = #tpu.pipeline_mode<synchronous>, transform_indices = @transform_0, window_bounds = array<i64: 504, 66>}, {pipeline_mode = #tpu.pipeline_mode<synchronous>, transform_indices = @transform_1, window_bounds = array<i64: 21, 66, 32>}, {pipeline_mode = #tpu.pipeline_mode<synchronous>, transform_indices = @transform_2, window_bounds = array<i64: 1, 32>}, {transform_indices = @transform_3, window_bounds = array<i64: 112, 32>}]} {
    %c112_i32 = arith.constant 112 : i32
    %0 = arith.muli %arg0, %c112_i32 : i32
    %1 = tpu.assume_multiple %0, 16 : i32
    %2 = arith.index_cast %1 : i32 to index
    %c0 = arith.constant 0 : index
    %3 = vector.load %arg1[%2, %c0] : memref<504x66xbf16, #tpu.memory_space<vmem>>, vector<168x66xbf16>
    %cst = arith.constant 0.000000e+00 : f32
    %4 = vector.broadcast %cst : f32 to vector<112x32xf32>
    %5 = vector.extract_strided_slice %3 {offsets = [0, 0], sizes = [112, 66], strides = [1, 1]} : vector<168x66xbf16> to vector<112x66xbf16>
    %c0_0 = arith.constant 0 : index
    %c0_1 = arith.constant 0 : index
    %c0_2 = arith.constant 0 : index
    %6 = vector.load %arg2[%c0_0, %c0_1, %c0_2] : memref<21x66x32xbf16, #tpu.memory_space<vmem>>, vector<1x66x32xbf16>
    %7 = vector.shape_cast %6 : vector<1x66x32xbf16> to vector<66x32xbf16>
    %cst_3 = arith.constant dense<0.000000e+00> : vector<112x32xf32>
    %8 = tpu.matmul %5, %7, %cst_3 {dimension_numbers = #tpu.dot_dimension_numbers<[1], [0], [0], [1], [0, 0, 1, 1], [], []>} : vector<112x66xbf16>, vector<66x32xbf16>, vector<112x32xf32> -> vector<112x32xf32>
    %9 = arith.addf %4, %8 : vector<112x32xf32>
    %10 = vector.extract_strided_slice %3 {offsets = [1, 0], sizes = [112, 66], strides = [1, 1]} : vector<168x66xbf16> to vector<112x66xbf16>
    %c1 = arith.constant 1 : index
    %c0_4 = arith.constant 0 : index
    %c0_5 = arith.constant 0 : index
    %11 = vector.load %arg2[%c1, %c0_4, %c0_5] : memref<21x66x32xbf16, #tpu.memory_space<vmem>>, vector<1x66x32xbf16>
    %12 = vector.shape_cast %11 : vector<1x66x32xbf16> to vector<66x32xbf16>
    %cst_6 = arith.constant dense<0.000000e+00> : vector<112x32xf32>
    %13 = tpu.matmul %10, %12, %cst_6 {dimension_numbers = #tpu.dot_dimension_numbers<[1], [0], [0], [1], [0, 0, 1, 1], [], []>} : vector<112x66xbf16>, vector<66x32xbf16>, vector<112x32xf32> -> vector<112x32xf32>
    %14 = arith.addf %9, %13 : vector<112x32xf32>
    %15 = vector.extract_strided_slice %3 {offsets = [2, 0], sizes = [112, 66], strides = [1, 1]} : vector<168x66xbf16> to vector<112x66xbf16>
    %c2 = arith.constant 2 : index
    %c0_7 = arith.constant 0 : index
    %c0_8 = arith.constant 0 : index
    %16 = vector.load %arg2[%c2, %c0_7, %c0_8] : memref<21x66x32xbf16, #tpu.memory_space<vmem>>, vector<1x66x32xbf16>
    %17 = vector.shape_cast %16 : vector<1x66x32xbf16> to vector<66x32xbf16>
    %cst_9 = arith.constant dense<0.000000e+00> : vector<112x32xf32>
    %18 = tpu.matmul %15, %17, %cst_9 {dimension_numbers = #tpu.dot_dimension_numbers<[1], [0], [0], [1], [0, 0, 1, 1], [], []>} : vector<112x66xbf16>, vector<66x32xbf16>, vector<112x32xf32> -> vector<112x32xf32>
    %19 = arith.addf %14, %18 : vector<112x32xf32>
    %20 = vector.extract_strided_slice %3 {offsets = [3, 0], sizes = [112, 66], strides = [1, 1]} : vector<168x66xbf16> to vector<112x66xbf16>
    %c3 = arith.constant 3 : index
    %c0_10 = arith.constant 0 : index
    %c0_11 = arith.constant 0 : index
    %21 = vector.load %arg2[%c3, %c0_10, %c0_11] : memref<21x66x32xbf16, #tpu.memory_space<vmem>>, vector<1x66x32xbf16>
    %22 = vector.shape_cast %21 : vector<1x66x32xbf16> to vector<66x32xbf16>
    %cst_12 = arith.constant dense<0.000000e+00> : vector<112x32xf32>
    %23 = tpu.matmul %20, %22, %cst_12 {dimension_numbers = #tpu.dot_dimension_numbers<[1], [0], [0], [1], [0, 0, 1, 1], [], []>} : vector<112x66xbf16>, vector<66x32xbf16>, vector<112x32xf32> -> vector<112x32xf32>
    %24 = arith.addf %19, %23 : vector<112x32xf32>
    %25 = vector.extract_strided_slice %3 {offsets = [4, 0], sizes = [112, 66], strides = [1, 1]} : vector<168x66xbf16> to vector<112x66xbf16>
    %c4 = arith.constant 4 : index
    %c0_13 = arith.constant 0 : index
    %c0_14 = arith.constant 0 : index
    %26 = vector.load %arg2[%c4, %c0_13, %c0_14] : memref<21x66x32xbf16, #tpu.memory_space<vmem>>, vector<1x66x32xbf16>
    %27 = vector.shape_cast %26 : vector<1x66x32xbf16> to vector<66x32xbf16>
    %cst_15 = arith.constant dense<0.000000e+00> : vector<112x32xf32>
    %28 = tpu.matmul %25, %27, %cst_15 {dimension_numbers = #tpu.dot_dimension_numbers<[1], [0], [0], [1], [0, 0, 1, 1], [], []>} : vector<112x66xbf16>, vector<66x32xbf16>, vector<112x32xf32> -> vector<112x32xf32>
    %29 = arith.addf %24, %28 : vector<112x32xf32>
    %30 = vector.extract_strided_slice %3 {offsets = [5, 0], sizes = [112, 66], strides = [1, 1]} : vector<168x66xbf16> to vector<112x66xbf16>
    %c5 = arith.constant 5 : index
    %c0_16 = arith.constant 0 : index
    %c0_17 = arith.constant 0 : index
    %31 = vector.load %arg2[%c5, %c0_16, %c0_17] : memref<21x66x32xbf16, #tpu.memory_space<vmem>>, vector<1x66x32xbf16>
    %32 = vector.shape_cast %31 : vector<1x66x32xbf16> to vector<66x32xbf16>
    %cst_18 = arith.constant dense<0.000000e+00> : vector<112x32xf32>
    %33 = tpu.matmul %30, %32, %cst_18 {dimension_numbers = #tpu.dot_dimension_numbers<[1], [0], [0], [1], [0, 0, 1, 1], [], []>} : vector<112x66xbf16>, vector<66x32xbf16>, vector<112x32xf32> -> vector<112x32xf32>
    %34 = arith.addf %29, %33 : vector<112x32xf32>
    %35 = vector.extract_strided_slice %3 {offsets = [6, 0], sizes = [112, 66], strides = [1, 1]} : vector<168x66xbf16> to vector<112x66xbf16>
    %c6 = arith.constant 6 : index
    %c0_19 = arith.constant 0 : index
    %c0_20 = arith.constant 0 : index
    %36 = vector.load %arg2[%c6, %c0_19, %c0_20] : memref<21x66x32xbf16, #tpu.memory_space<vmem>>, vector<1x66x32xbf16>
    %37 = vector.shape_cast %36 : vector<1x66x32xbf16> to vector<66x32xbf16>
    %cst_21 = arith.constant dense<0.000000e+00> : vector<112x32xf32>
    %38 = tpu.matmul %35, %37, %cst_21 {dimension_numbers = #tpu.dot_dimension_numbers<[1], [0], [0], [1], [0, 0, 1, 1], [], []>} : vector<112x66xbf16>, vector<66x32xbf16>, vector<112x32xf32> -> vector<112x32xf32>
    %39 = arith.addf %34, %38 : vector<112x32xf32>
    %40 = vector.extract_strided_slice %3 {offsets = [22, 0], sizes = [112, 66], strides = [1, 1]} : vector<168x66xbf16> to vector<112x66xbf16>
    %c7 = arith.constant 7 : index
    %c0_22 = arith.constant 0 : index
    %c0_23 = arith.constant 0 : index
    %41 = vector.load %arg2[%c7, %c0_22, %c0_23] : memref<21x66x32xbf16, #tpu.memory_space<vmem>>, vector<1x66x32xbf16>
    %42 = vector.shape_cast %41 : vector<1x66x32xbf16> to vector<66x32xbf16>
    %cst_24 = arith.constant dense<0.000000e+00> : vector<112x32xf32>
    %43 = tpu.matmul %40, %42, %cst_24 {dimension_numbers = #tpu.dot_dimension_numbers<[1], [0], [0], [1], [0, 0, 1, 1], [], []>} : vector<112x66xbf16>, vector<66x32xbf16>, vector<112x32xf32> -> vector<112x32xf32>
    %44 = arith.addf %39, %43 : vector<112x32xf32>
    %45 = vector.extract_strided_slice %3 {offsets = [23, 0], sizes = [112, 66], strides = [1, 1]} : vector<168x66xbf16> to vector<112x66xbf16>
    %c8 = arith.constant 8 : index
    %c0_25 = arith.constant 0 : index
    %c0_26 = arith.constant 0 : index
    %46 = vector.load %arg2[%c8, %c0_25, %c0_26] : memref<21x66x32xbf16, #tpu.memory_space<vmem>>, vector<1x66x32xbf16>
    %47 = vector.shape_cast %46 : vector<1x66x32xbf16> to vector<66x32xbf16>
    %cst_27 = arith.constant dense<0.000000e+00> : vector<112x32xf32>
    %48 = tpu.matmul %45, %47, %cst_27 {dimension_numbers = #tpu.dot_dimension_numbers<[1], [0], [0], [1], [0, 0, 1, 1], [], []>} : vector<112x66xbf16>, vector<66x32xbf16>, vector<112x32xf32> -> vector<112x32xf32>
    %49 = arith.addf %44, %48 : vector<112x32xf32>
    %50 = vector.extract_strided_slice %3 {offsets = [24, 0], sizes = [112, 66], strides = [1, 1]} : vector<168x66xbf16> to vector<112x66xbf16>
    %c9 = arith.constant 9 : index
    %c0_28 = arith.constant 0 : index
    %c0_29 = arith.constant 0 : index
    %51 = vector.load %arg2[%c9, %c0_28, %c0_29] : memref<21x66x32xbf16, #tpu.memory_space<vmem>>, vector<1x66x32xbf16>
    %52 = vector.shape_cast %51 : vector<1x66x32xbf16> to vector<66x32xbf16>
    %cst_30 = arith.constant dense<0.000000e+00> : vector<112x32xf32>
    %53 = tpu.matmul %50, %52, %cst_30 {dimension_numbers = #tpu.dot_dimension_numbers<[1], [0], [0], [1], [0, 0, 1, 1], [], []>} : vector<112x66xbf16>, vector<66x32xbf16>, vector<112x32xf32> -> vector<112x32xf32>
    %54 = arith.addf %49, %53 : vector<112x32xf32>
    %55 = vector.extract_strided_slice %3 {offsets = [25, 0], sizes = [112, 66], strides = [1, 1]} : vector<168x66xbf16> to vector<112x66xbf16>
    %c10 = arith.constant 10 : index
    %c0_31 = arith.constant 0 : index
    %c0_32 = arith.constant 0 : index
    %56 = vector.load %arg2[%c10, %c0_31, %c0_32] : memref<21x66x32xbf16, #tpu.memory_space<vmem>>, vector<1x66x32xbf16>
    %57 = vector.shape_cast %56 : vector<1x66x32xbf16> to vector<66x32xbf16>
    %cst_33 = arith.constant dense<0.000000e+00> : vector<112x32xf32>
    %58 = tpu.matmul %55, %57, %cst_33 {dimension_numbers = #tpu.dot_dimension_numbers<[1], [0], [0], [1], [0, 0, 1, 1], [], []>} : vector<112x66xbf16>, vector<66x32xbf16>, vector<112x32xf32> -> vector<112x32xf32>
    %59 = arith.addf %54, %58 : vector<112x32xf32>
    %60 = vector.extract_strided_slice %3 {offsets = [26, 0], sizes = [112, 66], strides = [1, 1]} : vector<168x66xbf16> to vector<112x66xbf16>
    %c11 = arith.constant 11 : index
    %c0_34 = arith.constant 0 : index
    %c0_35 = arith.constant 0 : index
    %61 = vector.load %arg2[%c11, %c0_34, %c0_35] : memref<21x66x32xbf16, #tpu.memory_space<vmem>>, vector<1x66x32xbf16>
    %62 = vector.shape_cast %61 : vector<1x66x32xbf16> to vector<66x32xbf16>
    %cst_36 = arith.constant dense<0.000000e+00> : vector<112x32xf32>
    %63 = tpu.matmul %60, %62, %cst_36 {dimension_numbers = #tpu.dot_dimension_numbers<[1], [0], [0], [1], [0, 0, 1, 1], [], []>} : vector<112x66xbf16>, vector<66x32xbf16>, vector<112x32xf32> -> vector<112x32xf32>
    %64 = arith.addf %59, %63 : vector<112x32xf32>
    %65 = vector.extract_strided_slice %3 {offsets = [27, 0], sizes = [112, 66], strides = [1, 1]} : vector<168x66xbf16> to vector<112x66xbf16>
    %c12 = arith.constant 12 : index
    %c0_37 = arith.constant 0 : index
    %c0_38 = arith.constant 0 : index
    %66 = vector.load %arg2[%c12, %c0_37, %c0_38] : memref<21x66x32xbf16, #tpu.memory_space<vmem>>, vector<1x66x32xbf16>
    %67 = vector.shape_cast %66 : vector<1x66x32xbf16> to vector<66x32xbf16>
    %cst_39 = arith.constant dense<0.000000e+00> : vector<112x32xf32>
    %68 = tpu.matmul %65, %67, %cst_39 {dimension_numbers = #tpu.dot_dimension_numbers<[1], [0], [0], [1], [0, 0, 1, 1], [], []>} : vector<112x66xbf16>, vector<66x32xbf16>, vector<112x32xf32> -> vector<112x32xf32>
    %69 = arith.addf %64, %68 : vector<112x32xf32>
    %70 = vector.extract_strided_slice %3 {offsets = [28, 0], sizes = [112, 66], strides = [1, 1]} : vector<168x66xbf16> to vector<112x66xbf16>
    %c13 = arith.constant 13 : index
    %c0_40 = arith.constant 0 : index
    %c0_41 = arith.constant 0 : index
    %71 = vector.load %arg2[%c13, %c0_40, %c0_41] : memref<21x66x32xbf16, #tpu.memory_space<vmem>>, vector<1x66x32xbf16>
    %72 = vector.shape_cast %71 : vector<1x66x32xbf16> to vector<66x32xbf16>
    %cst_42 = arith.constant dense<0.000000e+00> : vector<112x32xf32>
    %73 = tpu.matmul %70, %72, %cst_42 {dimension_numbers = #tpu.dot_dimension_numbers<[1], [0], [0], [1], [0, 0, 1, 1], [], []>} : vector<112x66xbf16>, vector<66x32xbf16>, vector<112x32xf32> -> vector<112x32xf32>
    %74 = arith.addf %69, %73 : vector<112x32xf32>
    %75 = vector.extract_strided_slice %3 {offsets = [44, 0], sizes = [112, 66], strides = [1, 1]} : vector<168x66xbf16> to vector<112x66xbf16>
    %c14 = arith.constant 14 : index
    %c0_43 = arith.constant 0 : index
    %c0_44 = arith.constant 0 : index
    %76 = vector.load %arg2[%c14, %c0_43, %c0_44] : memref<21x66x32xbf16, #tpu.memory_space<vmem>>, vector<1x66x32xbf16>
    %77 = vector.shape_cast %76 : vector<1x66x32xbf16> to vector<66x32xbf16>
    %cst_45 = arith.constant dense<0.000000e+00> : vector<112x32xf32>
    %78 = tpu.matmul %75, %77, %cst_45 {dimension_numbers = #tpu.dot_dimension_numbers<[1], [0], [0], [1], [0, 0, 1, 1], [], []>} : vector<112x66xbf16>, vector<66x32xbf16>, vector<112x32xf32> -> vector<112x32xf32>
    %79 = arith.addf %74, %78 : vector<112x32xf32>
    %80 = vector.extract_strided_slice %3 {offsets = [45, 0], sizes = [112, 66], strides = [1, 1]} : vector<168x66xbf16> to vector<112x66xbf16>
    %c15 = arith.constant 15 : index
    %c0_46 = arith.constant 0 : index
    %c0_47 = arith.constant 0 : index
    %81 = vector.load %arg2[%c15, %c0_46, %c0_47] : memref<21x66x32xbf16, #tpu.memory_space<vmem>>, vector<1x66x32xbf16>
    %82 = vector.shape_cast %81 : vector<1x66x32xbf16> to vector<66x32xbf16>
    %cst_48 = arith.constant dense<0.000000e+00> : vector<112x32xf32>
    %83 = tpu.matmul %80, %82, %cst_48 {dimension_numbers = #tpu.dot_dimension_numbers<[1], [0], [0], [1], [0, 0, 1, 1], [], []>} : vector<112x66xbf16>, vector<66x32xbf16>, vector<112x32xf32> -> vector<112x32xf32>
    %84 = arith.addf %79, %83 : vector<112x32xf32>
    %85 = vector.extract_strided_slice %3 {offsets = [46, 0], sizes = [112, 66], strides = [1, 1]} : vector<168x66xbf16> to vector<112x66xbf16>
    %c16 = arith.constant 16 : index
    %c0_49 = arith.constant 0 : index
    %c0_50 = arith.constant 0 : index
    %86 = vector.load %arg2[%c16, %c0_49, %c0_50] : memref<21x66x32xbf16, #tpu.memory_space<vmem>>, vector<1x66x32xbf16>
    %87 = vector.shape_cast %86 : vector<1x66x32xbf16> to vector<66x32xbf16>
    %cst_51 = arith.constant dense<0.000000e+00> : vector<112x32xf32>
    %88 = tpu.matmul %85, %87, %cst_51 {dimension_numbers = #tpu.dot_dimension_numbers<[1], [0], [0], [1], [0, 0, 1, 1], [], []>} : vector<112x66xbf16>, vector<66x32xbf16>, vector<112x32xf32> -> vector<112x32xf32>
    %89 = arith.addf %84, %88 : vector<112x32xf32>
    %90 = vector.extract_strided_slice %3 {offsets = [47, 0], sizes = [112, 66], strides = [1, 1]} : vector<168x66xbf16> to vector<112x66xbf16>
    %c17 = arith.constant 17 : index
    %c0_52 = arith.constant 0 : index
    %c0_53 = arith.constant 0 : index
    %91 = vector.load %arg2[%c17, %c0_52, %c0_53] : memref<21x66x32xbf16, #tpu.memory_space<vmem>>, vector<1x66x32xbf16>
    %92 = vector.shape_cast %91 : vector<1x66x32xbf16> to vector<66x32xbf16>
    %cst_54 = arith.constant dense<0.000000e+00> : vector<112x32xf32>
    %93 = tpu.matmul %90, %92, %cst_54 {dimension_numbers = #tpu.dot_dimension_numbers<[1], [0], [0], [1], [0, 0, 1, 1], [], []>} : vector<112x66xbf16>, vector<66x32xbf16>, vector<112x32xf32> -> vector<112x32xf32>
    %94 = arith.addf %89, %93 : vector<112x32xf32>
    %95 = vector.extract_strided_slice %3 {offsets = [48, 0], sizes = [112, 66], strides = [1, 1]} : vector<168x66xbf16> to vector<112x66xbf16>
    %c18 = arith.constant 18 : index
    %c0_55 = arith.constant 0 : index
    %c0_56 = arith.constant 0 : index
    %96 = vector.load %arg2[%c18, %c0_55, %c0_56] : memref<21x66x32xbf16, #tpu.memory_space<vmem>>, vector<1x66x32xbf16>
    %97 = vector.shape_cast %96 : vector<1x66x32xbf16> to vector<66x32xbf16>
    %cst_57 = arith.constant dense<0.000000e+00> : vector<112x32xf32>
    %98 = tpu.matmul %95, %97, %cst_57 {dimension_numbers = #tpu.dot_dimension_numbers<[1], [0], [0], [1], [0, 0, 1, 1], [], []>} : vector<112x66xbf16>, vector<66x32xbf16>, vector<112x32xf32> -> vector<112x32xf32>
    %99 = arith.addf %94, %98 : vector<112x32xf32>
    %100 = vector.extract_strided_slice %3 {offsets = [49, 0], sizes = [112, 66], strides = [1, 1]} : vector<168x66xbf16> to vector<112x66xbf16>
    %c19 = arith.constant 19 : index
    %c0_58 = arith.constant 0 : index
    %c0_59 = arith.constant 0 : index
    %101 = vector.load %arg2[%c19, %c0_58, %c0_59] : memref<21x66x32xbf16, #tpu.memory_space<vmem>>, vector<1x66x32xbf16>
    %102 = vector.shape_cast %101 : vector<1x66x32xbf16> to vector<66x32xbf16>
    %cst_60 = arith.constant dense<0.000000e+00> : vector<112x32xf32>
    %103 = tpu.matmul %100, %102, %cst_60 {dimension_numbers = #tpu.dot_dimension_numbers<[1], [0], [0], [1], [0, 0, 1, 1], [], []>} : vector<112x66xbf16>, vector<66x32xbf16>, vector<112x32xf32> -> vector<112x32xf32>
    %104 = arith.addf %99, %103 : vector<112x32xf32>
    %105 = vector.extract_strided_slice %3 {offsets = [50, 0], sizes = [112, 66], strides = [1, 1]} : vector<168x66xbf16> to vector<112x66xbf16>
    %c20 = arith.constant 20 : index
    %c0_61 = arith.constant 0 : index
    %c0_62 = arith.constant 0 : index
    %106 = vector.load %arg2[%c20, %c0_61, %c0_62] : memref<21x66x32xbf16, #tpu.memory_space<vmem>>, vector<1x66x32xbf16>
    %107 = vector.shape_cast %106 : vector<1x66x32xbf16> to vector<66x32xbf16>
    %cst_63 = arith.constant dense<0.000000e+00> : vector<112x32xf32>
    %108 = tpu.matmul %105, %107, %cst_63 {dimension_numbers = #tpu.dot_dimension_numbers<[1], [0], [0], [1], [0, 0, 1, 1], [], []>} : vector<112x66xbf16>, vector<66x32xbf16>, vector<112x32xf32> -> vector<112x32xf32>
    %109 = arith.addf %104, %108 : vector<112x32xf32>
    %c0_64 = arith.constant 0 : index
    %c0_65 = arith.constant 0 : index
    %110 = vector.load %arg3[%c0_64, %c0_65] : memref<1x32xf32, #tpu.memory_space<vmem>>, vector<1x32xf32>
    %111 = vector.broadcast %110 : vector<1x32xf32> to vector<112x32xf32>
    %112 = arith.addf %109, %111 : vector<112x32xf32>
    %cst_66 = arith.constant 0.000000e+00 : f32
    %113 = vector.broadcast %cst_66 : f32 to vector<112x32xf32>
    %114 = arith.maximumf %112, %113 : vector<112x32xf32>
    %115 = arith.truncf %114 : vector<112x32xf32> to vector<112x32xbf16>
    %c0_67 = arith.constant 0 : index
    %c0_68 = arith.constant 0 : index
    %116 = vector.load %arg4[%c0_67, %c0_68] : memref<112x32xbf16, #tpu.memory_space<vmem>>, vector<112x32xbf16>
    tpu.vector_store %arg4[%c0_67, %c0_68], %115 {strides = array<i32>} : memref<112x32xbf16, #tpu.memory_space<vmem>>, vector<112x32xbf16>,
    return
  }
  func.func @transform_0(%arg0: i32) -> (i32, i32) {
    %c0_i32 = arith.constant 0 : i32
    %c0_i32_0 = arith.constant 0 : i32
    %c0_i32_1 = arith.constant 0 : i32
    return %c0_i32, %c0_i32_0 : i32, i32
  }
  func.func @transform_1(%arg0: i32) -> (i32, i32, i32) {
    %c0_i32 = arith.constant 0 : i32
    %c0_i32_0 = arith.constant 0 : i32
    %c0_i32_1 = arith.constant 0 : i32
    %c0_i32_2 = arith.constant 0 : i32
    return %c0_i32, %c0_i32_0, %c0_i32_1 : i32, i32, i32
  }
  func.func @transform_2(%arg0: i32) -> (i32, i32) {
    %c0_i32 = arith.constant 0 : i32
    %c0_i32_0 = arith.constant 0 : i32
    %c0_i32_1 = arith.constant 0 : i32
    return %c0_i32, %c0_i32_0 : i32, i32
  }
  func.func @transform_3(%arg0: i32) -> (i32, i32) {
    %c0_i32 = arith.constant 0 : i32
    %c0_i32_0 = arith.constant 0 : i32
    return %arg0, %c0_i32 : i32, i32
  }
}

module attributes {stable_mosaic.version = 11 : i64} {
  func.func @_tail_kernel(%arg0: i32, %arg1: memref<2x256xbf16, #tpu.memory_space<vmem>>, %arg2: memref<256x256xbf16, #tpu.memory_space<vmem>>, %arg3: memref<1x256xf32, #tpu.memory_space<vmem>>, %arg4: memref<256x256xbf16, #tpu.memory_space<vmem>>, %arg5: memref<1x256xf32, #tpu.memory_space<vmem>>, %arg6: memref<256x64xbf16, #tpu.memory_space<vmem>>, %arg7: memref<1x64xf32, #tpu.memory_space<vmem>>, %arg8: memref<256x64xbf16, #tpu.memory_space<vmem>>, %arg9: memref<1x64xf32, #tpu.memory_space<vmem>>, %arg10: memref<64x64xbf16, #tpu.memory_space<vmem>>, %arg11: memref<1x64xf32, #tpu.memory_space<vmem>>, %arg12: memref<64x16xbf16, #tpu.memory_space<vmem>>, %arg13: memref<1x16xf32, #tpu.memory_space<vmem>>, %arg14: memref<64x16xbf16, #tpu.memory_space<vmem>>, %arg15: memref<1x16xf32, #tpu.memory_space<vmem>>, %arg16: memref<16x16xbf16, #tpu.memory_space<vmem>>, %arg17: memref<1x16xf32, #tpu.memory_space<vmem>>, %arg18: memref<16x32xbf16, #tpu.memory_space<vmem>>, %arg19: memref<1x32xf32, #tpu.memory_space<vmem>>, %arg20: memref<16x32xbf16, #tpu.memory_space<vmem>>, %arg21: memref<1x32xf32, #tpu.memory_space<vmem>>, %arg22: memref<32x32xbf16, #tpu.memory_space<vmem>>, %arg23: memref<1x32xf32, #tpu.memory_space<vmem>>, %arg24: memref<32x10xbf16, #tpu.memory_space<vmem>>, %arg25: memref<1x10xf32, #tpu.memory_space<vmem>>, %arg26: memref<2x10xf32, #tpu.memory_space<vmem>>) attributes {dimension_semantics = [#tpu.dimension_semantics<arbitrary>], iteration_bounds = array<i64: 1>, scalar_prefetch = 0 : i64, scratch_operands = 0 : i64, tpu.core_type = #tpu.core_type<tc>, window_params = [{pipeline_mode = #tpu.pipeline_mode<synchronous>, transform_indices = @transform_0, window_bounds = array<i64: 2, 256>}, {pipeline_mode = #tpu.pipeline_mode<synchronous>, transform_indices = @transform_1, window_bounds = array<i64: 256, 256>}, {pipeline_mode = #tpu.pipeline_mode<synchronous>, transform_indices = @transform_2, window_bounds = array<i64: 1, 256>}, {pipeline_mode = #tpu.pipeline_mode<synchronous>, transform_indices = @transform_3, window_bounds = array<i64: 256, 256>}, {pipeline_mode = #tpu.pipeline_mode<synchronous>, transform_indices = @transform_4, window_bounds = array<i64: 1, 256>}, {pipeline_mode = #tpu.pipeline_mode<synchronous>, transform_indices = @transform_5, window_bounds = array<i64: 256, 64>}, {pipeline_mode = #tpu.pipeline_mode<synchronous>, transform_indices = @transform_6, window_bounds = array<i64: 1, 64>}, {pipeline_mode = #tpu.pipeline_mode<synchronous>, transform_indices = @transform_7, window_bounds = array<i64: 256, 64>}, {pipeline_mode = #tpu.pipeline_mode<synchronous>, transform_indices = @transform_8, window_bounds = array<i64: 1, 64>}, {pipeline_mode = #tpu.pipeline_mode<synchronous>, transform_indices = @transform_9, window_bounds = array<i64: 64, 64>}, {pipeline_mode = #tpu.pipeline_mode<synchronous>, transform_indices = @transform_10, window_bounds = array<i64: 1, 64>}, {pipeline_mode = #tpu.pipeline_mode<synchronous>, transform_indices = @transform_11, window_bounds = array<i64: 64, 16>}, {pipeline_mode = #tpu.pipeline_mode<synchronous>, transform_indices = @transform_12, window_bounds = array<i64: 1, 16>}, {pipeline_mode = #tpu.pipeline_mode<synchronous>, transform_indices = @transform_13, window_bounds = array<i64: 64, 16>}, {pipeline_mode = #tpu.pipeline_mode<synchronous>, transform_indices = @transform_14, window_bounds = array<i64: 1, 16>}, {pipeline_mode = #tpu.pipeline_mode<synchronous>, transform_indices = @transform_15, window_bounds = array<i64: 16, 16>}, {pipeline_mode = #tpu.pipeline_mode<synchronous>, transform_indices = @transform_16, window_bounds = array<i64: 1, 16>}, {pipeline_mode = #tpu.pipeline_mode<synchronous>, transform_indices = @transform_17, window_bounds = array<i64: 16, 32>}, {pipeline_mode = #tpu.pipeline_mode<synchronous>, transform_indices = @transform_18, window_bounds = array<i64: 1, 32>}, {pipeline_mode = #tpu.pipeline_mode<synchronous>, transform_indices = @transform_19, window_bounds = array<i64: 16, 32>}, {pipeline_mode = #tpu.pipeline_mode<synchronous>, transform_indices = @transform_20, window_bounds = array<i64: 1, 32>}, {pipeline_mode = #tpu.pipeline_mode<synchronous>, transform_indices = @transform_21, window_bounds = array<i64: 32, 32>}, {pipeline_mode = #tpu.pipeline_mode<synchronous>, transform_indices = @transform_22, window_bounds = array<i64: 1, 32>}, {pipeline_mode = #tpu.pipeline_mode<synchronous>, transform_indices = @transform_23, window_bounds = array<i64: 32, 10>}, {pipeline_mode = #tpu.pipeline_mode<synchronous>, transform_indices = @transform_24, window_bounds = array<i64: 1, 10>}, {pipeline_mode = #tpu.pipeline_mode<synchronous>, transform_indices = @transform_25, window_bounds = array<i64: 2, 10>}]} {
    %c0 = arith.constant 0 : index
    %c0_0 = arith.constant 0 : index
    %0 = vector.load %arg1[%c0, %c0_0] : memref<2x256xbf16, #tpu.memory_space<vmem>>, vector<2x256xbf16>
    %1 = arith.extf %0 : vector<2x256xbf16> to vector<2x256xf32>
    %2 = arith.truncf %1 : vector<2x256xf32> to vector<2x256xbf16>
    %c0_1 = arith.constant 0 : index
    %c0_2 = arith.constant 0 : index
    %3 = vector.load %arg2[%c0_1, %c0_2] : memref<256x256xbf16, #tpu.memory_space<vmem>>, vector<256x256xbf16>
    %cst = arith.constant dense<0.000000e+00> : vector<2x256xf32>
    %4 = tpu.matmul %2, %3, %cst {dimension_numbers = #tpu.dot_dimension_numbers<[1], [0], [0], [1], [0, 0, 1, 1], [], []>} : vector<2x256xbf16>, vector<256x256xbf16>, vector<2x256xf32> -> vector<2x256xf32>
    %c0_3 = arith.constant 0 : index
    %c0_4 = arith.constant 0 : index
    %5 = vector.load %arg3[%c0_3, %c0_4] : memref<1x256xf32, #tpu.memory_space<vmem>>, vector<1x256xf32>
    %6 = vector.broadcast %5 : vector<1x256xf32> to vector<2x256xf32>
    %7 = arith.addf %4, %6 : vector<2x256xf32>
    %cst_5 = arith.constant 0.000000e+00 : f32
    %8 = vector.broadcast %cst_5 : f32 to vector<2x256xf32>
    %9 = arith.maximumf %7, %8 : vector<2x256xf32>
    %10 = arith.truncf %9 : vector<2x256xf32> to vector<2x256xbf16>
    %c0_6 = arith.constant 0 : index
    %c0_7 = arith.constant 0 : index
    %11 = vector.load %arg4[%c0_6, %c0_7] : memref<256x256xbf16, #tpu.memory_space<vmem>>, vector<256x256xbf16>
    %cst_8 = arith.constant dense<0.000000e+00> : vector<2x256xf32>
    %12 = tpu.matmul %10, %11, %cst_8 {dimension_numbers = #tpu.dot_dimension_numbers<[1], [0], [0], [1], [0, 0, 1, 1], [], []>} : vector<2x256xbf16>, vector<256x256xbf16>, vector<2x256xf32> -> vector<2x256xf32>
    %c0_9 = arith.constant 0 : index
    %c0_10 = arith.constant 0 : index
    %13 = vector.load %arg5[%c0_9, %c0_10] : memref<1x256xf32, #tpu.memory_space<vmem>>, vector<1x256xf32>
    %14 = vector.broadcast %13 : vector<1x256xf32> to vector<2x256xf32>
    %15 = arith.addf %12, %14 : vector<2x256xf32>
    %16 = arith.addf %15, %1 : vector<2x256xf32>
    %cst_11 = arith.constant 0.000000e+00 : f32
    %17 = vector.broadcast %cst_11 : f32 to vector<2x256xf32>
    %18 = arith.maximumf %16, %17 : vector<2x256xf32>
    %19 = arith.truncf %18 : vector<2x256xf32> to vector<2x256xbf16>
    %c0_12 = arith.constant 0 : index
    %c0_13 = arith.constant 0 : index
    %20 = vector.load %arg6[%c0_12, %c0_13] : memref<256x64xbf16, #tpu.memory_space<vmem>>, vector<256x64xbf16>
    %cst_14 = arith.constant dense<0.000000e+00> : vector<2x64xf32>
    %21 = tpu.matmul %19, %20, %cst_14 {dimension_numbers = #tpu.dot_dimension_numbers<[1], [0], [0], [1], [0, 0, 1, 1], [], []>} : vector<2x256xbf16>, vector<256x64xbf16>, vector<2x64xf32> -> vector<2x64xf32>
    %c0_15 = arith.constant 0 : index
    %c0_16 = arith.constant 0 : index
    %22 = vector.load %arg7[%c0_15, %c0_16] : memref<1x64xf32, #tpu.memory_space<vmem>>, vector<1x64xf32>
    %23 = vector.broadcast %22 : vector<1x64xf32> to vector<2x64xf32>
    %24 = arith.addf %21, %23 : vector<2x64xf32>
    %cst_17 = arith.constant 0.000000e+00 : f32
    %25 = vector.broadcast %cst_17 : f32 to vector<2x64xf32>
    %26 = arith.maximumf %24, %25 : vector<2x64xf32>
    %27 = arith.truncf %18 : vector<2x256xf32> to vector<2x256xbf16>
    %c0_18 = arith.constant 0 : index
    %c0_19 = arith.constant 0 : index
    %28 = vector.load %arg8[%c0_18, %c0_19] : memref<256x64xbf16, #tpu.memory_space<vmem>>, vector<256x64xbf16>
    %cst_20 = arith.constant dense<0.000000e+00> : vector<2x64xf32>
    %29 = tpu.matmul %27, %28, %cst_20 {dimension_numbers = #tpu.dot_dimension_numbers<[1], [0], [0], [1], [0, 0, 1, 1], [], []>} : vector<2x256xbf16>, vector<256x64xbf16>, vector<2x64xf32> -> vector<2x64xf32>
    %c0_21 = arith.constant 0 : index
    %c0_22 = arith.constant 0 : index
    %30 = vector.load %arg9[%c0_21, %c0_22] : memref<1x64xf32, #tpu.memory_space<vmem>>, vector<1x64xf32>
    %31 = vector.broadcast %30 : vector<1x64xf32> to vector<2x64xf32>
    %32 = arith.addf %29, %31 : vector<2x64xf32>
    %33 = arith.truncf %26 : vector<2x64xf32> to vector<2x64xbf16>
    %c0_23 = arith.constant 0 : index
    %c0_24 = arith.constant 0 : index
    %34 = vector.load %arg10[%c0_23, %c0_24] : memref<64x64xbf16, #tpu.memory_space<vmem>>, vector<64x64xbf16>
    %cst_25 = arith.constant dense<0.000000e+00> : vector<2x64xf32>
    %35 = tpu.matmul %33, %34, %cst_25 {dimension_numbers = #tpu.dot_dimension_numbers<[1], [0], [0], [1], [0, 0, 1, 1], [], []>} : vector<2x64xbf16>, vector<64x64xbf16>, vector<2x64xf32> -> vector<2x64xf32>
    %c0_26 = arith.constant 0 : index
    %c0_27 = arith.constant 0 : index
    %36 = vector.load %arg11[%c0_26, %c0_27] : memref<1x64xf32, #tpu.memory_space<vmem>>, vector<1x64xf32>
    %37 = vector.broadcast %36 : vector<1x64xf32> to vector<2x64xf32>
    %38 = arith.addf %35, %37 : vector<2x64xf32>
    %39 = arith.addf %38, %32 : vector<2x64xf32>
    %cst_28 = arith.constant 0.000000e+00 : f32
    %40 = vector.broadcast %cst_28 : f32 to vector<2x64xf32>
    %41 = arith.maximumf %39, %40 : vector<2x64xf32>
    %42 = arith.truncf %41 : vector<2x64xf32> to vector<2x64xbf16>
    %c0_29 = arith.constant 0 : index
    %c0_30 = arith.constant 0 : index
    %43 = vector.load %arg12[%c0_29, %c0_30] : memref<64x16xbf16, #tpu.memory_space<vmem>>, vector<64x16xbf16>
    %cst_31 = arith.constant dense<0.000000e+00> : vector<2x16xf32>
    %44 = tpu.matmul %42, %43, %cst_31 {dimension_numbers = #tpu.dot_dimension_numbers<[1], [0], [0], [1], [0, 0, 1, 1], [], []>} : vector<2x64xbf16>, vector<64x16xbf16>, vector<2x16xf32> -> vector<2x16xf32>
    %c0_32 = arith.constant 0 : index
    %c0_33 = arith.constant 0 : index
    %45 = vector.load %arg13[%c0_32, %c0_33] : memref<1x16xf32, #tpu.memory_space<vmem>>, vector<1x16xf32>
    %46 = vector.broadcast %45 : vector<1x16xf32> to vector<2x16xf32>
    %47 = arith.addf %44, %46 : vector<2x16xf32>
    %cst_34 = arith.constant 0.000000e+00 : f32
    %48 = vector.broadcast %cst_34 : f32 to vector<2x16xf32>
    %49 = arith.maximumf %47, %48 : vector<2x16xf32>
    %50 = arith.truncf %41 : vector<2x64xf32> to vector<2x64xbf16>
    %c0_35 = arith.constant 0 : index
    %c0_36 = arith.constant 0 : index
    %51 = vector.load %arg14[%c0_35, %c0_36] : memref<64x16xbf16, #tpu.memory_space<vmem>>, vector<64x16xbf16>
    %cst_37 = arith.constant dense<0.000000e+00> : vector<2x16xf32>
    %52 = tpu.matmul %50, %51, %cst_37 {dimension_numbers = #tpu.dot_dimension_numbers<[1], [0], [0], [1], [0, 0, 1, 1], [], []>} : vector<2x64xbf16>, vector<64x16xbf16>, vector<2x16xf32> -> vector<2x16xf32>
    %c0_38 = arith.constant 0 : index
    %c0_39 = arith.constant 0 : index
    %53 = vector.load %arg15[%c0_38, %c0_39] : memref<1x16xf32, #tpu.memory_space<vmem>>, vector<1x16xf32>
    %54 = vector.broadcast %53 : vector<1x16xf32> to vector<2x16xf32>
    %55 = arith.addf %52, %54 : vector<2x16xf32>
    %56 = arith.truncf %49 : vector<2x16xf32> to vector<2x16xbf16>
    %c0_40 = arith.constant 0 : index
    %c0_41 = arith.constant 0 : index
    %57 = vector.load %arg16[%c0_40, %c0_41] : memref<16x16xbf16, #tpu.memory_space<vmem>>, vector<16x16xbf16>
    %cst_42 = arith.constant dense<0.000000e+00> : vector<2x16xf32>
    %58 = tpu.matmul %56, %57, %cst_42 {dimension_numbers = #tpu.dot_dimension_numbers<[1], [0], [0], [1], [0, 0, 1, 1], [], []>} : vector<2x16xbf16>, vector<16x16xbf16>, vector<2x16xf32> -> vector<2x16xf32>
    %c0_43 = arith.constant 0 : index
    %c0_44 = arith.constant 0 : index
    %59 = vector.load %arg17[%c0_43, %c0_44] : memref<1x16xf32, #tpu.memory_space<vmem>>, vector<1x16xf32>
    %60 = vector.broadcast %59 : vector<1x16xf32> to vector<2x16xf32>
    %61 = arith.addf %58, %60 : vector<2x16xf32>
    %62 = arith.addf %61, %55 : vector<2x16xf32>
    %cst_45 = arith.constant 0.000000e+00 : f32
    %63 = vector.broadcast %cst_45 : f32 to vector<2x16xf32>
    %64 = arith.maximumf %62, %63 : vector<2x16xf32>
    %65 = arith.truncf %64 : vector<2x16xf32> to vector<2x16xbf16>
    %c0_46 = arith.constant 0 : index
    %c0_47 = arith.constant 0 : index
    %66 = vector.load %arg18[%c0_46, %c0_47] : memref<16x32xbf16, #tpu.memory_space<vmem>>, vector<16x32xbf16>
    %cst_48 = arith.constant dense<0.000000e+00> : vector<2x32xf32>
    %67 = tpu.matmul %65, %66, %cst_48 {dimension_numbers = #tpu.dot_dimension_numbers<[1], [0], [0], [1], [0, 0, 1, 1], [], []>} : vector<2x16xbf16>, vector<16x32xbf16>, vector<2x32xf32> -> vector<2x32xf32>
    %c0_49 = arith.constant 0 : index
    %c0_50 = arith.constant 0 : index
    %68 = vector.load %arg19[%c0_49, %c0_50] : memref<1x32xf32, #tpu.memory_space<vmem>>, vector<1x32xf32>
    %69 = vector.broadcast %68 : vector<1x32xf32> to vector<2x32xf32>
    %70 = arith.addf %67, %69 : vector<2x32xf32>
    %cst_51 = arith.constant 0.000000e+00 : f32
    %71 = vector.broadcast %cst_51 : f32 to vector<2x32xf32>
    %72 = arith.maximumf %70, %71 : vector<2x32xf32>
    %73 = arith.truncf %64 : vector<2x16xf32> to vector<2x16xbf16>
    %c0_52 = arith.constant 0 : index
    %c0_53 = arith.constant 0 : index
    %74 = vector.load %arg20[%c0_52, %c0_53] : memref<16x32xbf16, #tpu.memory_space<vmem>>, vector<16x32xbf16>
    %cst_54 = arith.constant dense<0.000000e+00> : vector<2x32xf32>
    %75 = tpu.matmul %73, %74, %cst_54 {dimension_numbers = #tpu.dot_dimension_numbers<[1], [0], [0], [1], [0, 0, 1, 1], [], []>} : vector<2x16xbf16>, vector<16x32xbf16>, vector<2x32xf32> -> vector<2x32xf32>
    %c0_55 = arith.constant 0 : index
    %c0_56 = arith.constant 0 : index
    %76 = vector.load %arg21[%c0_55, %c0_56] : memref<1x32xf32, #tpu.memory_space<vmem>>, vector<1x32xf32>
    %77 = vector.broadcast %76 : vector<1x32xf32> to vector<2x32xf32>
    %78 = arith.addf %75, %77 : vector<2x32xf32>
    %79 = arith.truncf %72 : vector<2x32xf32> to vector<2x32xbf16>
    %c0_57 = arith.constant 0 : index
    %c0_58 = arith.constant 0 : index
    %80 = vector.load %arg22[%c0_57, %c0_58] : memref<32x32xbf16, #tpu.memory_space<vmem>>, vector<32x32xbf16>
    %cst_59 = arith.constant dense<0.000000e+00> : vector<2x32xf32>
    %81 = tpu.matmul %79, %80, %cst_59 {dimension_numbers = #tpu.dot_dimension_numbers<[1], [0], [0], [1], [0, 0, 1, 1], [], []>} : vector<2x32xbf16>, vector<32x32xbf16>, vector<2x32xf32> -> vector<2x32xf32>
    %c0_60 = arith.constant 0 : index
    %c0_61 = arith.constant 0 : index
    %82 = vector.load %arg23[%c0_60, %c0_61] : memref<1x32xf32, #tpu.memory_space<vmem>>, vector<1x32xf32>
    %83 = vector.broadcast %82 : vector<1x32xf32> to vector<2x32xf32>
    %84 = arith.addf %81, %83 : vector<2x32xf32>
    %85 = arith.addf %84, %78 : vector<2x32xf32>
    %cst_62 = arith.constant 0.000000e+00 : f32
    %86 = vector.broadcast %cst_62 : f32 to vector<2x32xf32>
    %87 = arith.maximumf %85, %86 : vector<2x32xf32>
    %88 = arith.truncf %87 : vector<2x32xf32> to vector<2x32xbf16>
    %c0_63 = arith.constant 0 : index
    %c0_64 = arith.constant 0 : index
    %89 = vector.load %arg24[%c0_63, %c0_64] : memref<32x10xbf16, #tpu.memory_space<vmem>>, vector<32x10xbf16>
    %cst_65 = arith.constant dense<0.000000e+00> : vector<2x10xf32>
    %90 = tpu.matmul %88, %89, %cst_65 {dimension_numbers = #tpu.dot_dimension_numbers<[1], [0], [0], [1], [0, 0, 1, 1], [], []>} : vector<2x32xbf16>, vector<32x10xbf16>, vector<2x10xf32> -> vector<2x10xf32>
    %c0_66 = arith.constant 0 : index
    %c0_67 = arith.constant 0 : index
    %91 = vector.load %arg25[%c0_66, %c0_67] : memref<1x10xf32, #tpu.memory_space<vmem>>, vector<1x10xf32>
    %92 = vector.broadcast %91 : vector<1x10xf32> to vector<2x10xf32>
    %93 = arith.addf %90, %92 : vector<2x10xf32>
    %c0_68 = arith.constant 0 : index
    %c0_69 = arith.constant 0 : index
    %94 = vector.load %arg26[%c0_68, %c0_69] : memref<2x10xf32, #tpu.memory_space<vmem>>, vector<2x10xf32>
    tpu.vector_store %arg26[%c0_68, %c0_69], %93 {strides = array<i32>} : memref<2x10xf32, #tpu.memory_space<vmem>>, vector<2x10xf32>,
    return
  }
  func.func @transform_0(%arg0: i32) -> (i32, i32) {
    %c0_i32 = arith.constant 0 : i32
    %c0_i32_0 = arith.constant 0 : i32
    %c0_i32_1 = arith.constant 0 : i32
    return %c0_i32, %c0_i32_0 : i32, i32
  }
  func.func @transform_1(%arg0: i32) -> (i32, i32) {
    %c0_i32 = arith.constant 0 : i32
    %c0_i32_0 = arith.constant 0 : i32
    %c0_i32_1 = arith.constant 0 : i32
    return %c0_i32, %c0_i32_0 : i32, i32
  }
  func.func @transform_2(%arg0: i32) -> (i32, i32) {
    %c0_i32 = arith.constant 0 : i32
    %c0_i32_0 = arith.constant 0 : i32
    %c0_i32_1 = arith.constant 0 : i32
    return %c0_i32, %c0_i32_0 : i32, i32
  }
  func.func @transform_3(%arg0: i32) -> (i32, i32) {
    %c0_i32 = arith.constant 0 : i32
    %c0_i32_0 = arith.constant 0 : i32
    %c0_i32_1 = arith.constant 0 : i32
    return %c0_i32, %c0_i32_0 : i32, i32
  }
  func.func @transform_4(%arg0: i32) -> (i32, i32) {
    %c0_i32 = arith.constant 0 : i32
    %c0_i32_0 = arith.constant 0 : i32
    %c0_i32_1 = arith.constant 0 : i32
    return %c0_i32, %c0_i32_0 : i32, i32
  }
  func.func @transform_5(%arg0: i32) -> (i32, i32) {
    %c0_i32 = arith.constant 0 : i32
    %c0_i32_0 = arith.constant 0 : i32
    %c0_i32_1 = arith.constant 0 : i32
    return %c0_i32, %c0_i32_0 : i32, i32
  }
  func.func @transform_6(%arg0: i32) -> (i32, i32) {
    %c0_i32 = arith.constant 0 : i32
    %c0_i32_0 = arith.constant 0 : i32
    %c0_i32_1 = arith.constant 0 : i32
    return %c0_i32, %c0_i32_0 : i32, i32
  }
  func.func @transform_7(%arg0: i32) -> (i32, i32) {
    %c0_i32 = arith.constant 0 : i32
    %c0_i32_0 = arith.constant 0 : i32
    %c0_i32_1 = arith.constant 0 : i32
    return %c0_i32, %c0_i32_0 : i32, i32
  }
  func.func @transform_8(%arg0: i32) -> (i32, i32) {
    %c0_i32 = arith.constant 0 : i32
    %c0_i32_0 = arith.constant 0 : i32
    %c0_i32_1 = arith.constant 0 : i32
    return %c0_i32, %c0_i32_0 : i32, i32
  }
  func.func @transform_9(%arg0: i32) -> (i32, i32) {
    %c0_i32 = arith.constant 0 : i32
    %c0_i32_0 = arith.constant 0 : i32
    %c0_i32_1 = arith.constant 0 : i32
    return %c0_i32, %c0_i32_0 : i32, i32
  }
  func.func @transform_10(%arg0: i32) -> (i32, i32) {
    %c0_i32 = arith.constant 0 : i32
    %c0_i32_0 = arith.constant 0 : i32
    %c0_i32_1 = arith.constant 0 : i32
    return %c0_i32, %c0_i32_0 : i32, i32
  }
  func.func @transform_11(%arg0: i32) -> (i32, i32) {
    %c0_i32 = arith.constant 0 : i32
    %c0_i32_0 = arith.constant 0 : i32
    %c0_i32_1 = arith.constant 0 : i32
    return %c0_i32, %c0_i32_0 : i32, i32
  }
  func.func @transform_12(%arg0: i32) -> (i32, i32) {
    %c0_i32 = arith.constant 0 : i32
    %c0_i32_0 = arith.constant 0 : i32
    %c0_i32_1 = arith.constant 0 : i32
    return %c0_i32, %c0_i32_0 : i32, i32
  }
  func.func @transform_13(%arg0: i32) -> (i32, i32) {
    %c0_i32 = arith.constant 0 : i32
    %c0_i32_0 = arith.constant 0 : i32
    %c0_i32_1 = arith.constant 0 : i32
    return %c0_i32, %c0_i32_0 : i32, i32
  }
  func.func @transform_14(%arg0: i32) -> (i32, i32) {
    %c0_i32 = arith.constant 0 : i32
    %c0_i32_0 = arith.constant 0 : i32
    %c0_i32_1 = arith.constant 0 : i32
    return %c0_i32, %c0_i32_0 : i32, i32
  }
  func.func @transform_15(%arg0: i32) -> (i32, i32) {
    %c0_i32 = arith.constant 0 : i32
    %c0_i32_0 = arith.constant 0 : i32
    %c0_i32_1 = arith.constant 0 : i32
    return %c0_i32, %c0_i32_0 : i32, i32
  }
  func.func @transform_16(%arg0: i32) -> (i32, i32) {
    %c0_i32 = arith.constant 0 : i32
    %c0_i32_0 = arith.constant 0 : i32
    %c0_i32_1 = arith.constant 0 : i32
    return %c0_i32, %c0_i32_0 : i32, i32
  }
  func.func @transform_17(%arg0: i32) -> (i32, i32) {
    %c0_i32 = arith.constant 0 : i32
    %c0_i32_0 = arith.constant 0 : i32
    %c0_i32_1 = arith.constant 0 : i32
    return %c0_i32, %c0_i32_0 : i32, i32
  }
  func.func @transform_18(%arg0: i32) -> (i32, i32) {
    %c0_i32 = arith.constant 0 : i32
    %c0_i32_0 = arith.constant 0 : i32
    %c0_i32_1 = arith.constant 0 : i32
    return %c0_i32, %c0_i32_0 : i32, i32
  }
  func.func @transform_19(%arg0: i32) -> (i32, i32) {
    %c0_i32 = arith.constant 0 : i32
    %c0_i32_0 = arith.constant 0 : i32
    %c0_i32_1 = arith.constant 0 : i32
    return %c0_i32, %c0_i32_0 : i32, i32
  }
  func.func @transform_20(%arg0: i32) -> (i32, i32) {
    %c0_i32 = arith.constant 0 : i32
    %c0_i32_0 = arith.constant 0 : i32
    %c0_i32_1 = arith.constant 0 : i32
    return %c0_i32, %c0_i32_0 : i32, i32
  }
  func.func @transform_21(%arg0: i32) -> (i32, i32) {
    %c0_i32 = arith.constant 0 : i32
    %c0_i32_0 = arith.constant 0 : i32
    %c0_i32_1 = arith.constant 0 : i32
    return %c0_i32, %c0_i32_0 : i32, i32
  }
  func.func @transform_22(%arg0: i32) -> (i32, i32) {
    %c0_i32 = arith.constant 0 : i32
    %c0_i32_0 = arith.constant 0 : i32
    %c0_i32_1 = arith.constant 0 : i32
    return %c0_i32, %c0_i32_0 : i32, i32
  }
  func.func @transform_23(%arg0: i32) -> (i32, i32) {
    %c0_i32 = arith.constant 0 : i32
    %c0_i32_0 = arith.constant 0 : i32
    %c0_i32_1 = arith.constant 0 : i32
    return %c0_i32, %c0_i32_0 : i32, i32
  }
  func.func @transform_24(%arg0: i32) -> (i32, i32) {
    %c0_i32 = arith.constant 0 : i32
    %c0_i32_0 = arith.constant 0 : i32
    %c0_i32_1 = arith.constant 0 : i32
    return %c0_i32, %c0_i32_0 : i32, i32
  }
  func.func @transform_25(%arg0: i32) -> (i32, i32) {
    %c0_i32 = arith.constant 0 : i32
    %c0_i32_0 = arith.constant 0 : i32
    %c0_i32_1 = arith.constant 0 : i32
    return %c0_i32, %c0_i32_0 : i32, i32
  }
}

</mosaic_0001>

<bundles_post_ra>
// kernel: resnet_forward.2
= control target key start
LH: loop header
LB: loop body
LE: loop exit
PB: predicated region body
PF: predicated region fallthrough
CT: control target
= control target key end

     0   :  { %s5935_s12 = smov 0   ;;  %s7983_s0 = inlined_call_operand.vmem [shape: bf16[504,66], index: 0, kind: input, shape index: {}]   ;;  %s7984_s1 = inlined_call_operand.vmem [shape: bf16[21,66,32], index: 1, kind: input, shape index: {}]   ;;  %s7985_s2 = inlined_call_operand.vmem [shape: f32[1,32], index: 2, kind: input, shape index: {}]   ;;  %s7986_s3 = inlined_call_operand.vmem [shape: bf16[448,32], index: 3, kind: output, shape index: {}]  }
   0x1 LB: > { %s4203_s13 = sadd.s32 4294967295, %s5911_s12   ;;  %p4206_p0 = scmp.ge.s32.totalorder %s5911_s12, 1  ;;  %s5911_s12 = sphi %s5935_s12, %s13_s12  }
   0x2   : > { %p127_p1 = scmp.lt.s32.totalorder %s5911_s12, 5 }
   0x4   : > { %p128_p2 = pnand %p4206_p0, %p127_p1 }
   0x6   : > { %131 = sbr.rel (%p128_p2) target bundleno = 824 (0x338), region = 32 }
   0xb   : > { %v5765_v0 = vld [vmem:[%s7984_s1 + $0x44] ss:$0 sps:$4 sm:$0x11]   ;;  %v7991_v1 = vmov 0.0   ;;  %vm346_vm0 = vcmask 1040384   ;;  %v5766_v3 = vld [vmem:[%s7984_s1 + $0x3c] sm:$0xff]  }
   0xc   : > { %5745 = vmatprep.subr.bf16.mxu1 %v7991_v1  ;;  %4947 = vmatprep.subr.bf16.mxu0 %v7991_v1  ;;  %v348_v2 = vsel %vm346_vm0, %v5765_v0, 0  ;;  %s153_s18 = smul.u32 112, %s4203_s13  ;;  %vm5914_vm1 = vmmov 0   ;;  %v5767_v4 = vld [vmem:[%s7984_s1 + $0x34] sm:$0xff]   ;;  %v5768_v5 = vld [vmem:[%s7984_s1 + $0x2c] sm:$0xff]   ;;  %v5769_v25 = vld [vmem:[%s7984_s1 + $0x24] sm:$0xff]  }
   0xd   : > { %5750 = vmatpush3.bf16.msra.mxu1 %v348_v2  ;;  %4948 = vmatpush3.bf16.msra.mxu0 %v348_v2  ;;  %v5772_v12 = vld [vmem:[%s7984_s1 + $0x20] ss:$0 sps:$4 sm:$0x11]   ;;  %vm236_vm2 = vsmask.f32 7424  ;;  %vm324_vm3 = vcmask 539648  }
   0xe   : > { %5746 = vmatprep.subr.bf16.mxu1 %v7991_v1  ;;  %4949 = vmatprep.subr.bf16.mxu0 %v7991_v1  ;;  %s154_s19 = sshra.s32 %s153_s18, 3  ;;  %v481_v36 = vsel %vm346_vm0, %v5772_v12, 0  ;;  %v5777_v39 = vld [vmem:[%s7984_s1 + $0x68] ss:$0 sps:$4 sm:$0x11]   ;;  %v5776_v50 = vld [vmem:[%s7984_s1 + $0x18] sm:$0xff]  }
   0xf   : > { %4969 = vmatprep.mubr.msk.bf16.mxu1 %vm5914_vm1, %v7991_v1  ;;  %4957 = vmatprep.mubr.msk.bf16.mxu0 %vm5914_vm1, %v7991_v1  ;;  %s4208_s22 = sshll.u32 %s154_s19, 2  ;;  %v647_v47 = vsel %vm346_vm0, %v5777_v39, 0  ;;  %v5781_v54 = vld [vmem:[%s7984_s1 + $0x60] sm:$0xff]   ;;  %v5780_v55 = vld [vmem:[%s7984_s1 + $0x10] sm:$0xff]   ;;  %v5783_v57 = vld [vmem:[%s7984_s1 + $0x58] sm:$0xff]   ;;  %vm960_vm4 = vcmask 1045504  }
  0x10   : > { %s5968_s25 = scalar_lea.vmem %s7983_s0, %s4208_s22  ;;  %vm582_vm5 = vcmask 1046528   ;;  %vm1336_vm6 = vcmask 1044480   ;;  %vm762_vm7 = vsmask.f32 6400  ;;  %vm1140_vm8 = vsmask.f32 5376 }
  0x11   : > { %5751 = vmatpush3.bf16.msra.mxu1 %v5766_v3  ;;  %4950 = vmatpush3.bf16.msra.mxu0 %v5766_v3  ;;  %v164_v6 = vld [vmem:[%s5968_s25 + $0x18] sm:$0xf]  ;;  %v165_v7 = vld [vmem:[%s5968_s25 + $0x1c] sm:$0xf]  ;;  %v166_v8 = vld [vmem:[%s5968_s25 + $0x20] sm:$0xf] }
  0x12   : > { %5747 = vmatprep.subr.bf16.mxu1 %v7991_v1  ;;  %4951 = vmatprep.subr.bf16.mxu0 %v7991_v1  ;;  %v167_v9 = vld [vmem:[%s5968_s25 + $0x24] sm:$0xf]  ;;  %v5977_v10 = vcombine.low %v164_v6, %v165_v7  ;;  %v160_v13 = vld [vmem:[%s5968_s25 + $0x8] sm:$0xf]  ;;  %v161_v14 = vld [vmem:[%s5968_s25 + $0xc] sm:$0xf] }
  0x13   : > { %v5979_v11 = vcombine.low %v166_v8, %v167_v9  ;;  %v5987_v15 = vld [vmem:[%s5968_s25] sm:$0xff]   ;;  %v5997_v18 = vcombine.low %v160_v13, %v161_v14  ;;  %v168_v19 = vld [vmem:[%s5968_s25 + $0x28] sm:$0xf]  ;;  %v169_v20 = vld [vmem:[%s5968_s25 + $0x2c] sm:$0xf]  ;;  %vm4142_vm10 = vcmask 257024  }
  0x14   : > { %v5992_v16 = vshll.u32 %v5977_v10, 16  ;;  %v5995_v17 = vshrl.u32 %v5977_v10, 16  ;;  %v6005_v22 = vshrl.u32 %v5987_v15, 16  ;;  %v6008_v23 = vshll.u32 %v5987_v15, 16  ;;  %v162_v24 = vld [vmem:[%s5968_s25 + $0x10] sm:$0xf] }
  0x15   : > { %5752 = vmatpush3.bf16.msra.mxu1 %v5767_v4  ;;  %4952 = vmatpush3.bf16.msra.mxu0 %v5767_v4  ;;  %v6002_v21 = vshll.u32 %v5979_v11, 16  ;;  %v6016_v27 = vshll.u32 %v5997_v18, 16  ;;  %v6018_v28 = vcombine.low %v168_v19, %v169_v20  ;;  %v163_v29 = vld [vmem:[%s5968_s25 + $0x14] sm:$0xf]  ;;  %v6036_v38 = vshrl.u32 %v5979_v11, 16  ;;  %v5784_v3 = vld [vmem:[%s7984_s1 + $0x8] sm:$0xff]  }
  0x16   : > { %5748 = vmatprep.subr.bf16.mxu1 %v7991_v1  ;;  %4953 = vmatprep.subr.bf16.mxu0 %v7991_v1  ;;  %v263_v26 = vrot.slane %v5992_v16, 1  ;;  %v242_v31 = vrot.slane %v6008_v23, 1  ;;  %v6023_v32 = vcombine.low %v162_v24, %v163_v29  ;;  %v6031_v35 = vcombine.low %v163_v29, %v164_v6  ;;  %v170_v45 = vld [vmem:[%s5968_s25 + $0x30] sm:$0xf]  ;;  %v171_v46 = vld [vmem:[%s5968_s25 + $0x34] sm:$0xf] }
  0x17   : > { %v271_v30 = vrot.slane %v6002_v21, 1  ;;  %v247_v34 = vrot.slane %v6016_v27, 1  ;;  %v6042_v40 = vshrl.u32 %v5997_v18, 16  ;;  %v6045_v41 = vshll.u32 %v6018_v28, 16  ;;  %v172_v62 = vld [vmem:[%s5968_s25 + $0x38] sm:$0xf] }
  0x18   : > { %v267_v33 = vor.u32 %v5995_v17, %v263_v26  ;;  %v243_v37 = vor.u32 %v242_v31, %v6005_v22  ;;  %v6048_v42 = vshll.u32 %v6023_v32, 16  ;;  %v6071_v53 = vcombine.low %v170_v45, %v171_v46  ;;  %v5789_v20 = vld [vmem:[%s7984_s1] sm:$0xff]   ;;  %v5788_v24 = vld [vmem:[%s7984_s1 + $0x48] sm:$0xff]  }
  0x19   : > { %5753 = vmatpush3.bf16.msra.mxu1 %v5768_v5  ;;  %4954 = vmatpush3.bf16.msra.mxu0 %v5768_v5  ;;  %v275_v48 = vor.u32 %v6036_v38, %v271_v30  ;;  %v279_v49 = vrot.slane %v6045_v41, 1  ;;  %v251_v51 = vor.u32 %v6042_v40, %v247_v34  ;;  %v6084_v56 = vshrl.u32 %v6018_v28, 16  ;;  %v5785_v5 = vld [vmem:[%s7984_s1 + $0x50] sm:$0xff]  }
  0x1a   : > { %5749 = vmatprep.subr.bf16.mxu1 %v7991_v1  ;;  %4955 = vmatprep.subr.bf16.mxu0 %v7991_v1  ;;  %v6051_v43 = vsel %vm236_vm2, %v267_v33, %v271_v30  ;;  %v248_v44 = vsel %vm236_vm2, %v243_v37, %v247_v34  ;;  %v255_v52 = vrot.slane %v6048_v42, 1  ;;  %v6094_v60 = vshll.u32 %v6071_v53, 16  ;;  %v5791_v37 = vld [vmem:[%s7984_s1 + $0xb0] ss:$0 sps:$4 sm:$0x11]  }
  0x1b   : > { %8002 = vst [vmem:[#allocation2_spill] sm:$0xff] %v6051_v43  ;;  %v6090_v58 = vsel %vm236_vm2, %v275_v48, %v279_v49  ;;  %v6097_v61 = vshrl.u32 %v6023_v32, 16  ;;  %v283_v63 = vor.u32 %v6084_v56, %v279_v49  ;;  %v6113_v4 = vcombine.low %v172_v62, %v172_v62  ;;  %v5790_v49 = vld [vmem:[%s7984_s1 + $0x8c] ss:$0 sps:$4 sm:$0x11]  }
  0x1c   : > { %8003 = vst [vmem:[#allocation3_spill] sm:$0xff] %v6090_v58  ;;  %v256_v59 = vsel %vm236_vm2, %v251_v51, %v255_v52  ;;  %v287_v0 = vrot.slane %v6094_v60, 1  ;;  %v961_v6 = vrot.slane %v5987_v15, 2  ;;  %v6124_v7 = vshrl.u32 %v6071_v53, 16 }
  0x1d   : > { %5754 = vmatpush3.bf16.msra.mxu1 %v5769_v25  ;;  %4956 = vmatpush3.bf16.msra.mxu0 %v5769_v25  ;;  %v259_v2 = vor.u32 %v6097_v61, %v255_v52  ;;  %v962_v8 = vrot.slane %v5997_v18, 2  ;;  %v763_v9 = vrot.slane %v6005_v22, 1  ;;  %v764_v12 = vrot.slane %v6008_v23, 2 }
  0x1e   : > { %4985 = vmatprep.subr.bf16.mxu1 %v7991_v1  ;;  %5023 = vmatprep.subr.bf16.mxu0 %v7991_v1  ;;  %v6130_v13 = vsel %vm236_vm2, %v283_v63, %v287_v0  ;;  %v6136_v19 = vshll.u32 %v6113_v4, 16  ;;  %v583_v30 = vrot.slane %v5987_v15, 1  ;;  %v6159_v31 = vor.u32 %v6124_v7, %v287_v0 }
  0x1f   : > { %8004 = vst [vmem:[#allocation4_spill] sm:$0xff] %v6130_v13  ;;  %v264_v14 = vsel %vm236_vm2, %v259_v2, %v263_v26  ;;  %v6146_v25 = vsel %vm960_vm4, %v961_v6, %v962_v8  ;;  %v6148_v29 = vor.u32 %v764_v12, %v763_v9  ;;  %v964_v26 = vrot.slane %v6023_v32, 2  ;;  %v5799_v12 = vld [vmem:[%s7984_s1 + $0x90] sm:$0xff]  }
  0x20   : > { %4970 = vmatmul.mubr.msk.bf16.vlgmr.msra.gmra.mxu1 %vm324_vm3, %v6051_v43  ;;  %4958 = vmatmul.mubr.msk.bf16.vlgmr.msra.gmra.mxu0 %vm324_vm3, %v248_v44  ;;  %8005 = vst [vmem:[#allocation5_spill] sm:$0xff] %v6159_v31  ;;  %v295_v33 = vrot.slane %v6136_v19, 1  ;;  %v584_v34 = vrot.slane %v5997_v18, 1  ;;  %v1025_v45 = vsel %vm346_vm0, %v5791_v37, 0  ;;  %v586_v46 = vrot.slane %v6023_v32, 1 }
  0x21   : > { %4986 = vmatpush3.bf16.msra.mxu1 %v481_v36  ;;  %4973 = vmatprep.mubr.msk.bf16.mxu1 %vm5914_vm1, %v7991_v1  ;;  %v6166_v36 = vsel %vm960_vm4, %v962_v8, %v964_v26  ;;  %v790_v48 = vshrl.u32 %v6113_v4, 16  ;;  %v1337_v52 = vrot.slane %v5987_v15, 3  ;;  %v1340_v63 = vrot.slane %v6023_v32, 3  ;;  %v5797_v8 = vld [vmem:[%s7984_s1 + $0x98] sm:$0xff]  }
  0x22   : > { %4987 = vmatprep.subr.bf16.mxu1 %v7991_v1  ;;  %5024 = vmatpush3.bf16.msra.mxu0 %v647_v47  ;;  %v296_v39 = vsel %vm236_vm2, %v6159_v31, %v295_v33  ;;  %v585_v44 = vsel %vm582_vm5, %v583_v30, %v584_v34  ;;  %v5793_v47 = vld [vmem:[%s7984_s1 + $0xa8] sm:$0xff]   ;;  %v587_v0 = vsel %vm582_vm5, %v584_v34, %v586_v46  ;;  %v588_v6 = vrot.slane %v5977_v10, 1 }
  0x23   : > { %4961 = vmatprep.mubr.msk.bf16.mxu0 %vm5914_vm1, %v7991_v1  ;;  %5025 = vmatprep.subr.bf16.mxu0 %v7991_v1  ;;  %v792_v51 = vrot.slane %v790_v48, 1  ;;  %v592_v30 = vrot.slane %v6018_v28, 1  ;;  %v6283_v34 = vrot.slane %v6071_v53, 1  ;;  %v1168_v37 = vrot.slane %v790_v48, 2 }
  0x24   : > { %v589_v9 = vsel %vm582_vm5, %v586_v46, %v588_v6  ;;  %v596_v46 = vrot.slane %v6113_v4, 1  ;;  %v766_v48 = vrot.slane %v6042_v40, 1  ;;  %vm1675_vm9 = vsmask.f32 4352 }
  0x25   : > { %4988 = vmatpush3.bf16.msra.mxu1 %v5776_v50  ;;  %v793_v50 = vrot.slane %v6136_v19, 2  ;;  %8008 = vst [vmem:[#allocation8_spill] sm:$0xff] %v6283_v34 }
  0x26   : > { %4989 = vmatprep.subr.bf16.mxu1 %v7991_v1  ;;  %5026 = vmatpush3.bf16.msra.mxu0 %v5781_v54  ;;  %v1338_v54 = vrot.slane %v5997_v18, 3 }
  0x27   : > { %5027 = vmatprep.subr.bf16.mxu0 %v7991_v1 }
  0x28   : > { %4974 = vmatmul.mubr.msk.bf16.gmra.mxu1 %vm324_vm3, %v6090_v58  ;;  %4962 = vmatmul.mubr.msk.bf16.gmra.mxu0 %vm324_vm3, %v256_v59  ;;  %v1142_v59 = vrot.slane %v6008_v23, 3  ;;  %v6204_v62 = vsel %vm1336_vm6, %v1337_v52, %v1338_v54  ;;  %v5795_v23 = vld [vmem:[%s7984_s1 + $0xa0] sm:$0xff]   ;;  %v5803_v52 = vld [vmem:[%s7984_s1 + $0xf0] sm:$0xff]  }
  0x29   : > { %4990 = vmatpush3.bf16.msra.mxu1 %v5780_v55  ;;  %4977 = vmatprep.mubr.msk.bf16.mxu1 %vm5914_vm1, %v7991_v1  ;;  %v1141_v55 = vrot.slane %v6005_v22, 2  ;;  %v6215_v22 = vsel %vm1336_vm6, %v1338_v54, %v1340_v63  ;;  %v5800_v54 = vld [vmem:[%s7984_s1 + $0xd4] ss:$0 sps:$4 sm:$0x11]  }
  0x2a   : > { %5028 = vmatpush3.bf16.msra.mxu0 %v5783_v57  ;;  %4965 = vmatprep.mubr.msk.bf16.mxu0 %vm5914_vm1, %v7991_v1  ;;  %v6200_v57 = vor.u32 %v793_v50, %v792_v51 }
  0x2b   : > { %4991 = vmatprep.subr.bf16.mxu1 %v7991_v1  ;;  %5029 = vmatprep.subr.bf16.mxu0 %v7991_v1  ;;  %v6208_v2 = vor.u32 %v1142_v59, %v1141_v55  ;;  %v770_v55 = vrot.slane %v6097_v61, 1  ;;  %v771_v59 = vrot.slane %v6048_v42, 2 }
  0x2d   : > { %4992 = vmatpush3.bf16.msra.mxu1 %v5784_v3  ;;  %v845_v3 = vsel %vm346_vm0, %v5790_v49, 0  ;;  %v767_v49 = vrot.slane %v6016_v27, 2 }
  0x2e   : > { %5030 = vmatpush3.bf16.msra.mxu0 %v5785_v5  ;;  %4993 = vmatprep.subr.bf16.mxu1 %v7991_v1  ;;  %v5792_v5 = vld [vmem:[%s7984_s1 + $0x84] sm:$0xff]  }
  0x2f   : > { %5031 = vmatprep.subr.bf16.mxu0 %v7991_v1  ;;  %v768_v51 = vor.u32 %v767_v49, %v766_v48  ;;  %v970_v48 = vrot.slane %v6018_v28, 2 }
  0x30   : > { %4978 = vmatmul.mubr.msk.bf16.gmra.mxu1 %vm324_vm3, %v6130_v13  ;;  %4966 = vmatmul.mubr.msk.bf16.gmra.mxu0 %vm324_vm3, %v264_v14  ;;  %v590_v14 = vrot.slane %v5979_v11, 1 }
  0x31   : > { %4981 = vmatprep.mubr.msk.bf16.mxu1 %vm5914_vm1, %v7991_v1  ;;  %4994 = vmatpush3.bf16.msra.mxu1 %v5789_v20  ;;  %v5796_v20 = vld [vmem:[%s7984_s1 + $0x74] sm:$0xff]  }
  0x32   : > { %5032 = vmatpush3.bf16.msra.mxu0 %v5788_v24  ;;  %5033 = vmatprep.mubr.msk.bf16.mxu0 %vm5914_vm1, %v7991_v1  ;;  %v6262_v24 = vsel %vm582_vm5, %v588_v6, %v590_v14  ;;  %v6276_v33 = vsel %vm582_vm5, %v590_v14, %v592_v30  ;;  %v5809_v14 = vld [vmem:[%s7984_s1 + $0xd8] sm:$0xff]  }
  0x33   : > { %5061 = vmatprep.subr.bf16.mxu1 %v7991_v1  ;;  %5099 = vmatprep.subr.bf16.mxu0 %v7991_v1  ;;  %8006 = vst [vmem:[#allocation6_spill] sm:$0xff] %v6262_v24  ;;  %8007 = vst [vmem:[#allocation7_spill] sm:$0xff] %v6276_v33 }
  0x38   : > { %4982 = vmatmul.mubr.msk.bf16.gmra.mxu1 %vm324_vm3, %v296_v39  ;;  %5034 = vmatmul.mubr.msk.bf16.vlgmr.msra.gmra.mxu0 %vm324_vm3, %v585_v44  ;;  %v1169_v39 = vrot.slane %v6136_v19, 3  ;;  %v6294_v44 = vsel %vm582_vm5, %v592_v30, %v6283_v34  ;;  %v597_v19 = vsel %vm582_vm5, %v6283_v34, %v596_v46  ;;  %v779_v46 = vrot.slane %v6002_v21, 2 }
  0x39   : > { %4995 = vmatprep.mubr.msk.bf16.mxu1 %vm5914_vm1, %v7991_v1  ;;  %5100 = vmatpush3.bf16.msra.mxu0 %v1025_v45  ;;  %8009 = vst [vmem:[#allocation9_spill] sm:$0xff] %v6294_v44 }
  0x3a   : > { %5037 = vmatprep.mubr.msk.bf16.mxu0 %vm5914_vm1, %v7991_v1  ;;  %5101 = vmatprep.subr.bf16.mxu0 %v7991_v1  ;;  %v6296_v45 = vor.u32 %v1169_v39, %v1168_v37  ;;  %v778_v39 = vrot.slane %v6036_v38, 1 }
  0x3d   : > { %5102 = vmatpush3.bf16.msra.mxu0 %v5793_v47  ;;  %v5801_v47 = vld [vmem:[%s7984_s1 + $0xf8] ss:$0 sps:$4 sm:$0x11]  }
  0x3e   : > { %5103 = vmatprep.subr.bf16.mxu0 %v7991_v1  ;;  %v1401_v50 = vsel %vm346_vm0, %v5801_v47, 0  ;;  %v780_v47 = vor.u32 %v779_v46, %v778_v39  ;;  %v1342_v39 = vrot.slane %v5977_v10, 3  ;;  %v5812_v46 = vld [vmem:[%s7984_s1 + $0x114] sm:$0xff]  }
  0x40   : > { %4996 = vmatmul.mubr.msk.bf16.vlgmr.msra.gmra.mxu1 %vm324_vm3, %v5987_v15  ;;  %5038 = vmatmul.mubr.msk.bf16.gmra.mxu0 %vm324_vm3, %v587_v0  ;;  %v5794_v15 = vld [vmem:[%s7984_s1 + $0x7c] sm:$0xff]   ;;  %v1221_v0 = vsel %vm346_vm0, %v5800_v54, 0 }
  0x41   : > { %5062 = vmatpush3.bf16.msra.mxu1 %v845_v3  ;;  %4999 = vmatprep.mubr.msk.bf16.mxu1 %vm5914_vm1, %v7991_v1  ;;  %v5805_v3 = vld [vmem:[%s7984_s1 + $0xe8] sm:$0xff]  }
  0x42   : > { %5041 = vmatprep.mubr.msk.bf16.mxu0 %vm5914_vm1, %v7991_v1  ;;  %5063 = vmatprep.subr.bf16.mxu1 %v7991_v1 }
  0x43   : > { %5104 = vmatpush3.bf16.msra.mxu0 %v5795_v23  ;;  %v966_v23 = vrot.slane %v5977_v10, 2 }
  0x44   : > { %5105 = vmatprep.subr.bf16.mxu0 %v7991_v1 }
  0x45   : > { %5064 = vmatpush3.bf16.msra.mxu1 %v5792_v5  ;;  %v5802_v5 = vld [vmem:[%s7984_s1 + $0xcc] sm:$0xff]  }
  0x46   : > { %5065 = vmatprep.subr.bf16.mxu1 %v7991_v1 }
  0x47   : > { %5106 = vmatpush3.bf16.msra.mxu0 %v5797_v8  ;;  %v967_v8 = vsel %vm960_vm4, %v964_v26, %v966_v23 }
  0x48   : > { %5000 = vmatmul.mubr.msk.bf16.gmra.mxu1 %vm324_vm3, %v5997_v18  ;;  %5042 = vmatmul.mubr.msk.bf16.gmra.mxu0 %vm324_vm3, %v589_v9  ;;  %v5798_v18 = vld [vmem:[%s7984_s1 + $0x6c] sm:$0xff]   ;;  %v775_v9 = vrot.slane %v5992_v16, 2 }
  0x49   : > { %5003 = vmatprep.mubr.msk.bf16.mxu1 %vm5914_vm1, %v7991_v1  ;;  %5045 = vmatprep.mubr.msk.bf16.mxu0 %vm5914_vm1, %v7991_v1 }
  0x4a   : > { %5066 = vmatpush3.bf16.msra.mxu1 %v5794_v15  ;;  %5107 = vmatprep.subr.bf16.mxu0 %v7991_v1  ;;  %v774_v15 = vrot.slane %v5995_v17, 1 }
  0x4b   : > { %5067 = vmatprep.subr.bf16.mxu1 %v7991_v1  ;;  %5108 = vmatpush3.bf16.msra.mxu0 %v5799_v12  ;;  %v5804_v12 = vld [vmem:[%s7984_s1 + $0xc4] sm:$0xff]  }
  0x4c   : > { %5175 = vmatprep.subr.bf16.mxu0 %v7991_v1  ;;  %v776_v26 = vor.u32 %v775_v9, %v774_v15  ;;  %v1144_v15 = vrot.slane %v6042_v40, 2  ;;  %v1145_v9 = vrot.slane %v6016_v27, 3 }
  0x4e   : > { %5068 = vmatpush3.bf16.msra.mxu1 %v5796_v20  ;;  %v968_v20 = vrot.slane %v5979_v11, 2  ;;  %v781_v49 = vsel %vm762_vm7, %v776_v26, %v780_v47 }
  0x4f   : > { %5069 = vmatprep.subr.bf16.mxu1 %v7991_v1 }
  0x50   : > { %5004 = vmatmul.mubr.msk.bf16.gmra.mxu1 %vm324_vm3, %v6023_v32  ;;  %5046 = vmatmul.mubr.msk.bf16.gmra.mxu0 %vm324_vm3, %v6262_v24  ;;  %v969_v37 = vsel %vm960_vm4, %v966_v23, %v968_v20  ;;  %v974_v23 = vrot.slane %v6113_v4, 2 }
  0x51   : > { %5007 = vmatprep.mubr.msk.bf16.mxu1 %vm5914_vm1, %v7991_v1  ;;  %5049 = vmatprep.mubr.msk.bf16.mxu0 %vm5914_vm1, %v7991_v1 }
  0x52   : > { %5070 = vmatpush3.bf16.msra.mxu1 %v5798_v18  ;;  %v5806_v18 = vld [vmem:[%s7984_s1 + $0xbc] sm:$0xff]  }
  0x53   : > { %5137 = vmatprep.subr.bf16.mxu1 %v7991_v1 }
  0x58   : > { %5008 = vmatmul.mubr.msk.bf16.gmra.mxu1 %vm324_vm3, %v5977_v10  ;;  %5050 = vmatmul.mubr.msk.bf16.gmra.mxu0 %vm324_vm3, %v6276_v33 }
  0x59   : > { %5011 = vmatprep.mubr.msk.bf16.mxu1 %vm5914_vm1, %v7991_v1  ;;  %5053 = vmatprep.mubr.msk.bf16.mxu0 %vm5914_vm1, %v7991_v1 }
  0x60   : > { %5012 = vmatmul.mubr.msk.bf16.gmra.mxu1 %vm324_vm3, %v5979_v11  ;;  %5054 = vmatmul.mubr.msk.bf16.gmra.mxu0 %vm324_vm3, %v6294_v44 }
  0x61   : > { %5015 = vmatprep.mubr.msk.bf16.mxu1 %vm5914_vm1, %v7991_v1  ;;  %5057 = vmatprep.mubr.msk.bf16.mxu0 %vm5914_vm1, %v7991_v1 }
  0x68   : > { %5016 = vmatmul.mubr.msk.bf16.gmra.mxu1 %vm324_vm3, %v6018_v28  ;;  %5058 = vmatmul.mubr.msk.bf16.gmra.mxu0 %vm324_vm3, %v597_v19  ;;  %v5808_v19 = vld [vmem:[%s7984_s1 + $0xb4] sm:$0xff]  }
  0x69   : > { %5019 = vmatprep.mubr.msk.bf16.mxu1 %vm5914_vm1, %v7991_v1  ;;  %5109 = vmatprep.mubr.msk.bf16.mxu0 %vm5914_vm1, %v7991_v1 }
  0x70   : > { %5020 = vmatmul.mubr.msk.bf16.gmra.mxu1 %vm324_vm3, %v6071_v53  ;;  %5110 = vmatmul.mubr.msk.bf16.vlgmr.msra.gmra.mxu0 %vm324_vm3, %v6146_v25  ;;  %v769_v25 = vsel %vm762_vm7, %v6148_v29, %v768_v51  ;;  %v772_v29 = vor.u32 %v771_v59, %v770_v55 }
  0x71   : > { %5071 = vmatprep.mubr.msk.bf16.mxu1 %vm5914_vm1, %v7991_v1  ;;  %5176 = vmatpush3.bf16.msra.mxu0 %v1401_v50  ;;  %v971_v50 = vsel %vm960_vm4, %v968_v20, %v970_v48  ;;  %v1148_v20 = vrot.slane %v6097_v61, 2 }
  0x72   : > { %5113 = vmatprep.mubr.msk.bf16.mxu0 %vm5914_vm1, %v7991_v1  ;;  %5177 = vmatprep.subr.bf16.mxu0 %v7991_v1  ;;  %v773_v6 = vsel %vm762_vm7, %v768_v51, %v772_v29  ;;  %v777_v30 = vsel %vm762_vm7, %v772_v29, %v776_v26  ;;  %v782_v51 = vrot.slane %v6084_v56, 1  ;;  %v5810_v26 = vld [vmem:[%s7984_s1 + $0x11c] ss:$0 sps:$4 sm:$0x11]  }
  0x75   : > { %5178 = vmatpush3.bf16.msra.mxu0 %v5803_v52  ;;  %v783_v52 = vrot.slane %v6045_v41, 2 }
  0x76   : > { %5179 = vmatprep.subr.bf16.mxu0 %v7991_v1 }
  0x77   : > { %v784_v54 = vor.u32 %v783_v52, %v782_v51  ;;  %v5814_v51 = vld [vmem:[%s7984_s1 + $0x10c] sm:$0xff]   ;;  %v5819_v52 = vld [vmem:[%s7984_s1 + $0x120] sm:$0xff]  }
  0x78   : > { %5072 = vmatmul.mubr.msk.bf16.vlgmr.msra.gmra.mxu1 %vm324_vm3, %v769_v25  ;;  %5114 = vmatmul.mubr.msk.bf16.gmra.mxu0 %vm324_vm3, %v6166_v36  ;;  %v5807_v36 = vld [vmem:[%s7984_s1 + $0xe0] sm:$0xff]   ;;  %v972_v25 = vrot.slane %v6071_v53, 2 }
  0x79   : > { %5138 = vmatpush3.bf16.msra.mxu1 %v1221_v0  ;;  %5075 = vmatprep.mubr.msk.bf16.mxu1 %vm5914_vm1, %v7991_v1  ;;  %v785_v55 = vsel %vm762_vm7, %v780_v47, %v784_v54  ;;  %v786_v0 = vrot.slane %v6124_v7, 1 }
  0x7a   : > { %5117 = vmatprep.mubr.msk.bf16.mxu0 %vm5914_vm1, %v7991_v1  ;;  %5139 = vmatprep.subr.bf16.mxu1 %v7991_v1  ;;  %v973_v59 = vsel %vm960_vm4, %v970_v48, %v972_v25  ;;  %v6485_v48 = vsel %vm1336_vm6, %v1340_v63, %v1342_v39  ;;  %v1344_v63 = vrot.slane %v5979_v11, 3 }
  0x7b   : > { %5180 = vmatpush3.bf16.msra.mxu0 %v5805_v3  ;;  %v787_v3 = vrot.slane %v6094_v60, 2 }
  0x7c   : > { %5181 = vmatprep.subr.bf16.mxu0 %v7991_v1 }
  0x7d   : > { %5140 = vmatpush3.bf16.msra.mxu1 %v5802_v5  ;;  %v788_v29 = vor.u32 %v787_v3, %v786_v0  ;;  %v1157_v0 = vrot.slane %v6002_v21, 3  ;;  %v5818_v3 = vld [vmem:[%s7984_s1 + $0xfc] sm:$0xff]  }
  0x7e   : > { %5141 = vmatprep.subr.bf16.mxu1 %v7991_v1 }
  0x7f   : > { %5182 = vmatpush3.bf16.msra.mxu0 %v5807_v36  ;;  %v789_v5 = vsel %vm762_vm7, %v784_v54, %v788_v29  ;;  %v975_v36 = vsel %vm960_vm4, %v972_v25, %v974_v23  ;;  %v5816_v54 = vld [vmem:[%s7984_s1 + $0x104] sm:$0xff]   ;;  %v1346_v23 = vrot.slane %v6018_v28, 3 }
  0x80   : > { %5076 = vmatmul.mubr.msk.bf16.gmra.mxu1 %vm324_vm3, %v773_v6  ;;  %5118 = vmatmul.mubr.msk.bf16.gmra.mxu0 %vm324_vm3, %v967_v8  ;;  %v5811_v6 = vld [vmem:[%s7984_s1 + $0x140] ss:$0 sps:$4 sm:$0x11]   ;;  %v795_v8 = vsel %vm762_vm7, %v788_v29, %v6200_v57  ;;  %v5813_v57 = vld [vmem:[%s7984_s1 + $0x138] sm:$0xff]  }
  0x81   : > { %5079 = vmatprep.mubr.msk.bf16.mxu1 %vm5914_vm1, %v7991_v1  ;;  %5121 = vmatprep.mubr.msk.bf16.mxu0 %vm5914_vm1, %v7991_v1 }
  0x82   : > { %5142 = vmatpush3.bf16.msra.mxu1 %v5804_v12  ;;  %5183 = vmatprep.subr.bf16.mxu0 %v7991_v1  ;;  %v1766_v12 = vsel %vm346_vm0, %v5811_v6, 0  ;;  %v1160_v6 = vrot.slane %v6084_v56, 2 }
  0x83   : > { %5143 = vmatprep.subr.bf16.mxu1 %v7991_v1  ;;  %5184 = vmatpush3.bf16.msra.mxu0 %v5809_v14  ;;  %v1146_v14 = vor.u32 %v1145_v9, %v1144_v15  ;;  %v6543_v9 = vrot.slane %v6071_v53, 3 }
  0x84   : > { %5251 = vmatprep.subr.bf16.mxu0 %v7991_v1 }
  0x86   : > { %5144 = vmatpush3.bf16.msra.mxu1 %v5806_v18  ;;  %v1149_v18 = vrot.slane %v6048_v42, 3 }
  0x87   : > { %5145 = vmatprep.subr.bf16.mxu1 %v7991_v1 }
  0x88   : > { %5080 = vmatmul.mubr.msk.bf16.gmra.mxu1 %vm324_vm3, %v777_v30  ;;  %5122 = vmatmul.mubr.msk.bf16.gmra.mxu0 %vm324_vm3, %v969_v37  ;;  %v1560_v30 = vsel %vm346_vm0, %v5810_v26, 0  ;;  %v5815_v37 = vld [vmem:[%s7984_s1 + $0x130] sm:$0xff]   ;;  %v6550_v26 = vsel %vm1336_vm6, %v1346_v23, %v6543_v9 }
  0x89   : > { %5083 = vmatprep.mubr.msk.bf16.mxu1 %vm5914_vm1, %v7991_v1  ;;  %5125 = vmatprep.mubr.msk.bf16.mxu0 %vm5914_vm1, %v7991_v1 }
  0x8a   : > { %5146 = vmatpush3.bf16.msra.mxu1 %v5808_v19  ;;  %v5817_v19 = vld [vmem:[%s7984_s1 + $0x128] sm:$0xff]  }
  0x8b   : > { %5213 = vmatprep.subr.bf16.mxu1 %v7991_v1 }
  0x90   : > { %5084 = vmatmul.mubr.msk.bf16.gmra.mxu1 %vm324_vm3, %v781_v49  ;;  %5126 = vmatmul.mubr.msk.bf16.gmra.mxu0 %vm324_vm3, %v971_v50  ;;  %v1152_v49 = vrot.slane %v5995_v17, 2  ;;  %v1153_v50 = vrot.slane %v5992_v16, 3 }
  0x91   : > { %5087 = vmatprep.mubr.msk.bf16.mxu1 %vm5914_vm1, %v7991_v1  ;;  %5129 = vmatprep.mubr.msk.bf16.mxu0 %vm5914_vm1, %v7991_v1 }
  0x92   : > { %v1154_v32 = vor.u32 %v1153_v50, %v1152_v49 }
  0x98   : > { %5088 = vmatmul.mubr.msk.bf16.gmra.mxu1 %vm324_vm3, %v785_v55  ;;  %5130 = vmatmul.mubr.msk.bf16.gmra.mxu0 %vm324_vm3, %v973_v59  ;;  %v6512_v55 = vsel %vm1336_vm6, %v1342_v39, %v1344_v63  ;;  %v1156_v59 = vrot.slane %v6036_v38, 2  ;;  %v1679_v39 = vrot.slane %v6097_v61, 3  ;;  %v1683_v61 = vrot.slane %v5995_v17, 3  ;;  %v5823_v17 = vld [vmem:[%s7984_s1 + $0x180] sm:$0xff]  }
  0x99   : > { %5091 = vmatprep.mubr.msk.bf16.mxu1 %vm5914_vm1, %v7991_v1  ;;  %5133 = vmatprep.mubr.msk.bf16.mxu0 %vm5914_vm1, %v7991_v1 }
  0x9a   : > { %v1158_v29 = vor.u32 %v1157_v0, %v1156_v59  ;;  %v1687_v59 = vrot.slane %v6036_v38, 3  ;;  %v1688_v0 = vrot.slane %v6002_v21, 4  ;;  %v5822_v38 = vld [vmem:[%s7984_s1 + $0x15c] sm:$0xff]  }
  0x9c   : > { %v1689_v21 = vor.u32 %v1688_v0, %v1687_v59 }
  0xa0   : > { %5092 = vmatmul.mubr.msk.bf16.gmra.mxu1 %vm324_vm3, %v789_v5  ;;  %5134 = vmatmul.mubr.msk.bf16.gmra.mxu0 %vm324_vm3, %v975_v36  ;;  %v1159_v5 = vsel %vm1140_vm8, %v1154_v32, %v1158_v29  ;;  %v6531_v36 = vsel %vm1336_vm6, %v1344_v63, %v1346_v23 }
  0xa1   : > { %5095 = vmatprep.mubr.msk.bf16.mxu1 %vm5914_vm1, %v7991_v1  ;;  %5185 = vmatprep.mubr.msk.bf16.mxu0 %vm5914_vm1, %v7991_v1 }
  0xa8   : > { %5096 = vmatmul.mubr.msk.bf16.gmra.mxu1 %vm324_vm3, %v795_v8  ;;  %5186 = vmatmul.mubr.msk.bf16.vlgmr.msra.gmra.mxu0 %vm324_vm3, %v6204_v62  ;;  %v1147_v62 = vsel %vm1140_vm8, %v6208_v2, %v1146_v14  ;;  %v1150_v2 = vor.u32 %v1149_v18, %v1148_v20  ;;  %v1161_v8 = vrot.slane %v6045_v41, 3  ;;  %v1350_v20 = vrot.slane %v6113_v4, 3 }
  0xa9   : > { %5147 = vmatprep.mubr.msk.bf16.mxu1 %vm5914_vm1, %v7991_v1  ;;  %5252 = vmatpush3.bf16.msra.mxu0 %v1766_v12  ;;  %v1164_v12 = vrot.slane %v6124_v7, 2 }
  0xaa   : > { %5189 = vmatprep.mubr.msk.bf16.mxu0 %vm5914_vm1, %v7991_v1  ;;  %5253 = vmatprep.subr.bf16.mxu0 %v7991_v1  ;;  %v1151_v47 = vsel %vm1140_vm8, %v1146_v14, %v1150_v2  ;;  %v1155_v25 = vsel %vm1140_vm8, %v1150_v2, %v1154_v32  ;;  %v1162_v15 = vor.u32 %v1161_v8, %v1160_v6  ;;  %v1165_v14 = vrot.slane %v6094_v60, 3  ;;  %v5820_v32 = vld [vmem:[%s7984_s1 + $0x164] ss:$0 sps:$4 sm:$0x11]  }
  0xab   : > { %v1677_v2 = vrot.slane %v6016_v27, 4  ;;  %v5821_v27 = vld [vmem:[%s7984_s1 + $0x188] ss:$0 sps:$4 sm:$0x11]  }
  0xac   : > { %v2157_v49 = vsel %vm346_vm0, %v5821_v27, 0  ;;  %v5826_v27 = vld [vmem:[%s7984_s1 + $0x14c] sm:$0xff]  }
  0xad   : > { %5254 = vmatpush3.bf16.msra.mxu0 %v5813_v57  ;;  %v1163_v57 = vsel %vm1140_vm8, %v1158_v29, %v1162_v15  ;;  %v1937_v29 = vsel %vm346_vm0, %v5820_v32, 0  ;;  %v5831_v32 = vld [vmem:[%s7984_s1 + $0x144] sm:$0xff]  }
  0xae   : > { %5255 = vmatprep.subr.bf16.mxu0 %v7991_v1 }
  0xb0   : > { %5148 = vmatmul.mubr.msk.bf16.vlgmr.msra.gmra.mxu1 %vm324_vm3, %v1147_v62  ;;  %5190 = vmatmul.mubr.msk.bf16.gmra.mxu0 %vm324_vm3, %v6215_v22  ;;  %v1166_v62 = vor.u32 %v1165_v14, %v1164_v12 }
  0xb1   : > { %5214 = vmatpush3.bf16.msra.mxu1 %v1560_v30  ;;  %5151 = vmatprep.mubr.msk.bf16.mxu1 %vm5914_vm1, %v7991_v1  ;;  %v1351_v30 = vsel %vm1336_vm6, %v6543_v9, %v1350_v20  ;;  %v1691_v20 = vrot.slane %v6084_v56, 3 }
  0xb2   : > { %5193 = vmatprep.mubr.msk.bf16.mxu0 %vm5914_vm1, %v7991_v1  ;;  %5215 = vmatprep.subr.bf16.mxu1 %v7991_v1  ;;  %v1167_v18 = vsel %vm1140_vm8, %v1162_v15, %v1166_v62 }
  0xb3   : > { %5256 = vmatpush3.bf16.msra.mxu0 %v5815_v37  ;;  %v1676_v37 = vrot.slane %v6042_v40, 3  ;;  %v1171_v40 = vsel %vm1140_vm8, %v1166_v62, %v6296_v45 }
  0xb4   : > { %5257 = vmatprep.subr.bf16.mxu0 %v7991_v1 }
  0xb5   : > { %5216 = vmatpush3.bf16.msra.mxu1 %v5812_v46  ;;  %v1680_v46 = vrot.slane %v6048_v42, 4  ;;  %v1678_v4 = vor.u32 %v1677_v2, %v1676_v37  ;;  %v5824_v2 = vld [vmem:[%s7984_s1 + $0x154] sm:$0xff]  }
  0xb6   : > { %5217 = vmatprep.subr.bf16.mxu1 %v7991_v1 }
  0xb7   : > { %5258 = vmatpush3.bf16.msra.mxu0 %v5817_v19  ;;  %v1681_v19 = vor.u32 %v1680_v46, %v1679_v39  ;;  %v5832_v39 = vld [vmem:[%s7984_s1 + $0x168] sm:$0xff]  }
  0xb8   : > { %5152 = vmatmul.mubr.msk.bf16.gmra.mxu1 %vm324_vm3, %v1151_v47  ;;  %5194 = vmatmul.mubr.msk.bf16.gmra.mxu0 %vm324_vm3, %v6485_v48  ;;  %v1684_v47 = vrot.slane %v5992_v16, 4 }
  0xb9   : > { %5155 = vmatprep.mubr.msk.bf16.mxu1 %vm5914_vm1, %v7991_v1  ;;  %5197 = vmatprep.mubr.msk.bf16.mxu0 %vm5914_vm1, %v7991_v1  ;;  %v1682_v42 = vsel %vm1675_vm9, %v1678_v4, %v1681_v19 }
  0xba   : > { %5218 = vmatpush3.bf16.msra.mxu1 %v5814_v51  ;;  %5259 = vmatprep.subr.bf16.mxu0 %v7991_v1  ;;  %v1685_v45 = vor.u32 %v1684_v47, %v1683_v61  ;;  %v1695_v47 = vrot.slane %v6124_v7, 3 }
  0xbb   : > { %5219 = vmatprep.subr.bf16.mxu1 %v7991_v1  ;;  %5260 = vmatpush3.bf16.msra.mxu0 %v5819_v52 }
  0xbc   : > { %5327 = vmatprep.subr.bf16.mxu0 %v7991_v1  ;;  %v1690_v62 = vsel %vm1675_vm9, %v1685_v45, %v1689_v21 }
  0xbe   : > { %5220 = vmatpush3.bf16.msra.mxu1 %v5816_v54 }
  0xbf   : > { %5221 = vmatprep.subr.bf16.mxu1 %v7991_v1 }
  0xc0   : > { %5156 = vmatmul.mubr.msk.bf16.gmra.mxu1 %vm324_vm3, %v1155_v25  ;;  %5198 = vmatmul.mubr.msk.bf16.gmra.mxu0 %vm324_vm3, %v6512_v55  ;;  %v1686_v25 = vsel %vm1675_vm9, %v1681_v19, %v1685_v45  ;;  %v6672_v45 = vld [vmem:[%s5968_s25 + $0x38] sm:$0xf] }
  0xc1   : > { %5159 = vmatprep.mubr.msk.bf16.mxu1 %vm5914_vm1, %v7991_v1  ;;  %5201 = vmatprep.mubr.msk.bf16.mxu0 %vm5914_vm1, %v7991_v1 }
  0xc2   : > { %5222 = vmatpush3.bf16.msra.mxu1 %v5818_v3 }
  0xc3   : > { %5289 = vmatprep.subr.bf16.mxu1 %v7991_v1 }
  0xc8   : > { %5160 = vmatmul.mubr.msk.bf16.gmra.mxu1 %vm324_vm3, %v1159_v5  ;;  %5202 = vmatmul.mubr.msk.bf16.gmra.mxu0 %vm324_vm3, %v6531_v36  ;;  %v5825_v5 = vld [vmem:[%s7984_s1 + $0x178] sm:$0xff]  }
  0xc9   : > { %5163 = vmatprep.mubr.msk.bf16.mxu1 %vm5914_vm1, %v7991_v1  ;;  %5205 = vmatprep.mubr.msk.bf16.mxu0 %vm5914_vm1, %v7991_v1 }
  0xd0   : > { %5164 = vmatmul.mubr.msk.bf16.gmra.mxu1 %vm324_vm3, %v1163_v57  ;;  %5206 = vmatmul.mubr.msk.bf16.gmra.mxu0 %vm324_vm3, %v6550_v26 }
  0xd1   : > { %5167 = vmatprep.mubr.msk.bf16.mxu1 %vm5914_vm1, %v7991_v1  ;;  %5209 = vmatprep.mubr.msk.bf16.mxu0 %vm5914_vm1, %v7991_v1 }
  0xd8   : > { %5168 = vmatmul.mubr.msk.bf16.gmra.mxu1 %vm324_vm3, %v1167_v18  ;;  %5210 = vmatmul.mubr.msk.bf16.gmra.mxu0 %vm324_vm3, %v1351_v30  ;;  %v1692_v18 = vrot.slane %v6045_v41, 4 }
  0xd9   : > { %5171 = vmatprep.mubr.msk.bf16.mxu1 %vm5914_vm1, %v7991_v1  ;;  %5261 = vmatprep.mubr.msk.bf16.mxu0 %vm5914_vm1, %v7991_v1 }
  0xda   : > { %v1693_v56 = vor.u32 %v1692_v18, %v1691_v20 }
  0xdc   : > { %v1694_v61 = vsel %vm1675_vm9, %v1689_v21, %v1693_v56 }
  0xe0   : > { %v6582_v50 = vpop.f32.mrf.mxu1  ;;  %5172 = vmatmul.mubr.msk.bf16.gmra.mxu1 %vm324_vm3, %v1171_v40  ;;  %v6585_v51 = vpop.f32.mrf.mxu0  ;;  %5262 = vmatmul.mubr.msk.bf16.vlgmr.msra.gmra.mxu0 %vm324_vm3, %v1682_v42 }
  0xe1   : > { %5223 = vmatprep.mubr.msk.bf16.mxu1 %vm5914_vm1, %v7991_v1  ;;  %5328 = vmatpush3.bf16.msra.mxu0 %v2157_v49  ;;  %v1696_v49 = vrot.slane %v6094_v60, 4 }
  0xe2   : > { %v4971_v16 = vpop.f32.mrf.mxu1  ;;  %v4959_v52 = vpop.f32.mrf.mxu0  ;;  %5265 = vmatprep.mubr.msk.bf16.mxu0 %vm5914_vm1, %v7991_v1  ;;  %5329 = vmatprep.subr.bf16.mxu0 %v7991_v1 }
  0xe3   : > { %v1697_v7 = vor.u32 %v1696_v49, %v1695_v47 }
  0xe4   : > { %v6599_v63 = vpop.f32.mrf.mxu1  ;;  %v6601_v54 = vpop.f32.mrf.mxu0 }
  0xe5   : > { %5330 = vmatpush3.bf16.msra.mxu0 %v5823_v17 }
  0xe6   : > { %v4972_v3 = vpop.f32.mrf.mxu1  ;;  %v4960_v23 = vpop.f32.mrf.mxu0  ;;  %5331 = vmatprep.subr.bf16.mxu0 %v7991_v1 }
  0xe7   : > { %v6694_v3 = vld [vmem:[%s5968_s25 + $0x40] sm:$0xf] }
  0xe8   : > { %v6611_v6 = vpop.f32.mrf.mxu1  ;;  %5224 = vmatmul.mubr.msk.bf16.vlgmr.msra.gmra.mxu1 %vm324_vm3, %v6215_v22  ;;  %v6615_v8 = vpop.f32.mrf.mxu0  ;;  %5266 = vmatmul.mubr.msk.bf16.gmra.mxu0 %vm324_vm3, %v1686_v25  ;;  %v5828_v22 = vld [vmem:[%s7984_s1 + $0x170] sm:$0xff]   ;;  %v6701_v21 = vcombine.low %v6694_v3, %v6694_v3 }
  0xe9   : > { %5290 = vmatpush3.bf16.msra.mxu1 %v1937_v29  ;;  %5227 = vmatprep.mubr.msk.bf16.mxu1 %vm5914_vm1, %v7991_v1 }
  0xea   : > { %v4975_v15 = vpop.f32.mrf.mxu1  ;;  %v4963_v12 = vpop.f32.mrf.mxu0  ;;  %5269 = vmatprep.mubr.msk.bf16.mxu0 %vm5914_vm1, %v7991_v1  ;;  %5291 = vmatprep.subr.bf16.mxu1 %v7991_v1 }
  0xeb   : > { %5332 = vmatpush3.bf16.msra.mxu0 %v5825_v5 }
  0xec   : > { %v6629_v14 = vpop.f32.mrf.mxu1  ;;  %v6631_v57 = vpop.f32.mrf.mxu0  ;;  %5333 = vmatprep.subr.bf16.mxu0 %v7991_v1 }
  0xed   : > { %5292 = vmatpush3.bf16.msra.mxu1 %v5822_v38  ;;  %v1698_v38 = vsel %vm1675_vm9, %v1693_v56, %v1697_v7 }
  0xee   : > { %v4976_v30 = vpop.f32.mrf.mxu1  ;;  %v4964_v37 = vpop.f32.mrf.mxu0  ;;  %5293 = vmatprep.subr.bf16.mxu1 %v7991_v1 }
  0xef   : > { %5334 = vmatpush3.bf16.msra.mxu0 %v5828_v22  ;;  %v1709_v30 = vshrl.u32 %v6701_v21, 16  ;;  %v1712_v37 = vshll.u32 %v6701_v21, 16 }
  0xf0   : > { %v6644_v46 = vpop.f32.mrf.mxu1  ;;  %5228 = vmatmul.mubr.msk.bf16.gmra.mxu1 %vm324_vm3, %v6485_v48  ;;  %v6648_v41 = vpop.f32.mrf.mxu0  ;;  %5270 = vmatmul.mubr.msk.bf16.gmra.mxu0 %vm324_vm3, %v1690_v62  ;;  %v6659_v48 = vld [vmem:[%s5968_s25 + $0x3c] sm:$0xf] }
  0xf1   : > { %5231 = vmatprep.mubr.msk.bf16.mxu1 %vm5914_vm1, %v7991_v1  ;;  %5273 = vmatprep.mubr.msk.bf16.mxu0 %vm5914_vm1, %v7991_v1  ;;  %v6676_v17 = vcombine.low %v6672_v45, %v6659_v48  ;;  %v1714_v47 = vrot.slane %v1712_v37, 4 }
  0xf2   : > { %v4979_v4 = vpop.f32.mrf.mxu1  ;;  %v4967_v19 = vpop.f32.mrf.mxu0  ;;  %5294 = vmatpush3.bf16.msra.mxu1 %v5824_v2  ;;  %5335 = vmatprep.subr.bf16.mxu0 %v7991_v1 }
  0xf3   : > { %5295 = vmatprep.subr.bf16.mxu1 %v7991_v1  ;;  %5336 = vmatpush3.bf16.msra.mxu0 %v5832_v39  ;;  %v7987_v59 = vshrl.u32 %v6676_v17, 16  ;;  %v7988_v0 = vshll.u32 %v6676_v17, 16 }
  0xf4   : > { %v6663_v40 = vpop.f32.mrf.mxu1  ;;  %v6665_v42 = vpop.f32.mrf.mxu0  ;;  %5403 = vmatprep.subr.bf16.mxu0 %v7991_v1 }
  0xf5   : > { %v1702_v15 = vrot.slane %v7987_v59, 3  ;;  %v1705_v12 = vrot.slane %v7988_v0, 4 }
  0xf6   : > { %v4980_v16 = vpop.f32.mrf.mxu1  ;;  %v4968_v52 = vpop.f32.mrf.mxu0  ;;  %5296 = vmatpush3.bf16.msra.mxu1 %v5826_v27 }
  0xf7   : > { %5297 = vmatprep.subr.bf16.mxu1 %v7991_v1  ;;  %v1706_v39 = vor.u32 %v1705_v12, %v1702_v15  ;;  %v5895_v52 = vld [vmem:[%s5968_s25 + $0x10] sm:$0xf]  ;;  %v1522_v12 = vrot.slane %v6676_v17, 3 }
  0xf8   : > { %v6682_v25 = vpop.f32.mrf.mxu1  ;;  %5232 = vmatmul.mubr.msk.bf16.gmra.mxu1 %vm324_vm3, %v6512_v55  ;;  %v683_v60 = vpop.f32.mrf.mxu0  ;;  %5274 = vmatmul.mubr.msk.bf16.gmra.mxu0 %vm324_vm3, %v1694_v61  ;;  %v1711_v61 = vrot.slane %v1709_v30, 3 }
  0xf9   : > { %5235 = vmatprep.mubr.msk.bf16.mxu1 %vm5914_vm1, %v7991_v1  ;;  %5277 = vmatprep.mubr.msk.bf16.mxu0 %vm5914_vm1, %v7991_v1  ;;  %v1707_v16 = vsel %vm1675_vm9, %v1697_v7, %v1706_v39  ;;  %v1523_v30 = vsel %vm1336_vm6, %v6543_v9, %v1522_v12 }
  0xfa   : > { %v4983_v29 = vpop.f32.mrf.mxu1  ;;  %v5035_v23 = vpop.f32.mrf.mxu0  ;;  %5298 = vmatpush3.bf16.msra.mxu1 %v5831_v32 }
  0xfb   : > { %5365 = vmatprep.subr.bf16.mxu1 %v7991_v1 }
  0xfc   : > { %v6697_v55 = vpop.f32.mrf.mxu1  ;;  %v686_v5 = vpop.f32.mrf.mxu0 }
  0xfe   : > { %v4984_v22 = vpop.f32.mrf.mxu1  ;;  %v5036_v62 = vpop.f32.mrf.mxu0 }
 0x100   : > { %v517_v20 = vpop.f32.mrf.mxu1  ;;  %5236 = vmatmul.mubr.msk.bf16.gmra.mxu1 %vm324_vm3, %v6531_v36  ;;  %v691_v18 = vpop.f32.mrf.mxu0  ;;  %5278 = vmatmul.mubr.msk.bf16.gmra.mxu0 %vm324_vm3, %v1698_v38 }
 0x101   : > { %v518_v2 = vadd.f32 %v517_v20, %v6585_v51  ;;  %5239 = vmatprep.mubr.msk.bf16.mxu1 %vm5914_vm1, %v7991_v1  ;;  %5281 = vmatprep.mubr.msk.bf16.mxu0 %vm5914_vm1, %v7991_v1  ;;  %v5894_v51 = vld [vmem:[%s5968_s25 + $0xc] sm:$0xf] }
 0x102   : > { %v4997_v56 = vpop.f32.mrf.mxu1  ;;  %v5039_v36 = vpop.f32.mrf.mxu0  ;;  %v6724_v32 = vcombine.low %v5894_v51, %v5895_v52  ;;  %v5896_v51 = vld [vmem:[%s5968_s25 + $0x1c] sm:$0xf]  ;;  %v5897_v52 = vld [vmem:[%s5968_s25 + $0x20] sm:$0xf] }
 0x103   : > { %v6718_v4 = vadd.f32 %v683_v60, %v518_v2 }
 0x104   : > { %v520_v19 = vpop.f32.mrf.mxu1  ;;  %v694_v27 = vpop.f32.mrf.mxu0  ;;  %v7990_v56 = vshrl.u32 %v6724_v32, 16 }
 0x105   : > { %v521_v49 = vadd.f32 %v520_v19, %v6601_v54  ;;  %v1715_v54 = vor.u32 %v1714_v47, %v1711_v61  ;;  %v6748_v19 = vshll.u32 %v6031_v35, 16 }
 0x106   : > { %v4998_v29 = vpop.f32.mrf.mxu1  ;;  %v5040_v23 = vpop.f32.mrf.mxu0 }
 0x107   : > { %v6726_v38 = vadd.f32 %v686_v5, %v521_v49  ;;  %v7989_v5 = vshll.u32 %v6724_v32, 16  ;;  %v1716_v2 = vsel %vm1675_vm9, %v1706_v39, %v1715_v54  ;;  %v6765_v29 = vcombine.low %v5896_v51, %v5897_v52  ;;  %v5839_v51 = vld [vmem:[%s7984_s1 + $0x1c8] sm:$0xff]  }
 0x108   : > { %v525_v15 = vpop.f32.mrf.mxu1  ;;  %5240 = vmatmul.mubr.msk.bf16.gmra.mxu1 %vm324_vm3, %v6550_v26  ;;  %v699_v60 = vpop.f32.mrf.mxu0  ;;  %5282 = vmatmul.mubr.msk.bf16.gmra.mxu0 %vm324_vm3, %v1707_v16  ;;  %v2063_v16 = vrot.slane %v6748_v19, 1  ;;  %v2455_v34 = vrot.slane %v6748_v19, 2 }
 0x109   : > { %v526_v7 = vadd.f32 %v525_v15, %v6615_v8  ;;  %5243 = vmatprep.mubr.msk.bf16.mxu1 %vm5914_vm1, %v7991_v1  ;;  %5285 = vmatprep.mubr.msk.bf16.mxu0 %vm5914_vm1, %v7991_v1  ;;  %v2059_v36 = vrot.slane %v7989_v5, 1 }
 0x10a   : > { %v5001_v22 = vpop.f32.mrf.mxu1  ;;  %v5043_v62 = vpop.f32.mrf.mxu0 }
 0x10b   : > { %v6738_v20 = vadd.f32 %v691_v18, %v526_v7 }
 0x10c   : > { %v528_v26 = vpop.f32.mrf.mxu1  ;;  %v702_v37 = vpop.f32.mrf.mxu0 }
 0x10d   : > { %v529_v8 = vadd.f32 %v528_v26, %v6631_v57  ;;  %v1524_v57 = vrot.slane %v6701_v21, 3 }
 0x10e   : > { %v5002_v18 = vpop.f32.mrf.mxu1  ;;  %v5044_v61 = vpop.f32.mrf.mxu0 }
 0x10f   : > { %v6750_v47 = vadd.f32 %v694_v27, %v529_v8  ;;  %v2060_v27 = vor.u32 %v2059_v36, %v7990_v56  ;;  %v1525_v7 = vsel %vm1336_vm6, %v1522_v12, %v1524_v57 }
 0x110   : > { %v533_v9 = vpop.f32.mrf.mxu1  ;;  %5244 = vmatmul.mubr.msk.bf16.gmra.mxu1 %vm324_vm3, %v1523_v30  ;;  %v707_v39 = vpop.f32.mrf.mxu0  ;;  %5286 = vmatmul.mubr.msk.bf16.gmra.mxu0 %vm324_vm3, %v1716_v2  ;;  %v6776_v30 = vshrl.u32 %v6031_v35, 16  ;;  %v6779_v2 = vshll.u32 %v6765_v29, 16 }
 0x111   : > { %v534_v49 = vadd.f32 %v533_v9, %v6648_v41  ;;  %5247 = vmatprep.mubr.msk.bf16.mxu1 %vm5914_vm1, %v7991_v1  ;;  %5337 = vmatprep.mubr.msk.bf16.mxu0 %vm5914_vm1, %v7991_v1  ;;  %v5835_v41 = vld [vmem:[%s7984_s1 + $0x1d0] ss:$0 sps:$4 sm:$0x11]   ;;  %v2064_v26 = vsel %vm236_vm2, %v2060_v27, %v2063_v16  ;;  %v5899_v27 = vld [vmem:[%s5968_s25 + $0x28] sm:$0xf] }
 0x112   : > { %v5005_v23 = vpop.f32.mrf.mxu1  ;;  %v5047_v15 = vpop.f32.mrf.mxu0  ;;  %v2067_v9 = vor.u32 %v6776_v30, %v2063_v16  ;;  %v2070_v57 = vrot.slane %v6779_v2, 1  ;;  %v2454_v13 = vrot.slane %v6776_v30, 1  ;;  %v2459_v44 = vrot.slane %v6779_v2, 2 }
 0x113   : > { %v6770_v21 = vadd.f32 %v699_v60, %v534_v49  ;;  %v2533_v60 = vsel %vm346_vm0, %v5835_v41, 0  ;;  %v5898_v49 = vld [vmem:[%s5968_s25 + $0x24] sm:$0xf] }
 0x114   : > { %v536_v54 = vpop.f32.mrf.mxu1  ;;  %v710_v22 = vpop.f32.mrf.mxu0 }
 0x115   : > { %v537_v62 = vadd.f32 %v536_v54, %v6665_v42 }
 0x116   : > { %v5006_v8 = vpop.f32.mrf.mxu1  ;;  %v5048_v36 = vpop.f32.mrf.mxu0 }
 0x117   : > { %v6782_v18 = vadd.f32 %v702_v37, %v537_v62  ;;  %v6793_v37 = vcombine.low %v5898_v49, %v5899_v27  ;;  %v6809_v62 = vshrl.u32 %v6765_v29, 16 }
 0x118   : > { %v541_v12 = vpop.f32.mrf.mxu1  ;;  %5248 = vmatmul.mubr.msk.bf16.gmra.mxu1 %vm324_vm3, %v1525_v7  ;;  %v715_v42 = vpop.f32.mrf.mxu0  ;;  %5338 = vmatmul.mubr.msk.bf16.vlgmr.msra.gmra.mxu0 %vm324_vm3, %v2064_v26  ;;  %v2071_v7 = vsel %vm236_vm2, %v2067_v9, %v2070_v57 }
 0x119   : > { %v542_v61 = vadd.f32 %v541_v12, %v6582_v50  ;;  %5299 = vmatprep.mubr.msk.bf16.mxu1 %vm5914_vm1, %v7991_v1  ;;  %5404 = vmatpush3.bf16.msra.mxu0 %v2533_v60  ;;  %v5834_v50 = vld [vmem:[%s7984_s1 + $0x1ac] ss:$0 sps:$4 sm:$0x11]   ;;  %v6812_v26 = vshll.u32 %v6793_v37, 16  ;;  %v2074_v49 = vor.u32 %v6809_v62, %v2070_v57 }
 0x11a   : > { %v5009_v52 = vpop.f32.mrf.mxu1  ;;  %v5051_v23 = vpop.f32.mrf.mxu0  ;;  %5341 = vmatprep.mubr.msk.bf16.mxu0 %vm5914_vm1, %v7991_v1  ;;  %5405 = vmatprep.subr.bf16.mxu0 %v7991_v1  ;;  %v2336_v36 = vsel %vm346_vm0, %v5834_v50, 0 }
 0x11b   : > { %v6804_v16 = vadd.f32 %v707_v39, %v542_v61  ;;  %v2077_v27 = vrot.slane %v6812_v26, 1  ;;  %v5901_v52 = vld [vmem:[%s5968_s25 + $0x30] sm:$0xf] }
 0x11c   : > { %v544_v15 = vpop.f32.mrf.mxu1  ;;  %v718_v41 = vpop.f32.mrf.mxu0 }
 0x11d   : > { %v545_v54 = vadd.f32 %v544_v15, %v6599_v63  ;;  %5406 = vmatpush3.bf16.msra.mxu0 %v5839_v51  ;;  %v5842_v63 = vld [vmem:[%s7984_s1 + $0x1c0] sm:$0xff]   ;;  %v5900_v51 = vld [vmem:[%s5968_s25 + $0x2c] sm:$0xf] }
 0x11e   : > { %v5010_v8 = vpop.f32.mrf.mxu1  ;;  %v5052_v39 = vpop.f32.mrf.mxu0  ;;  %5407 = vmatprep.subr.bf16.mxu0 %v7991_v1  ;;  %v6834_v23 = vcombine.low %v5900_v51, %v5901_v52  ;;  %v5902_v52 = vld [vmem:[%s5968_s25 + $0x34] sm:$0xf] }
 0x11f   : > { %v6819_v60 = vadd.f32 %v710_v22, %v545_v54  ;;  %v5838_v22 = vld [vmem:[%s7984_s1 + $0x1a4] sm:$0xff]   ;;  %v6848_v39 = vshrl.u32 %v6793_v37, 16 }
 0x120   : > { %v549_v12 = vpop.f32.mrf.mxu1  ;;  %5300 = vmatmul.mubr.msk.bf16.vlgmr.msra.gmra.mxu1 %vm324_vm3, %v6724_v32  ;;  %v723_v61 = vpop.f32.mrf.mxu0  ;;  %5342 = vmatmul.mubr.msk.bf16.gmra.mxu0 %vm324_vm3, %v2071_v7 }
 0x121   : > { %v550_v9 = vadd.f32 %v549_v12, %v6611_v6  ;;  %5366 = vmatpush3.bf16.msra.mxu1 %v2336_v36  ;;  %5303 = vmatprep.mubr.msk.bf16.mxu1 %vm5914_vm1, %v7991_v1  ;;  %v5844_v6 = vld [vmem:[%s7984_s1 + $0x1b8] sm:$0xff]   ;;  %v2078_v36 = vsel %vm236_vm2, %v2074_v49, %v2077_v27 }
 0x122   : > { %v5013_v50 = vpop.f32.mrf.mxu1  ;;  %v5055_v15 = vpop.f32.mrf.mxu0  ;;  %5345 = vmatprep.mubr.msk.bf16.mxu0 %vm5914_vm1, %v7991_v1  ;;  %5367 = vmatprep.subr.bf16.mxu1 %v7991_v1 }
 0x123   : > { %5408 = vmatpush3.bf16.msra.mxu0 %v5842_v63  ;;  %v6842_v57 = vadd.f32 %v715_v42, %v550_v9  ;;  %v6851_v63 = vshll.u32 %v6834_v23, 16  ;;  %v5841_v42 = vld [vmem:[%s7984_s1 + $0x19c] sm:$0xff]   ;;  %v6867_v50 = vcombine.low %v5902_v52, %v6672_v45  ;;  %v5843_v45 = vld [vmem:[%s7984_s1 + $0x194] sm:$0xff]  }
 0x124   : > { %v552_v54 = vpop.f32.mrf.mxu1  ;;  %v726_v7 = vpop.f32.mrf.mxu0  ;;  %5409 = vmatprep.subr.bf16.mxu0 %v7991_v1 }
 0x125   : > { %v553_v8 = vadd.f32 %v552_v54, %v6629_v14  ;;  %5368 = vmatpush3.bf16.msra.mxu1 %v5838_v22  ;;  %v5847_v14 = vld [vmem:[%s7984_s1 + $0x1b0] sm:$0xff]  }
 0x126   : > { %v5014_v12 = vpop.f32.mrf.mxu1  ;;  %v5056_v51 = vpop.f32.mrf.mxu0  ;;  %5369 = vmatprep.subr.bf16.mxu1 %v7991_v1 }
 0x127   : > { %5410 = vmatpush3.bf16.msra.mxu0 %v5844_v6  ;;  %v6860_v9 = vadd.f32 %v718_v41, %v553_v8  ;;  %v2081_v41 = vor.u32 %v6848_v39, %v2077_v27  ;;  %v2084_v6 = vrot.slane %v6851_v63, 1 }
 0x128   : > { %v557_v49 = vpop.f32.mrf.mxu1  ;;  %5304 = vmatmul.mubr.msk.bf16.gmra.mxu1 %vm324_vm3, %v6031_v35  ;;  %v731_v22 = vpop.f32.mrf.mxu0  ;;  %5346 = vmatmul.mubr.msk.bf16.gmra.mxu0 %vm324_vm3, %v2078_v36 }
 0x129   : > { %v558_v15 = vadd.f32 %v557_v49, %v6644_v46  ;;  %5307 = vmatprep.mubr.msk.bf16.mxu1 %vm5914_vm1, %v7991_v1  ;;  %5349 = vmatprep.mubr.msk.bf16.mxu0 %vm5914_vm1, %v7991_v1  ;;  %v2085_v51 = vsel %vm236_vm2, %v2081_v41, %v2084_v6  ;;  %v6890_v49 = vshll.u32 %v6867_v50, 16  ;;  %v6903_v41 = vcombine.low %v6659_v48, %v6694_v3 }
 0x12a   : > { %v5017_v54 = vpop.f32.mrf.mxu1  ;;  %v5059_v8 = vpop.f32.mrf.mxu0  ;;  %5370 = vmatpush3.bf16.msra.mxu1 %v5841_v42  ;;  %5411 = vmatprep.subr.bf16.mxu0 %v7991_v1  ;;  %v6887_v42 = vshrl.u32 %v6834_v23, 16 }
 0x12b   : > { %5371 = vmatprep.subr.bf16.mxu1 %v7991_v1  ;;  %5412 = vmatpush3.bf16.msra.mxu0 %v5847_v14  ;;  %v6881_v46 = vadd.f32 %v723_v61, %v558_v15  ;;  %v5846_v61 = vld [vmem:[%s7984_s1 + $0x18c] sm:$0xff]   ;;  %v6945_v0 = vshrl.u32 %v6903_v41, 16 }
 0x12c   : > { %v560_v36 = vpop.f32.mrf.mxu1  ;;  %v734_v12 = vpop.f32.mrf.mxu0  ;;  %5479 = vmatprep.subr.bf16.mxu0 %v7991_v1 }
 0x12d   : > { %v561_v27 = vadd.f32 %v560_v36, %v6663_v40 }
 0x12e   : > { %v5018_v52 = vpop.f32.mrf.mxu1  ;;  %v5060_v54 = vpop.f32.mrf.mxu0  ;;  %5372 = vmatpush3.bf16.msra.mxu1 %v5843_v45  ;;  %v2091_v45 = vrot.slane %v6890_v49, 1 }
 0x12f   : > { %5373 = vmatprep.subr.bf16.mxu1 %v7991_v1  ;;  %v6896_v14 = vadd.f32 %v726_v7, %v561_v27  ;;  %v2088_v7 = vor.u32 %v6887_v42, %v2084_v6  ;;  %v6918_v54 = vshrl.u32 %v6867_v50, 16  ;;  %v6921_v6 = vshll.u32 %v6903_v41, 16 }
 0x130   : > { %v565_v40 = vpop.f32.mrf.mxu1  ;;  %5308 = vmatmul.mubr.msk.bf16.gmra.mxu1 %vm324_vm3, %v6765_v29  ;;  %v1061_v15 = vpop.f32.mrf.mxu0  ;;  %5350 = vmatmul.mubr.msk.bf16.gmra.mxu0 %vm324_vm3, %v2085_v51 }
 0x131   : > { %v566_v8 = vadd.f32 %v565_v40, %v6682_v25  ;;  %5311 = vmatprep.mubr.msk.bf16.mxu1 %vm5914_vm1, %v7991_v1  ;;  %5353 = vmatprep.mubr.msk.bf16.mxu0 %vm5914_vm1, %v7991_v1  ;;  %v2092_v52 = vsel %vm236_vm2, %v2088_v7, %v2091_v45  ;;  %v6924_v40 = vld [vmem:[%s5968_s25 + $0x44] sm:$0xf] }
 0x132   : > { %v5021_v36 = vpop.f32.mrf.mxu1  ;;  %v5111_v27 = vpop.f32.mrf.mxu0  ;;  %5374 = vmatpush3.bf16.msra.mxu1 %v5846_v61 }
 0x133   : > { %5441 = vmatprep.subr.bf16.mxu1 %v7991_v1  ;;  %v6913_v48 = vadd.f32 %v731_v22, %v566_v8 }
 0x134   : > { %v568_v3 = vpop.f32.mrf.mxu1  ;;  %v1064_v25 = vpop.f32.mrf.mxu0 }
 0x135   : > { %v569_v51 = vadd.f32 %v568_v3, %v6697_v55  ;;  %v6933_v55 = vcombine.low %v6924_v40, %v6924_v40  ;;  %v2098_v3 = vrot.slane %v6921_v6, 1 }
 0x136   : > { %v5022_v36 = vpop.f32.mrf.mxu1  ;;  %v5112_v61 = vpop.f32.mrf.mxu0 }
 0x137   : > { %v6926_v27 = vadd.f32 %v734_v12, %v569_v51  ;;  %v2095_v12 = vor.u32 %v6918_v54, %v2091_v45 }
 0x138   : > { %v881_v22 = vpop.f32.mrf.mxu1  ;;  %5312 = vmatmul.mubr.msk.bf16.gmra.mxu1 %vm324_vm3, %v6793_v37  ;;  %v1069_v8 = vpop.f32.mrf.mxu0  ;;  %5354 = vmatmul.mubr.msk.bf16.gmra.mxu0 %vm324_vm3, %v2092_v52 }
 0x139   : > { %v936_v7 = vadd.f32 %v881_v22, %v6718_v4  ;;  %5315 = vmatprep.mubr.msk.bf16.mxu1 %vm5914_vm1, %v7991_v1  ;;  %5357 = vmatprep.mubr.msk.bf16.mxu0 %vm5914_vm1, %v7991_v1  ;;  %v7994_v4 = vshll.u32 %v6933_v55, 16  ;;  %v2099_v5 = vsel %vm236_vm2, %v2095_v12, %v2098_v3 }
 0x13a   : > { %v5073_v51 = vpop.f32.mrf.mxu1  ;;  %v5115_v36 = vpop.f32.mrf.mxu0 }
 0x13b   : > { %v6942_v61 = vadd.f32 %v1061_v15, %v936_v7  ;;  %v2102_v7 = vor.u32 %v6945_v0, %v2098_v3  ;;  %v2106_v51 = vrot.slane %v7994_v4, 1  ;;  %v8010_v36 = vmov 0.0  }
 0x13c   : > { %v884_v52 = vpop.f32.mrf.mxu1  ;;  %v1072_v59 = vpop.f32.mrf.mxu0  ;;  %v8011_v3 = vshrl.u32 %v6724_v32, 16 }
 0x13d   : > { %v937_v22 = vadd.f32 %v884_v52, %v6726_v38 }
 0x13e   : > { %v5074_v56 = vpop.f32.mrf.mxu1  ;;  %v5116_v1 = vpop.f32.mrf.mxu0 }
 0x13f   : > { %v6950_v45 = vadd.f32 %v1064_v25, %v937_v22  ;;  %v2451_v22 = vrot.slane %v8011_v3, 1 }
 0x140   : > { %v889_v31 = vpop.f32.mrf.mxu1  ;;  %5316 = vmatmul.mubr.msk.bf16.gmra.mxu1 %vm324_vm3, %v6834_v23  ;;  %v1077_v15 = vpop.f32.mrf.mxu0  ;;  %5358 = vmatmul.mubr.msk.bf16.gmra.mxu0 %vm324_vm3, %v2099_v5  ;;  %v2107_v5 = vsel %vm236_vm2, %v2102_v7, %v2106_v51 }
 0x141   : > { %v938_v38 = vadd.f32 %v889_v31, %v6738_v20  ;;  %5319 = vmatprep.mubr.msk.bf16.mxu1 %vm5914_vm1, %v8010_v36  ;;  %5361 = vmatprep.mubr.msk.bf16.mxu0 %vm5914_vm1, %v8010_v36  ;;  %v8012_v31 = vshll.u32 %v6724_v32, 16 }
 0x142   : > { %v5077_v1 = vpop.f32.mrf.mxu1  ;;  %v5119_v56 = vpop.f32.mrf.mxu0 }
 0x143   : > { %v6963_v25 = vadd.f32 %v1069_v8, %v938_v38  ;;  %v2452_v20 = vrot.slane %v8012_v31, 2 }
 0x144   : > { %v892_v12 = vpop.f32.mrf.mxu1  ;;  %v1080_v52 = vpop.f32.mrf.mxu0 }
 0x145   : > { %v939_v4 = vadd.f32 %v892_v12, %v6750_v47  ;;  %v2453_v51 = vor.u32 %v2452_v20, %v2451_v22  ;;  %v2456_v12 = vor.u32 %v2455_v34, %v2454_v13 }
 0x146   : > { %v5078_v1 = vpop.f32.mrf.mxu1  ;;  %v5120_v56 = vpop.f32.mrf.mxu0 }
 0x147   : > { %v6973_v8 = vadd.f32 %v1072_v59, %v939_v4  ;;  %v5849_v4 = vld [vmem:[%s7984_s1 + $0x218] ss:$0 sps:$4 sm:$0x11]   ;;  %v2457_v56 = vsel %vm762_vm7, %v2453_v51, %v2456_v12 }
 0x148   : > { %v897_v38 = vpop.f32.mrf.mxu1  ;;  %5320 = vmatmul.mubr.msk.bf16.gmra.mxu1 %vm324_vm3, %v6867_v50  ;;  %v1085_v7 = vpop.f32.mrf.mxu0  ;;  %5362 = vmatmul.mubr.msk.bf16.gmra.mxu0 %vm324_vm3, %v2107_v5  ;;  %v2871_v34 = vsel %vm346_vm0, %v5849_v4, 0 }
 0x149   : > { %v940_v47 = vadd.f32 %v897_v38, %v6770_v21  ;;  %5323 = vmatprep.mubr.msk.bf16.mxu1 %vm5914_vm1, %v8010_v36  ;;  %5413 = vmatprep.mubr.msk.bf16.mxu0 %vm5914_vm1, %v8010_v36  ;;  %v2458_v38 = vrot.slane %v6809_v62, 1 }
 0x14a   : > { %v5081_v3 = vpop.f32.mrf.mxu1  ;;  %v5123_v59 = vpop.f32.mrf.mxu0 }
 0x14b   : > { %v6986_v31 = vadd.f32 %v1077_v15, %v940_v47  ;;  %v2273_v47 = vrot.slane %v6031_v35, 1  ;;  %v2460_v59 = vor.u32 %v2459_v44, %v2458_v38 }
 0x14c   : > { %v900_v1 = vpop.f32.mrf.mxu1  ;;  %v1088_v5 = vpop.f32.mrf.mxu0 }
 0x14d   : > { %v941_v21 = vadd.f32 %v900_v1, %v6782_v18  ;;  %v2272_v18 = vrot.slane %v6724_v32, 1 }
 0x14e   : > { %v5082_v22 = vpop.f32.mrf.mxu1  ;;  %v5124_v13 = vpop.f32.mrf.mxu0 }
 0x14f   : > { %v6993_v20 = vadd.f32 %v1080_v52, %v941_v21  ;;  %v5851_v52 = vld [vmem:[%s7984_s1 + $0x210] sm:$0xff]   ;;  %v2274_v44 = vsel %vm582_vm5, %v2272_v18, %v2273_v47  ;;  %v2461_v13 = vsel %vm762_vm7, %v2456_v12, %v2460_v59 }
 0x150   : > { %v905_v3 = vpop.f32.mrf.mxu1  ;;  %5324 = vmatmul.mubr.msk.bf16.gmra.mxu1 %vm324_vm3, %v6903_v41  ;;  %v1093_v15 = vpop.f32.mrf.mxu0  ;;  %5414 = vmatmul.mubr.msk.bf16.vlgmr.msra.gmra.mxu0 %vm324_vm3, %v2457_v56  ;;  %v5848_v21 = vld [vmem:[%s7984_s1 + $0x1f4] ss:$0 sps:$4 sm:$0x11]  }
 0x151   : > { %v942_v51 = vadd.f32 %v905_v3, %v6804_v16  ;;  %5375 = vmatprep.mubr.msk.bf16.mxu1 %vm5914_vm1, %v8010_v36  ;;  %5480 = vmatpush3.bf16.msra.mxu0 %v2871_v34  ;;  %v2462_v34 = vrot.slane %v6848_v39, 1  ;;  %v2463_v3 = vrot.slane %v6812_v26, 2 }
 0x152   : > { %v5085_v4 = vpop.f32.mrf.mxu1  ;;  %v5127_v1 = vpop.f32.mrf.mxu0  ;;  %5417 = vmatprep.mubr.msk.bf16.mxu0 %vm5914_vm1, %v8010_v36  ;;  %5481 = vmatprep.subr.bf16.mxu0 %v8010_v36 }
 0x153   : > { %v7012_v16 = vadd.f32 %v1085_v7, %v942_v51  ;;  %v2712_v1 = vsel %vm346_vm0, %v5848_v21, 0  ;;  %v5853_v7 = vld [vmem:[%s7984_s1 + $0x208] sm:$0xff]   ;;  %v2275_v51 = vrot.slane %v6765_v29, 1 }
 0x154   : > { %v908_v56 = vpop.f32.mrf.mxu1  ;;  %v1096_v38 = vpop.f32.mrf.mxu0 }
 0x155   : > { %v943_v22 = vadd.f32 %v908_v56, %v6819_v60  ;;  %5482 = vmatpush3.bf16.msra.mxu0 %v5851_v52 }
 0x156   : > { %v5086_v4 = vpop.f32.mrf.mxu1  ;;  %v5128_v58 = vpop.f32.mrf.mxu0  ;;  %5483 = vmatprep.subr.bf16.mxu0 %v8010_v36 }
 0x157   : > { %v7024_v18 = vadd.f32 %v1088_v5, %v943_v22  ;;  %v2464_v58 = vor.u32 %v2463_v3, %v2462_v34  ;;  %v5850_v5 = vld [vmem:[%s7984_s1 + $0x1ec] sm:$0xff]  }
 0x158   : > { %v913_v60 = vpop.f32.mrf.mxu1  ;;  %5376 = vmatmul.mubr.msk.bf16.vlgmr.msra.gmra.mxu1 %vm324_vm3, %v2274_v44  ;;  %v1101_v12 = vpop.f32.mrf.mxu0  ;;  %5418 = vmatmul.mubr.msk.bf16.gmra.mxu0 %vm324_vm3, %v2461_v13  ;;  %v2276_v13 = vsel %vm582_vm5, %v2273_v47, %v2275_v51 }
 0x159   : > { %v944_v52 = vadd.f32 %v913_v60, %v6842_v57  ;;  %5442 = vmatpush3.bf16.msra.mxu1 %v2712_v1  ;;  %5379 = vmatprep.mubr.msk.bf16.mxu1 %vm5914_vm1, %v8010_v36  ;;  %v5855_v57 = vld [vmem:[%s7984_s1 + $0x200] sm:$0xff]   ;;  %v2465_v4 = vsel %vm762_vm7, %v2460_v59, %v2464_v58  ;;  %v2466_v1 = vrot.slane %v6887_v42, 1 }
 0x15a   : > { %v5089_v21 = vpop.f32.mrf.mxu1  ;;  %v5131_v56 = vpop.f32.mrf.mxu0  ;;  %5421 = vmatprep.mubr.msk.bf16.mxu0 %vm5914_vm1, %v8010_v36  ;;  %5443 = vmatprep.subr.bf16.mxu1 %v8010_v36 }
 0x15b   : > { %5484 = vmatpush3.bf16.msra.mxu0 %v5853_v7  ;;  %v7041_v44 = vadd.f32 %v1093_v15, %v944_v52  ;;  %v2467_v7 = vrot.slane %v6851_v63, 2  ;;  %v5852_v15 = vld [vmem:[%s7984_s1 + $0x1e4] sm:$0xff]  }
 0x15c   : > { %v916_v22 = vpop.f32.mrf.mxu1  ;;  %v1104_v34 = vpop.f32.mrf.mxu0  ;;  %5485 = vmatprep.subr.bf16.mxu0 %v8010_v36 }
 0x15d   : > { %v945_v3 = vadd.f32 %v916_v22, %v6860_v9  ;;  %5444 = vmatpush3.bf16.msra.mxu1 %v5850_v5  ;;  %v5857_v9 = vld [vmem:[%s7984_s1 + $0x1f8] sm:$0xff]   ;;  %v2277_v5 = vrot.slane %v6793_v37, 1 }
 0x15e   : > { %v5090_v60 = vpop.f32.mrf.mxu1  ;;  %v5132_v21 = vpop.f32.mrf.mxu0  ;;  %5445 = vmatprep.subr.bf16.mxu1 %v8010_v36 }
 0x15f   : > { %5486 = vmatpush3.bf16.msra.mxu0 %v5855_v57  ;;  %v7056_v47 = vadd.f32 %v1096_v38, %v945_v3  ;;  %v2468_v57 = vor.u32 %v2467_v7, %v2466_v1  ;;  %v2470_v21 = vrot.slane %v6918_v54, 1 }
 0x160   : > { %v921_v59 = vpop.f32.mrf.mxu1  ;;  %5380 = vmatmul.mubr.msk.bf16.gmra.mxu1 %vm324_vm3, %v2276_v13  ;;  %v1109_v52 = vpop.f32.mrf.mxu0  ;;  %5422 = vmatmul.mubr.msk.bf16.gmra.mxu0 %vm324_vm3, %v2465_v4  ;;  %v5854_v13 = vld [vmem:[%s7984_s1 + $0x1dc] sm:$0xff]   ;;  %v2278_v4 = vsel %vm582_vm5, %v2275_v51, %v2277_v5 }
 0x161   : > { %v946_v56 = vadd.f32 %v921_v59, %v6881_v46  ;;  %5383 = vmatprep.mubr.msk.bf16.mxu1 %vm5914_vm1, %v8010_v36  ;;  %5425 = vmatprep.mubr.msk.bf16.mxu0 %vm5914_vm1, %v8010_v36  ;;  %v2469_v7 = vsel %vm762_vm7, %v2464_v58, %v2468_v57  ;;  %v2279_v58 = vrot.slane %v6834_v23, 1 }
 0x162   : > { %v5093_v22 = vpop.f32.mrf.mxu1  ;;  %v5135_v38 = vpop.f32.mrf.mxu0  ;;  %5446 = vmatpush3.bf16.msra.mxu1 %v5852_v15  ;;  %5487 = vmatprep.subr.bf16.mxu0 %v8010_v36  ;;  %v2471_v15 = vrot.slane %v6890_v49, 2 }
 0x163   : > { %5447 = vmatprep.subr.bf16.mxu1 %v8010_v36  ;;  %5488 = vmatpush3.bf16.msra.mxu0 %v5857_v9  ;;  %v7071_v46 = vadd.f32 %v1101_v12, %v946_v56  ;;  %v5856_v12 = vld [vmem:[%s7984_s1 + $0x1d4] sm:$0xff]  }
 0x164   : > { %v924_v3 = vpop.f32.mrf.mxu1  ;;  %v1112_v60 = vpop.f32.mrf.mxu0  ;;  %5555 = vmatprep.subr.bf16.mxu0 %v8010_v36  ;;  %v2472_v38 = vor.u32 %v2471_v15, %v2470_v21 }
 0x165   : > { %v947_v1 = vadd.f32 %v924_v3, %v6896_v14 }
 0x166   : > { %v5094_v59 = vpop.f32.mrf.mxu1  ;;  %v5136_v22 = vpop.f32.mrf.mxu0  ;;  %5448 = vmatpush3.bf16.msra.mxu1 %v5854_v13 }
 0x167   : > { %5449 = vmatprep.subr.bf16.mxu1 %v8010_v36  ;;  %v7083_v51 = vadd.f32 %v1104_v34, %v947_v1  ;;  %v2280_v1 = vsel %vm582_vm5, %v2277_v5, %v2279_v58  ;;  %v2473_v59 = vsel %vm762_vm7, %v2468_v57, %v2472_v38  ;;  %v2474_v22 = vrot.slane %v6945_v0, 1 }
 0x168   : > { %v929_v9 = vpop.f32.mrf.mxu1  ;;  %5384 = vmatmul.mubr.msk.bf16.gmra.mxu1 %vm324_vm3, %v2278_v4  ;;  %v1437_v14 = vpop.f32.mrf.mxu0  ;;  %5426 = vmatmul.mubr.msk.bf16.gmra.mxu0 %vm324_vm3, %v2469_v7  ;;  %v2281_v5 = vrot.slane %v6867_v50, 1 }
 0x169   : > { %v948_v56 = vadd.f32 %v929_v9, %v6913_v48  ;;  %5387 = vmatprep.mubr.msk.bf16.mxu1 %vm5914_vm1, %v8010_v36  ;;  %5429 = vmatprep.mubr.msk.bf16.mxu0 %vm5914_vm1, %v8010_v36  ;;  %v2475_v9 = vrot.slane %v6921_v6, 2 }
 0x16a   : > { %v5097_v13 = vpop.f32.mrf.mxu1  ;;  %v5187_v34 = vpop.f32.mrf.mxu0  ;;  %5450 = vmatpush3.bf16.msra.mxu1 %v5856_v12 }
 0x16b   : > { %5517 = vmatprep.subr.bf16.mxu1 %v8010_v36  ;;  %v7094_v3 = vadd.f32 %v1109_v52, %v948_v56  ;;  %v2476_v57 = vor.u32 %v2475_v9, %v2474_v22 }
 0x16c   : > { %v932_v4 = vpop.f32.mrf.mxu1  ;;  %v1440_v7 = vpop.f32.mrf.mxu0 }
 0x16d   : > { %v949_v48 = vadd.f32 %v932_v4, %v6926_v27 }
 0x16e   : > { %v5098_v21 = vpop.f32.mrf.mxu1  ;;  %v5188_v15 = vpop.f32.mrf.mxu0 }
 0x16f   : > { %v7101_v13 = vadd.f32 %v1112_v60, %v949_v48  ;;  %v2478_v60 = vshrl.u32 %v6933_v55, 16  ;;  %v2282_v48 = vsel %vm582_vm5, %v2279_v58, %v2281_v5 }
 0x170   : > { %v1257_v12 = vpop.f32.mrf.mxu1  ;;  %5388 = vmatmul.mubr.msk.bf16.gmra.mxu1 %vm324_vm3, %v2280_v1  ;;  %v1445_v52 = vpop.f32.mrf.mxu0  ;;  %5430 = vmatmul.mubr.msk.bf16.gmra.mxu0 %vm324_vm3, %v2473_v59 }
 0x171   : > { %v1312_v27 = vadd.f32 %v1257_v12, %v6942_v61  ;;  %5391 = vmatprep.mubr.msk.bf16.mxu1 %vm5914_vm1, %v8010_v36  ;;  %5433 = vmatprep.mubr.msk.bf16.mxu0 %vm5914_vm1, %v8010_v36  ;;  %v2477_v61 = vsel %vm762_vm7, %v2472_v38, %v2476_v57  ;;  %v2480_v15 = vrot.slane %v2478_v60, 1  ;;  %v8013_v12 = vshll.u32 %v6933_v55, 16 }
 0x172   : > { %v5149_v56 = vpop.f32.mrf.mxu1  ;;  %v5191_v34 = vpop.f32.mrf.mxu0 }
 0x173   : > { %v7112_v4 = vadd.f32 %v1437_v14, %v1312_v27  ;;  %v2481_v33 = vrot.slane %v8013_v12, 2 }
 0x174   : > { %v1260_v1 = vpop.f32.mrf.mxu1  ;;  %v1448_v59 = vpop.f32.mrf.mxu0 }
 0x175   : > { %v1313_v21 = vadd.f32 %v1260_v1, %v6950_v45  ;;  %v2283_v45 = vrot.slane %v6903_v41, 1 }
 0x176   : > { %v5150_v43 = vpop.f32.mrf.mxu1  ;;  %v5192_v22 = vpop.f32.mrf.mxu0 }
 0x177   : > { %v7119_v9 = vadd.f32 %v1440_v7, %v1313_v21  ;;  %v2482_v43 = vor.u32 %v2481_v33, %v2480_v15 }
 0x178   : > { %v1265_v56 = vpop.f32.mrf.mxu1  ;;  %5392 = vmatmul.mubr.msk.bf16.gmra.mxu1 %vm324_vm3, %v2282_v48  ;;  %v1453_v14 = vpop.f32.mrf.mxu0  ;;  %5434 = vmatmul.mubr.msk.bf16.gmra.mxu0 %vm324_vm3, %v2477_v61  ;;  %v2284_v48 = vsel %vm582_vm5, %v2281_v5, %v2283_v45  ;;  %v2649_v5 = vrot.slane %v6031_v35, 2 }
 0x179   : > { %v1314_v58 = vadd.f32 %v1265_v56, %v6963_v25  ;;  %5395 = vmatprep.mubr.msk.bf16.mxu1 %vm5914_vm1, %v8010_v36  ;;  %5437 = vmatprep.mubr.msk.bf16.mxu0 %vm5914_vm1, %v8010_v36  ;;  %v2483_v25 = vsel %vm762_vm7, %v2476_v57, %v2482_v43  ;;  %v2651_v57 = vrot.slane %v6765_v29, 2  ;;  %v5859_v56 = vld [vmem:[%s7984_s1 + $0x260] ss:$0 sps:$4 sm:$0x11]  }
 0x17a   : > { %v5153_v38 = vpop.f32.mrf.mxu1  ;;  %v5195_v7 = vpop.f32.mrf.mxu0 }
 0x17b   : > { %v7129_v27 = vadd.f32 %v1445_v52, %v1314_v58 }
 0x17c   : > { %v1268_v60 = vpop.f32.mrf.mxu1  ;;  %v1456_v34 = vpop.f32.mrf.mxu0 }
 0x17d   : > { %v1315_v1 = vadd.f32 %v1268_v60, %v6973_v8  ;;  %v2285_v8 = vrot.slane %v6933_v55, 1  ;;  %v7154_v60 = vsel %vm960_vm4, %v2649_v5, %v2651_v57 }
 0x17e   : > { %v5154_v21 = vpop.f32.mrf.mxu1  ;;  %v5196_v61 = vpop.f32.mrf.mxu0 }
 0x17f   : > { %v7134_v12 = vadd.f32 %v1448_v59, %v1315_v1  ;;  %v2286_v7 = vsel %vm582_vm5, %v2283_v45, %v2285_v8  ;;  %v2648_v45 = vrot.slane %v6724_v32, 2 }
 0x180   : > { %v1273_v22 = vpop.f32.mrf.mxu1  ;;  %5396 = vmatmul.mubr.msk.bf16.gmra.mxu1 %vm324_vm3, %v2284_v48  ;;  %v1461_v33 = vpop.f32.mrf.mxu0  ;;  %5438 = vmatmul.mubr.msk.bf16.gmra.mxu0 %vm324_vm3, %v2483_v25  ;;  %v3255_v25 = vsel %vm346_vm0, %v5859_v56, 0 }
 0x181   : > { %v1316_v52 = vadd.f32 %v1273_v22, %v6986_v31  ;;  %5399 = vmatprep.mubr.msk.bf16.mxu1 %vm5914_vm1, %v8010_v36  ;;  %5489 = vmatprep.mubr.msk.bf16.mxu0 %vm5914_vm1, %v8010_v36  ;;  %v2653_v22 = vrot.slane %v6793_v37, 2 }
 0x182   : > { %v5157_v59 = vpop.f32.mrf.mxu1  ;;  %v5199_v15 = vpop.f32.mrf.mxu0 }
 0x183   : > { %v7149_v58 = vadd.f32 %v1453_v14, %v1316_v52  ;;  %v5858_v59 = vld [vmem:[%s7984_s1 + $0x23c] ss:$0 sps:$4 sm:$0x11]  }
 0x184   : > { %v1276_v31 = vpop.f32.mrf.mxu1  ;;  %v1464_v43 = vpop.f32.mrf.mxu0 }
 0x185   : > { %v1317_v38 = vadd.f32 %v1276_v31, %v6993_v20  ;;  %v2650_v31 = vsel %vm960_vm4, %v2648_v45, %v2649_v5 }
 0x186   : > { %v5158_v1 = vpop.f32.mrf.mxu1  ;;  %v5200_v48 = vpop.f32.mrf.mxu0 }
 0x187   : > { %v7157_v21 = vadd.f32 %v1456_v34, %v1317_v38  ;;  %v5861_v34 = vld [vmem:[%s7984_s1 + $0x258] sm:$0xff]   ;;  %v7181_v38 = vsel %vm960_vm4, %v2651_v57, %v2653_v22  ;;  %v3076_v1 = vsel %vm346_vm0, %v5858_v59, 0  ;;  %v2655_v57 = vrot.slane %v6834_v23, 2 }
 0x188   : > { %v1281_v61 = vpop.f32.mrf.mxu1  ;;  %5400 = vmatmul.mubr.msk.bf16.gmra.mxu1 %vm324_vm3, %v2286_v7  ;;  %v1469_v14 = vpop.f32.mrf.mxu0  ;;  %5490 = vmatmul.mubr.msk.bf16.vlgmr.msra.gmra.mxu0 %vm324_vm3, %v7154_v60 }
 0x189   : > { %v1318_v20 = vadd.f32 %v1281_v61, %v7012_v16  ;;  %5451 = vmatprep.mubr.msk.bf16.mxu1 %vm5914_vm1, %v8010_v36  ;;  %5556 = vmatpush3.bf16.msra.mxu0 %v3255_v25 }
 0x18a   : > { %v5161_v52 = vpop.f32.mrf.mxu1  ;;  %v5203_v8 = vpop.f32.mrf.mxu0  ;;  %5493 = vmatprep.mubr.msk.bf16.mxu0 %vm5914_vm1, %v8010_v36  ;;  %5557 = vmatprep.subr.bf16.mxu0 %v8010_v36 }
 0x18b   : > { %v7176_v16 = vadd.f32 %v1461_v33, %v1318_v20  ;;  %v5863_v33 = vld [vmem:[%s7984_s1 + $0x250] sm:$0xff]  }
 0x18c   : > { %v1284_v32 = vpop.f32.mrf.mxu1  ;;  %v1472_v15 = vpop.f32.mrf.mxu0 }
 0x18d   : > { %v1319_v56 = vadd.f32 %v1284_v32, %v7024_v18  ;;  %5558 = vmatpush3.bf16.msra.mxu0 %v5861_v34  ;;  %v2656_v32 = vsel %vm960_vm4, %v2653_v22, %v2655_v57 }
 0x18e   : > { %v5162_v7 = vpop.f32.mrf.mxu1  ;;  %v5204_v48 = vpop.f32.mrf.mxu0  ;;  %5559 = vmatprep.subr.bf16.mxu0 %v8010_v36 }
 0x18f   : > { %v7188_v25 = vadd.f32 %v1464_v43, %v1319_v56  ;;  %v5860_v43 = vld [vmem:[%s7984_s1 + $0x234] sm:$0xff]   ;;  %v5862_v7 = vld [vmem:[%s7984_s1 + $0x22c] sm:$0xff]  }
 0x190   : > { %v1289_v61 = vpop.f32.mrf.mxu1  ;;  %5452 = vmatmul.mubr.msk.bf16.vlgmr.msra.gmra.mxu1 %vm324_vm3, %v2650_v31  ;;  %v1477_v18 = vpop.f32.mrf.mxu0  ;;  %5494 = vmatmul.mubr.msk.bf16.gmra.mxu0 %vm324_vm3, %v7181_v38 }
 0x191   : > { %v1320_v5 = vadd.f32 %v1289_v61, %v7041_v44  ;;  %5518 = vmatpush3.bf16.msra.mxu1 %v3076_v1  ;;  %5455 = vmatprep.mubr.msk.bf16.mxu1 %vm5914_vm1, %v8010_v36  ;;  %v5866_v44 = vld [vmem:[%s7984_s1 + $0x248] sm:$0xff]  }
 0x192   : > { %v5165_v20 = vpop.f32.mrf.mxu1  ;;  %v5207_v45 = vpop.f32.mrf.mxu0  ;;  %5497 = vmatprep.mubr.msk.bf16.mxu0 %vm5914_vm1, %v8010_v36  ;;  %5519 = vmatprep.subr.bf16.mxu1 %v8010_v36 }
 0x193   : > { %5560 = vmatpush3.bf16.msra.mxu0 %v5863_v33  ;;  %v7206_v34 = vadd.f32 %v1469_v14, %v1320_v5  ;;  %v5869_v14 = vld [vmem:[%s7984_s1 + $0x240] sm:$0xff]   ;;  %v2657_v33 = vrot.slane %v6867_v50, 2 }
 0x194   : > { %v1292_v52 = vpop.f32.mrf.mxu1  ;;  %v1480_v8 = vpop.f32.mrf.mxu0  ;;  %5561 = vmatprep.subr.bf16.mxu0 %v8010_v36 }
 0x195   : > { %v1321_v59 = vadd.f32 %v1292_v52, %v7056_v47  ;;  %5520 = vmatpush3.bf16.msra.mxu1 %v5860_v43  ;;  %v2658_v45 = vsel %vm960_vm4, %v2655_v57, %v2657_v33  ;;  %v7254_v57 = vrot.slane %v6903_v41, 2 }
 0x196   : > { %v5166_v56 = vpop.f32.mrf.mxu1  ;;  %v5208_v31 = vpop.f32.mrf.mxu0  ;;  %5521 = vmatprep.subr.bf16.mxu1 %v8010_v36 }
 0x197   : > { %5562 = vmatpush3.bf16.msra.mxu0 %v5866_v44  ;;  %v7218_v1 = vadd.f32 %v1472_v15, %v1321_v59  ;;  %v5868_v59 = vld [vmem:[%s7984_s1 + $0x21c] sm:$0xff]  }
 0x198   : > { %v1297_v48 = vpop.f32.mrf.mxu1  ;;  %5456 = vmatmul.mubr.msk.bf16.gmra.mxu1 %vm324_vm3, %v7154_v60  ;;  %v1485_v47 = vpop.f32.mrf.mxu0  ;;  %5498 = vmatmul.mubr.msk.bf16.gmra.mxu0 %vm324_vm3, %v2656_v32  ;;  %v5864_v60 = vld [vmem:[%s7984_s1 + $0x224] sm:$0xff]  }
 0x199   : > { %v1322_v22 = vadd.f32 %v1297_v48, %v7071_v46  ;;  %5459 = vmatprep.mubr.msk.bf16.mxu1 %vm5914_vm1, %v8010_v36  ;;  %5501 = vmatprep.mubr.msk.bf16.mxu0 %vm5914_vm1, %v8010_v36 }
 0x19a   : > { %v5169_v61 = vpop.f32.mrf.mxu1  ;;  %v5211_v15 = vpop.f32.mrf.mxu0  ;;  %5522 = vmatpush3.bf16.msra.mxu1 %v5862_v7  ;;  %5563 = vmatprep.subr.bf16.mxu0 %v8010_v36 }
 0x19b   : > { %5523 = vmatprep.subr.bf16.mxu1 %v8010_v36  ;;  %5564 = vmatpush3.bf16.msra.mxu0 %v5869_v14  ;;  %v7234_v46 = vadd.f32 %v1477_v18, %v1322_v22  ;;  %v7257_v14 = vld [vmem:[%s5968_s25 + $0x48] sm:$0xf]  ;;  %v2660_v61 = vsel %vm960_vm4, %v2657_v33, %v7254_v57 }
 0x19c   : > { %v1300_v5 = vpop.f32.mrf.mxu1  ;;  %v1488_v43 = vpop.f32.mrf.mxu0  ;;  %5631 = vmatprep.subr.bf16.mxu0 %v8010_v36  ;;  %v7267_v15 = vcombine.low %v6924_v40, %v7257_v14 }
 0x19d   : > { %v1323_v20 = vadd.f32 %v1300_v5, %v7083_v51 }
 0x19e   : > { %v5170_v44 = vpop.f32.mrf.mxu1  ;;  %v5212_v52 = vpop.f32.mrf.mxu0  ;;  %5524 = vmatpush3.bf16.msra.mxu1 %v5864_v60  ;;  %v2833_v40 = vrot.slane %v7267_v15, 2 }
 0x19f   : > { %5525 = vmatprep.subr.bf16.mxu1 %v8010_v36  ;;  %v7243_v18 = vadd.f32 %v1480_v8, %v1323_v20 }
 0x1a0   : > { %v1305_v56 = vpop.f32.mrf.mxu1  ;;  %5460 = vmatmul.mubr.msk.bf16.gmra.mxu1 %vm324_vm3, %v7181_v38  ;;  %v1802_v31 = vpop.f32.mrf.mxu0  ;;  %5502 = vmatmul.mubr.msk.bf16.gmra.mxu0 %vm324_vm3, %v2658_v45 }
 0x1a1   : > { %v1324_v51 = vadd.f32 %v1305_v56, %v7094_v3  ;;  %5463 = vmatprep.mubr.msk.bf16.mxu1 %vm5914_vm1, %v8010_v36  ;;  %5505 = vmatprep.mubr.msk.bf16.mxu0 %vm5914_vm1, %v8010_v36 }
 0x1a2   : > { %v5173_v8 = vpop.f32.mrf.mxu1  ;;  %v5263_v7 = vpop.f32.mrf.mxu0  ;;  %5526 = vmatpush3.bf16.msra.mxu1 %v5868_v59 }
 0x1a3   : > { %5593 = vmatprep.subr.bf16.mxu1 %v8010_v36  ;;  %v7260_v38 = vadd.f32 %v1485_v47, %v1324_v51 }
 0x1a4   : > { %v1308_v48 = vpop.f32.mrf.mxu1  ;;  %v1805_v3 = vpop.f32.mrf.mxu0 }
 0x1a5   : > { %v1325_v22 = vadd.f32 %v1308_v48, %v7101_v13 }
 0x1a6   : > { %v5174_v60 = vpop.f32.mrf.mxu1  ;;  %v5264_v5 = vpop.f32.mrf.mxu0 }
 0x1a7   : > { %v7269_v20 = vadd.f32 %v1488_v43, %v1325_v22  ;;  %v7280_v43 = vld [vmem:[%s5968_s25 + $0x4c] sm:$0xf] }
 0x1a8   : > { %v1596_v44 = vpop.f32.mrf.mxu1  ;;  %5464 = vmatmul.mubr.msk.bf16.gmra.mxu1 %vm324_vm3, %v2656_v32  ;;  %v1810_v47 = vpop.f32.mrf.mxu0  ;;  %5506 = vmatmul.mubr.msk.bf16.gmra.mxu0 %vm324_vm3, %v2660_v61  ;;  %v7289_v8 = vcombine.low %v7280_v43, %v7280_v43 }
 0x1a9   : > { %v1651_v13 = vadd.f32 %v1596_v44, %v7112_v4  ;;  %5467 = vmatprep.mubr.msk.bf16.mxu1 %vm5914_vm1, %v8010_v36  ;;  %5509 = vmatprep.mubr.msk.bf16.mxu0 %vm5914_vm1, %v8010_v36  ;;  %v2834_v4 = vsel %vm960_vm4, %v7254_v57, %v2833_v40 }
 0x1aa   : > { %v5225_v33 = vpop.f32.mrf.mxu1  ;;  %v5267_v52 = vpop.f32.mrf.mxu0 }
 0x1ab   : > { %v7282_v59 = vadd.f32 %v1802_v31, %v1651_v13 }
 0x1ac   : > { %v1599_v32 = vpop.f32.mrf.mxu1  ;;  %v1813_v56 = vpop.f32.mrf.mxu0 }
 0x1ad   : > { %v1652_v51 = vadd.f32 %v1599_v32, %v7119_v9  ;;  %v2835_v9 = vrot.slane %v7289_v8, 2 }
 0x1ae   : > { %v5226_v7 = vpop.f32.mrf.mxu1  ;;  %v5268_v48 = vpop.f32.mrf.mxu0 }
 0x1af   : > { %v7291_v22 = vadd.f32 %v1805_v3, %v1652_v51  ;;  %v2836_v32 = vsel %vm960_vm4, %v2833_v40, %v2835_v9  ;;  %v3192_v40 = vrot.slane %v6765_v29, 3 }
 0x1b0   : > { %v1604_v60 = vpop.f32.mrf.mxu1  ;;  %5468 = vmatmul.mubr.msk.bf16.gmra.mxu1 %vm324_vm3, %v2658_v45  ;;  %v1818_v31 = vpop.f32.mrf.mxu0  ;;  %5510 = vmatmul.mubr.msk.bf16.gmra.mxu0 %vm324_vm3, %v2834_v4 }
 0x1b1   : > { %v1653_v5 = vadd.f32 %v1604_v60, %v7129_v27  ;;  %5471 = vmatprep.mubr.msk.bf16.mxu1 %vm5914_vm1, %v8010_v36  ;;  %5513 = vmatprep.mubr.msk.bf16.mxu0 %vm5914_vm1, %v8010_v36 }
 0x1b2   : > { %v5229_v44 = vpop.f32.mrf.mxu1  ;;  %v5271_v13 = vpop.f32.mrf.mxu0 }
 0x1b3   : > { %v7301_v3 = vadd.f32 %v1810_v47, %v1653_v5  ;;  %v2661_v47 = vrot.slane %v6933_v55, 2  ;;  %v2986_v13 = vrot.slane %v6776_v30, 2  ;;  %v2987_v55 = vrot.slane %v6748_v19, 3 }
 0x1b4   : > { %v1607_v33 = vpop.f32.mrf.mxu1  ;;  %v1821_v52 = vpop.f32.mrf.mxu0 }
 0x1b5   : > { %v1654_v45 = vadd.f32 %v1607_v33, %v7134_v12  ;;  %v3191_v12 = vrot.slane %v6031_v35, 3  ;;  %v2989_v33 = vrot.slane %v6809_v62, 2  ;;  %v2990_v35 = vrot.slane %v6779_v2, 3 }
 0x1b6   : > { %v5230_v51 = vpop.f32.mrf.mxu1  ;;  %v5272_v27 = vpop.f32.mrf.mxu0 }
 0x1b7   : > { %v7305_v4 = vadd.f32 %v1813_v56, %v1654_v45  ;;  %v2662_v45 = vsel %vm960_vm4, %v7254_v57, %v2661_v47  ;;  %v2991_v24 = vor.u32 %v2990_v35, %v2989_v33  ;;  %v3194_v57 = vrot.slane %v6793_v37, 3 }
 0x1b8   : > { %v1612_v7 = vpop.f32.mrf.mxu1  ;;  %5472 = vmatmul.mubr.msk.bf16.gmra.mxu1 %vm324_vm3, %v2660_v61  ;;  %v1826_v48 = vpop.f32.mrf.mxu0  ;;  %5514 = vmatmul.mubr.msk.bf16.gmra.mxu0 %vm324_vm3, %v2836_v32  ;;  %v5871_v61 = vld [vmem:[%s7984_s1 + $0x2a8] ss:$0 sps:$4 sm:$0x11]   ;;  %v3193_v32 = vsel %vm1336_vm6, %v3191_v12, %v3192_v40  ;;  %v2993_v35 = vrot.slane %v6848_v39, 2 }
 0x1b9   : > { %v1655_v60 = vadd.f32 %v1612_v7, %v7149_v58  ;;  %5475 = vmatprep.mubr.msk.bf16.mxu1 %vm5914_vm1, %v8010_v36  ;;  %5565 = vmatprep.mubr.msk.bf16.mxu0 %vm5914_vm1, %v8010_v36  ;;  %v3603_v27 = vsel %vm346_vm0, %v5871_v61, 0  ;;  %v5870_v61 = vld [vmem:[%s7984_s1 + $0x284] ss:$0 sps:$4 sm:$0x11]   ;;  %v3195_v33 = vsel %vm1336_vm6, %v3192_v40, %v3194_v57 }
 0x1ba   : > { %v5233_v56 = vpop.f32.mrf.mxu1  ;;  %v5275_v5 = vpop.f32.mrf.mxu0 }
 0x1bb   : > { %v7320_v9 = vadd.f32 %v1818_v31, %v1655_v60  ;;  %v2988_v5 = vor.u32 %v2987_v55, %v2986_v13 }
 0x1bc   : > { %v1615_v58 = vpop.f32.mrf.mxu1  ;;  %v1829_v44 = vpop.f32.mrf.mxu0 }
 0x1bd   : > { %v1656_v29 = vadd.f32 %v1615_v58, %v7157_v21  ;;  %v2992_v37 = vsel %vm1140_vm8, %v2988_v5, %v2991_v24  ;;  %v3196_v5 = vrot.slane %v6834_v23, 3 }
 0x1be   : > { %v5234_v51 = vpop.f32.mrf.mxu1  ;;  %v5276_v31 = vpop.f32.mrf.mxu0 }
 0x1bf   : > { %v7331_v7 = vadd.f32 %v1821_v52, %v1656_v29  ;;  %v5873_v52 = vld [vmem:[%s7984_s1 + $0x2a0] sm:$0xff]   ;;  %v2994_v29 = vrot.slane %v6812_v26, 3 }
 0x1c0   : > { %v1620_v60 = vpop.f32.mrf.mxu1  ;;  %5476 = vmatmul.mubr.msk.bf16.gmra.mxu1 %vm324_vm3, %v2662_v45  ;;  %v1834_v56 = vpop.f32.mrf.mxu0  ;;  %5566 = vmatmul.mubr.msk.bf16.vlgmr.msra.gmra.mxu0 %vm324_vm3, %v3193_v32  ;;  %v3450_v32 = vsel %vm346_vm0, %v5870_v61, 0  ;;  %v2997_v61 = vrot.slane %v6887_v42, 2 }
 0x1c1   : > { %v1657_v21 = vadd.f32 %v1620_v60, %v7176_v16  ;;  %5527 = vmatprep.mubr.msk.bf16.mxu1 %vm5914_vm1, %v8010_v36  ;;  %5632 = vmatpush3.bf16.msra.mxu0 %v3603_v27  ;;  %v2995_v60 = vor.u32 %v2994_v29, %v2993_v35 }
 0x1c2   : > { %v5237_v47 = vpop.f32.mrf.mxu1  ;;  %v5279_v12 = vpop.f32.mrf.mxu0  ;;  %5569 = vmatprep.mubr.msk.bf16.mxu0 %vm5914_vm1, %v8010_v36  ;;  %5633 = vmatprep.subr.bf16.mxu0 %v8010_v36 }
 0x1c3   : > { %v7348_v16 = vadd.f32 %v1826_v48, %v1657_v21  ;;  %v5875_v48 = vld [vmem:[%s7984_s1 + $0x298] sm:$0xff]  }
 0x1c4   : > { %v1623_v58 = vpop.f32.mrf.mxu1  ;;  %v1837_v13 = vpop.f32.mrf.mxu0 }
 0x1c5   : > { %v1658_v55 = vadd.f32 %v1623_v58, %v7188_v25  ;;  %5634 = vmatpush3.bf16.msra.mxu0 %v5873_v52  ;;  %v2998_v58 = vrot.slane %v6851_v63, 3 }
 0x1c6   : > { %v5238_v45 = vpop.f32.mrf.mxu1  ;;  %v5280_v51 = vpop.f32.mrf.mxu0  ;;  %5635 = vmatprep.subr.bf16.mxu0 %v8010_v36 }
 0x1c7   : > { %v7360_v31 = vadd.f32 %v1829_v44, %v1658_v55  ;;  %v5872_v44 = vld [vmem:[%s7984_s1 + $0x27c] sm:$0xff]   ;;  %v2996_v55 = vsel %vm1140_vm8, %v2991_v24, %v2995_v60  ;;  %v5879_v45 = vld [vmem:[%s7984_s1 + $0x288] sm:$0xff]  }
 0x1c8   : > { %v1628_v25 = vpop.f32.mrf.mxu1  ;;  %5528 = vmatmul.mubr.msk.bf16.vlgmr.msra.gmra.mxu1 %vm324_vm3, %v2992_v37  ;;  %v1842_v40 = vpop.f32.mrf.mxu0  ;;  %5570 = vmatmul.mubr.msk.bf16.gmra.mxu0 %vm324_vm3, %v3195_v33  ;;  %v3197_v33 = vsel %vm1336_vm6, %v3194_v57, %v3196_v5  ;;  %v2999_v57 = vor.u32 %v2998_v58, %v2997_v61  ;;  %v3002_v61 = vrot.slane %v6890_v49, 3 }
 0x1c9   : > { %v1659_v27 = vadd.f32 %v1628_v25, %v7206_v34  ;;  %5594 = vmatpush3.bf16.msra.mxu1 %v3450_v32  ;;  %5531 = vmatprep.mubr.msk.bf16.mxu1 %vm5914_vm1, %v8010_v36  ;;  %v5877_v34 = vld [vmem:[%s7984_s1 + $0x290] sm:$0xff]  }
 0x1ca   : > { %v5241_v21 = vpop.f32.mrf.mxu1  ;;  %v5283_v52 = vpop.f32.mrf.mxu0  ;;  %5573 = vmatprep.mubr.msk.bf16.mxu0 %vm5914_vm1, %v8010_v36  ;;  %5595 = vmatprep.subr.bf16.mxu1 %v8010_v36 }
 0x1cb   : > { %5636 = vmatpush3.bf16.msra.mxu0 %v5875_v48  ;;  %v7377_v47 = vadd.f32 %v1834_v56, %v1659_v27  ;;  %v5874_v56 = vld [vmem:[%s7984_s1 + $0x274] sm:$0xff]   ;;  %v3198_v48 = vrot.slane %v6867_v50, 3  ;;  %v5876_v27 = vld [vmem:[%s7984_s1 + $0x26c] sm:$0xff]   ;;  %v3000_v21 = vsel %vm1140_vm8, %v2995_v60, %v2999_v57 }
 0x1cc   : > { %v1631_v12 = vpop.f32.mrf.mxu1  ;;  %v1845_v23 = vpop.f32.mrf.mxu0  ;;  %5637 = vmatprep.subr.bf16.mxu0 %v8010_v36 }
 0x1cd   : > { %v1660_v37 = vadd.f32 %v1631_v12, %v7218_v1  ;;  %5596 = vmatpush3.bf16.msra.mxu1 %v5872_v44  ;;  %v3001_v12 = vrot.slane %v6918_v54, 2 }
 0x1ce   : > { %v5242_v35 = vpop.f32.mrf.mxu1  ;;  %v5284_v29 = vpop.f32.mrf.mxu0  ;;  %5597 = vmatprep.subr.bf16.mxu1 %v8010_v36 }
 0x1cf   : > { %5638 = vmatpush3.bf16.msra.mxu0 %v5877_v34  ;;  %v7392_v32 = vadd.f32 %v1837_v13, %v1660_v37  ;;  %v3199_v34 = vsel %vm1336_vm6, %v3196_v5, %v3198_v48  ;;  %v3200_v35 = vrot.slane %v6903_v41, 3 }
 0x1d0   : > { %v1636_v1 = vpop.f32.mrf.mxu1  ;;  %5532 = vmatmul.mubr.msk.bf16.gmra.mxu1 %vm324_vm3, %v2996_v55  ;;  %v1850_v24 = vpop.f32.mrf.mxu0  ;;  %5574 = vmatmul.mubr.msk.bf16.gmra.mxu0 %vm324_vm3, %v3197_v33  ;;  %v3003_v33 = vor.u32 %v3002_v61, %v3001_v12 }
 0x1d1   : > { %v1661_v51 = vadd.f32 %v1636_v1, %v7234_v46  ;;  %5535 = vmatprep.mubr.msk.bf16.mxu1 %vm5914_vm1, %v8010_v36  ;;  %5577 = vmatprep.mubr.msk.bf16.mxu0 %vm5914_vm1, %v8010_v36 }
 0x1d2   : > { %v5245_v25 = vpop.f32.mrf.mxu1  ;;  %v5287_v13 = vpop.f32.mrf.mxu0  ;;  %5598 = vmatpush3.bf16.msra.mxu1 %v5874_v56  ;;  %5639 = vmatprep.subr.bf16.mxu0 %v8010_v36 }
 0x1d3   : > { %5599 = vmatprep.subr.bf16.mxu1 %v8010_v36  ;;  %5640 = vmatpush3.bf16.msra.mxu0 %v5879_v45  ;;  %v7407_v46 = vadd.f32 %v1842_v40, %v1661_v51  ;;  %v5878_v40 = vld [vmem:[%s7984_s1 + $0x264] sm:$0xff]   ;;  %v3006_v51 = vrot.slane %v6921_v6, 3  ;;  %v3004_v13 = vsel %vm1140_vm8, %v2999_v57, %v3003_v33  ;;  %v3010_v57 = vshrl.u32 %v7267_v15, 16 }
 0x1d4   : > { %v1639_v44 = vpop.f32.mrf.mxu1  ;;  %v1853_v52 = vpop.f32.mrf.mxu0  ;;  %5707 = vmatprep.subr.bf16.mxu0 %v8010_v36 }
 0x1d5   : > { %v1662_v50 = vadd.f32 %v1639_v44, %v7243_v18 }
 0x1d6   : > { %v5246_v58 = vpop.f32.mrf.mxu1  ;;  %v5288_v37 = vpop.f32.mrf.mxu0  ;;  %5600 = vmatpush3.bf16.msra.mxu1 %v5876_v27  ;;  %v3201_v27 = vsel %vm1336_vm6, %v3198_v48, %v3200_v35  ;;  %v3013_v48 = vshll.u32 %v7267_v15, 16 }
 0x1d7   : > { %5601 = vmatprep.subr.bf16.mxu1 %v8010_v36  ;;  %v7419_v60 = vadd.f32 %v1845_v23, %v1662_v50 }
 0x1d8   : > { %v1644_v55 = vpop.f32.mrf.mxu1  ;;  %5536 = vmatmul.mubr.msk.bf16.gmra.mxu1 %vm324_vm3, %v3000_v21  ;;  %v2193_v18 = vpop.f32.mrf.mxu0  ;;  %5578 = vmatmul.mubr.msk.bf16.gmra.mxu0 %vm324_vm3, %v3199_v34 }
 0x1d9   : > { %v1663_v5 = vadd.f32 %v1644_v55, %v7260_v38  ;;  %5539 = vmatprep.mubr.msk.bf16.mxu1 %vm5914_vm1, %v8010_v36  ;;  %5581 = vmatprep.mubr.msk.bf16.mxu0 %vm5914_vm1, %v8010_v36  ;;  %v3005_v38 = vrot.slane %v6945_v0, 2 }
 0x1da   : > { %v5249_v29 = vpop.f32.mrf.mxu1  ;;  %v5339_v23 = vpop.f32.mrf.mxu0  ;;  %5602 = vmatpush3.bf16.msra.mxu1 %v5878_v40 }
 0x1db   : > { %5669 = vmatprep.subr.bf16.mxu1 %v8010_v36  ;;  %v7430_v56 = vadd.f32 %v1850_v24, %v1663_v5  ;;  %v3007_v34 = vor.u32 %v3006_v51, %v3005_v38  ;;  %v3012_v29 = vrot.slane %v3010_v57, 2  ;;  %v3015_v23 = vrot.slane %v3013_v48, 3 }
 0x1dc   : > { %v1647_v45 = vpop.f32.mrf.mxu1  ;;  %v2196_v1 = vpop.f32.mrf.mxu0 }
 0x1dd   : > { %v1664_v25 = vadd.f32 %v1647_v45, %v7269_v20  ;;  %v3202_v20 = vrot.slane %v7267_v15, 3  ;;  %v3008_v40 = vsel %vm1140_vm8, %v3003_v33, %v3007_v34  ;;  %v3022_v33 = vshll.u32 %v7289_v8, 16 }
 0x1de   : > { %v5250_v41 = vpop.f32.mrf.mxu1  ;;  %v5340_v44 = vpop.f32.mrf.mxu0 }
 0x1df   : > { %v7437_v21 = vadd.f32 %v1853_v52, %v1664_v25  ;;  %v3203_v5 = vsel %vm1336_vm6, %v3200_v35, %v3202_v20 }
 0x1e0   : > { %v1973_v50 = vpop.f32.mrf.mxu1  ;;  %5540 = vmatmul.mubr.msk.bf16.gmra.mxu1 %vm324_vm3, %v3004_v13  ;;  %v2201_v24 = vpop.f32.mrf.mxu0  ;;  %5582 = vmatmul.mubr.msk.bf16.gmra.mxu0 %vm324_vm3, %v3201_v27  ;;  %v3016_v13 = vor.u32 %v3015_v23, %v3012_v29 }
 0x1e1   : > { %v2028_v12 = vadd.f32 %v1973_v50, %v7282_v59  ;;  %5543 = vmatprep.mubr.msk.bf16.mxu1 %vm5914_vm1, %v8010_v36  ;;  %5585 = vmatprep.mubr.msk.bf16.mxu0 %vm5914_vm1, %v8010_v36 }
 0x1e2   : > { %v5301_v52 = vpop.f32.mrf.mxu1  ;;  %v5343_v61 = vpop.f32.mrf.mxu0 }
 0x1e3   : > { %v7449_v58 = vadd.f32 %v2193_v18, %v2028_v12 }
 0x1e4   : > { %v1976_v37 = vpop.f32.mrf.mxu1  ;;  %v2204_v59 = vpop.f32.mrf.mxu0 }
 0x1e5   : > { %v2029_v55 = vadd.f32 %v1976_v37, %v7291_v22  ;;  %v3019_v22 = vshrl.u32 %v7289_v8, 16  ;;  %v3017_v37 = vsel %vm1140_vm8, %v3007_v34, %v3016_v13 }
 0x1e6   : > { %v5302_v45 = vpop.f32.mrf.mxu1  ;;  %v5344_v38 = vpop.f32.mrf.mxu0 }
 0x1e7   : > { %v7458_v51 = vadd.f32 %v2196_v1, %v2029_v55  ;;  %v3204_v1 = vrot.slane %v7289_v8, 3  ;;  %v3021_v52 = vrot.slane %v3019_v22, 2 }
 0x1e8   : > { %v1981_v18 = vpop.f32.mrf.mxu1  ;;  %5544 = vmatmul.mubr.msk.bf16.gmra.mxu1 %vm324_vm3, %v3008_v40  ;;  %v2209_v25 = vpop.f32.mrf.mxu0  ;;  %5586 = vmatmul.mubr.msk.bf16.gmra.mxu0 %vm324_vm3, %v3203_v5 }
 0x1e9   : > { %v2030_v35 = vadd.f32 %v1981_v18, %v7301_v3  ;;  %5547 = vmatprep.mubr.msk.bf16.mxu1 %vm5914_vm1, %v8010_v36  ;;  %5589 = vmatprep.mubr.msk.bf16.mxu0 %vm5914_vm1, %v8010_v36  ;;  %v3024_v3 = vrot.slane %v3022_v33, 3  ;;  %v3205_v40 = vsel %vm1336_vm6, %v3202_v20, %v3204_v1  ;;  %v5881_v20 = vld [vmem:[%s7984_s1 + $0x2f0] ss:$0 sps:$4 sm:$0x11]  }
 0x1ea   : > { %v5305_v27 = vpop.f32.mrf.mxu1  ;;  %v5347_v41 = vpop.f32.mrf.mxu0 }
 0x1eb   : > { %v7470_v44 = vadd.f32 %v2201_v24, %v2030_v35  ;;  %v3025_v45 = vor.u32 %v3024_v3, %v3021_v52  ;;  %v3371_v41 = vrot.slane %v6748_v19, 4  ;;  %v3374_v52 = vrot.slane %v6779_v2, 4 }
 0x1ec   : > { %v1984_v50 = vpop.f32.mrf.mxu1  ;;  %v2212_v12 = vpop.f32.mrf.mxu0 }
 0x1ed   : > { %v2031_v61 = vadd.f32 %v1984_v50, %v7305_v4  ;;  %v3026_v35 = vsel %vm1140_vm8, %v3016_v13, %v3025_v45  ;;  %v3373_v50 = vrot.slane %v6809_v62, 3  ;;  %v5883_v62 = vld [vmem:[%s7984_s1 + $0x2e8] sm:$0xff]  }
 0x1ee   : > { %v5306_v55 = vpop.f32.mrf.mxu1  ;;  %v5348_v5 = vpop.f32.mrf.mxu0 }
 0x1ef   : > { %v7479_v29 = vadd.f32 %v2204_v59, %v2031_v61  ;;  %v3375_v2 = vor.u32 %v3374_v52, %v3373_v50  ;;  %v5880_v55 = vld [vmem:[%s7984_s1 + $0x2cc] ss:$0 sps:$4 sm:$0x11]  }
 0x1f0   : > { %v1989_v24 = vpop.f32.mrf.mxu1  ;;  %5548 = vmatmul.mubr.msk.bf16.gmra.mxu1 %vm324_vm3, %v3017_v37  ;;  %v2217_v23 = vpop.f32.mrf.mxu0  ;;  %5590 = vmatmul.mubr.msk.bf16.gmra.mxu0 %vm324_vm3, %v3205_v40  ;;  %v3946_v37 = vsel %vm346_vm0, %v5881_v20, 0  ;;  %v3783_v20 = vsel %vm346_vm0, %v5880_v55, 0 }
 0x1f1   : > { %v2032_v38 = vadd.f32 %v1989_v24, %v7320_v9  ;;  %5551 = vmatprep.mubr.msk.bf16.mxu1 %vm5914_vm1, %v8010_v36  ;;  %5641 = vmatprep.mubr.msk.bf16.mxu0 %vm5914_vm1, %v8010_v36  ;;  %v3370_v9 = vrot.slane %v6776_v30, 3 }
 0x1f2   : > { %v5309_v4 = vpop.f32.mrf.mxu1  ;;  %v5351_v34 = vpop.f32.mrf.mxu0 }
 0x1f3   : > { %v7491_v59 = vadd.f32 %v2209_v25, %v2032_v38  ;;  %v3372_v19 = vor.u32 %v3371_v41, %v3370_v9  ;;  %v3377_v38 = vrot.slane %v6848_v39, 3  ;;  %v3378_v4 = vrot.slane %v6812_v26, 4 }
 0x1f4   : > { %v1992_v18 = vpop.f32.mrf.mxu1  ;;  %v2220_v1 = vpop.f32.mrf.mxu0 }
 0x1f5   : > { %v2033_v27 = vadd.f32 %v1992_v18, %v7331_v7  ;;  %v3376_v45 = vsel %vm1675_vm9, %v3372_v19, %v3375_v2  ;;  %v3379_v39 = vor.u32 %v3378_v4, %v3377_v38  ;;  %v3385_v38 = vrot.slane %v6918_v54, 3 }
 0x1f6   : > { %v5310_v3 = vpop.f32.mrf.mxu1  ;;  %v5352_v61 = vpop.f32.mrf.mxu0  ;;  %v3386_v4 = vrot.slane %v6890_v49, 4 }
 0x1f7   : > { %v7500_v25 = vadd.f32 %v2212_v12, %v2033_v27  ;;  %v5882_v27 = vld [vmem:[%s7984_s1 + $0x2c4] sm:$0xff]   ;;  %v3380_v61 = vsel %vm1675_vm9, %v3375_v2, %v3379_v39 }
 0x1f8   : > { %v1997_v40 = vpop.f32.mrf.mxu1  ;;  %5552 = vmatmul.mubr.msk.bf16.gmra.mxu1 %vm324_vm3, %v3026_v35  ;;  %v2225_v13 = vpop.f32.mrf.mxu0  ;;  %5642 = vmatmul.mubr.msk.bf16.vlgmr.msra.gmra.mxu0 %vm324_vm3, %v5977_v10  ;;  %v3387_v54 = vor.u32 %v3386_v4, %v3385_v38 }
 0x1f9   : > { %v2034_v30 = vadd.f32 %v1997_v40, %v7348_v16  ;;  %5603 = vmatprep.mubr.msk.bf16.mxu1 %vm5914_vm1, %v8010_v36  ;;  %5708 = vmatpush3.bf16.msra.mxu0 %v3946_v37  ;;  %v3381_v37 = vrot.slane %v6887_v42, 3  ;;  %v3382_v40 = vrot.slane %v6851_v63, 4 }
 0x1fa   : > { %v5313_v7 = vpop.f32.mrf.mxu1  ;;  %v5355_v12 = vpop.f32.mrf.mxu0  ;;  %5645 = vmatprep.mubr.msk.bf16.mxu0 %vm5914_vm1, %v8010_v36  ;;  %5709 = vmatprep.subr.bf16.mxu0 %v8010_v36 }
 0x1fb   : > { %v7517_v10 = vadd.f32 %v2217_v23, %v2034_v30  ;;  %v5885_v23 = vld [vmem:[%s7984_s1 + $0x2e0] sm:$0xff]   ;;  %v3383_v7 = vor.u32 %v3382_v40, %v3381_v37 }
 0x1fc   : > { %v2000_v16 = vpop.f32.mrf.mxu1  ;;  %v2228_v5 = vpop.f32.mrf.mxu0 }
 0x1fd   : > { %v2035_v24 = vadd.f32 %v2000_v16, %v7360_v31  ;;  %5710 = vmatpush3.bf16.msra.mxu0 %v5883_v62  ;;  %v5886_v16 = vld [vmem:[%s7984_s1 + $0x2b4] sm:$0xff]  }
 0x1fe   : > { %v5314_v34 = vpop.f32.mrf.mxu1  ;;  %v5356_v18 = vpop.f32.mrf.mxu0  ;;  %5711 = vmatprep.subr.bf16.mxu0 %v8010_v36 }
 0x1ff   : > { %v7528_v35 = vadd.f32 %v2220_v1, %v2035_v24  ;;  %v5890_v18 = vld [vmem:[%s7984_s1 + $0x2ac] sm:$0xff]  }
 0x200   : > { %v2005_v31 = vpop.f32.mrf.mxu1  ;;  %5604 = vmatmul.mubr.msk.bf16.vlgmr.msra.gmra.mxu1 %vm324_vm3, %v3376_v45  ;;  %v2233_v9 = vpop.f32.mrf.mxu0  ;;  %5646 = vmatmul.mubr.msk.bf16.gmra.mxu0 %vm324_vm3, %v5979_v11  ;;  %v5888_v11 = vld [vmem:[%s7984_s1 + $0x2d8] sm:$0xff]   ;;  %v3384_v45 = vsel %vm1675_vm9, %v3379_v39, %v3383_v7 }
 0x201   : > { %v2036_v26 = vadd.f32 %v2005_v31, %v7377_v47  ;;  %5670 = vmatpush3.bf16.msra.mxu1 %v3783_v20  ;;  %5607 = vmatprep.mubr.msk.bf16.mxu1 %vm5914_vm1, %v8010_v36 }
 0x202   : > { %v5317_v1 = vpop.f32.mrf.mxu1  ;;  %v5359_v41 = vpop.f32.mrf.mxu0  ;;  %5649 = vmatprep.mubr.msk.bf16.mxu0 %vm5914_vm1, %v8010_v36  ;;  %5671 = vmatprep.subr.bf16.mxu1 %v8010_v36 }
 0x203   : > { %5712 = vmatpush3.bf16.msra.mxu0 %v5885_v23  ;;  %v7545_v47 = vadd.f32 %v2225_v13, %v2036_v26  ;;  %v5884_v13 = vld [vmem:[%s7984_s1 + $0x2bc] sm:$0xff]  }
 0x204   : > { %v2008_v50 = vpop.f32.mrf.mxu1  ;;  %v2236_v52 = vpop.f32.mrf.mxu0  ;;  %5713 = vmatprep.subr.bf16.mxu0 %v8010_v36 }
 0x205   : > { %v2037_v3 = vadd.f32 %v2008_v50, %v7392_v32  ;;  %5672 = vmatpush3.bf16.msra.mxu1 %v5882_v27  ;;  %v5891_v32 = vld [vmem:[%s7984_s1 + $0x2d0] sm:$0xff]  }
 0x206   : > { %v5318_v30 = vpop.f32.mrf.mxu1  ;;  %v5360_v19 = vpop.f32.mrf.mxu0  ;;  %5673 = vmatprep.subr.bf16.mxu1 %v8010_v36 }
 0x207   : > { %5714 = vmatpush3.bf16.msra.mxu0 %v5888_v11  ;;  %v7559_v62 = vadd.f32 %v2228_v5, %v2037_v3  ;;  %v3390_v11 = vrot.slane %v6921_v6, 4 }
 0x208   : > { %v2013_v2 = vpop.f32.mrf.mxu1  ;;  %5608 = vmatmul.mubr.msk.bf16.gmra.mxu1 %vm324_vm3, %v3380_v61  ;;  %v2241_v42 = vpop.f32.mrf.mxu0  ;;  %5650 = vmatmul.mubr.msk.bf16.gmra.mxu0 %vm324_vm3, %v6018_v28 }
 0x209   : > { %v2038_v63 = vadd.f32 %v2013_v2, %v7407_v46  ;;  %5611 = vmatprep.mubr.msk.bf16.mxu1 %vm5914_vm1, %v8010_v36  ;;  %5653 = vmatprep.mubr.msk.bf16.mxu0 %vm5914_vm1, %v8010_v36  ;;  %v5904_v2 = vld [vmem:[%s5968_s25 + $0x44] sm:$0xf] }
 0x20a   : > { %v5321_v12 = vpop.f32.mrf.mxu1  ;;  %v5363_v55 = vpop.f32.mrf.mxu0  ;;  %5674 = vmatpush3.bf16.msra.mxu1 %v5884_v13  ;;  %5715 = vmatprep.subr.bf16.mxu0 %v8010_v36 }
 0x20b   : > { %5675 = vmatprep.subr.bf16.mxu1 %v8010_v36  ;;  %5716 = vmatpush3.bf16.msra.mxu0 %v5891_v32  ;;  %v7574_v28 = vadd.f32 %v2233_v9, %v2038_v63  ;;  %v5903_v32 = vld [vmem:[%s5968_s25 + $0x40] sm:$0xf]  ;;  %v3394_v12 = vrot.slane %v3013_v48, 4 }
 0x20c   : > { %v2016_v46 = vpop.f32.mrf.mxu1  ;;  %v2244_v5 = vpop.f32.mrf.mxu0 }
 0x20d   : > { %v2039_v24 = vadd.f32 %v2016_v46, %v7419_v60 }
 0x20e   : > { %v5322_v34 = vpop.f32.mrf.mxu1  ;;  %v5364_v20 = vpop.f32.mrf.mxu0  ;;  %5676 = vmatpush3.bf16.msra.mxu1 %v5886_v16 }
 0x20f   : > { %5677 = vmatprep.subr.bf16.mxu1 %v8010_v36  ;;  %v7584_v23 = vadd.f32 %v2236_v52, %v2039_v24  ;;  %v7636_v34 = vcombine.low %v7257_v14, %v7280_v43 }
 0x210   : > { %v2021_v31 = vpop.f32.mrf.mxu1  ;;  %5612 = vmatmul.mubr.msk.bf16.gmra.mxu1 %vm324_vm3, %v3384_v45  ;;  %v2569_v60 = vpop.f32.mrf.mxu0  ;;  %5654 = vmatmul.mubr.msk.bf16.gmra.mxu0 %vm324_vm3, %v6071_v53  ;;  %v3388_v53 = vsel %vm1675_vm9, %v3383_v7, %v3387_v54  ;;  %v3393_v7 = vrot.slane %v3010_v57, 3 }
 0x211   : > { %v2040_v49 = vadd.f32 %v2021_v31, %v7430_v56  ;;  %5615 = vmatprep.mubr.msk.bf16.mxu1 %vm5914_vm1, %v8010_v36  ;;  %5657 = vmatprep.mubr.msk.bf16.mxu0 %vm5914_vm1, %v8010_v36  ;;  %v3389_v56 = vrot.slane %v6945_v0, 3  ;;  %v3398_v31 = vrot.slane %v3022_v33, 4 }
 0x212   : > { %v5325_v9 = vpop.f32.mrf.mxu1  ;;  %v5415_v26 = vpop.f32.mrf.mxu0  ;;  %5678 = vmatpush3.bf16.msra.mxu1 %v5890_v18  ;;  %v3395_v57 = vor.u32 %v3394_v12, %v3393_v7  ;;  %v3397_v18 = vrot.slane %v3019_v22, 3 }
 0x213   : > { %v7594_v39 = vadd.f32 %v2241_v42, %v2040_v49  ;;  %v3391_v0 = vor.u32 %v3390_v11, %v3389_v56  ;;  %v7614_v42 = vcombine.low %v5903_v32, %v5904_v2 }
 0x214   : > { %v2024_v27 = vpop.f32.mrf.mxu1  ;;  %v2572_v1 = vpop.f32.mrf.mxu0  ;;  %v3399_v43 = vor.u32 %v3398_v31, %v3397_v18 }
 0x215   : > { %v2041_v41 = vadd.f32 %v2024_v27, %v7437_v21 }
 0x216   : > { %v5326_v50 = vpop.f32.mrf.mxu1  ;;  %v5416_v52 = vpop.f32.mrf.mxu0 }
 0x217   : > { %v7600_v3 = vadd.f32 %v2244_v5, %v2041_v41  ;;  %v3400_v41 = vsel %vm1675_vm9, %v3395_v57, %v3399_v43  ;;  %v8014_v52 = vld [vmem:[#allocation6_spill] sm:$0xff] }
 0x218   : > { %v2372_v61 = vpop.f32.mrf.mxu1  ;;  %5616 = vmatmul.mubr.msk.bf16.gmra.mxu1 %vm324_vm3, %v3388_v53  ;;  %v2577_v37 = vpop.f32.mrf.mxu0  ;;  %5658 = vmatmul.mubr.msk.bf16.gmra.mxu0 %vm324_vm3, %v6676_v17 }
 0x219   : > { %v2427_v21 = vadd.f32 %v2372_v61, %v7449_v58  ;;  %5619 = vmatprep.mubr.msk.bf16.mxu1 %vm5914_vm1, %v8010_v36  ;;  %5661 = vmatprep.mubr.msk.bf16.mxu0 %vm5914_vm1, %v8010_v36  ;;  %v3392_v58 = vsel %vm1675_vm9, %v3387_v54, %v3391_v0 }
 0x21a   : > { %v5377_v6 = vpop.f32.mrf.mxu1  ;;  %v5419_v40 = vpop.f32.mrf.mxu0 }
 0x21b   : > { %v7610_v30 = vadd.f32 %v2569_v60, %v2427_v21 }
 0x21c   : > { %v2375_v19 = vpop.f32.mrf.mxu1  ;;  %v2580_v13 = vpop.f32.mrf.mxu0 }
 0x21d   : > { %v2428_v63 = vadd.f32 %v2375_v19, %v7458_v51 }
 0x21e   : > { %v5378_v55 = vpop.f32.mrf.mxu1  ;;  %v5420_v16 = vpop.f32.mrf.mxu0 }
 0x21f   : > { %v7622_v46 = vadd.f32 %v2572_v1, %v2428_v63 }
 0x220   : > { %v2380_v5 = vpop.f32.mrf.mxu1  ;;  %5620 = vmatmul.mubr.msk.bf16.gmra.mxu1 %vm324_vm3, %v3392_v58  ;;  %v2585_v24 = vpop.f32.mrf.mxu0  ;;  %5662 = vmatmul.mubr.msk.bf16.gmra.mxu0 %vm324_vm3, %v7614_v42  ;;  %v8016_v58 = vld [vmem:[#allocation7_spill] sm:$0xff] }
 0x221   : > { %v2429_v51 = vadd.f32 %v2380_v5, %v7470_v44  ;;  %5623 = vmatprep.mubr.msk.bf16.mxu1 %vm5914_vm1, %v8010_v36  ;;  %5665 = vmatprep.mubr.msk.bf16.mxu0 %vm5914_vm1, %v8010_v36  ;;  %v3396_v44 = vsel %vm1675_vm9, %v3391_v0, %v3395_v57 }
 0x222   : > { %v5381_v15 = vpop.f32.mrf.mxu1  ;;  %v5423_v48 = vpop.f32.mrf.mxu0 }
 0x223   : > { %v7632_v45 = vadd.f32 %v2577_v37, %v2429_v51 }
 0x224   : > { %v2383_v38 = vpop.f32.mrf.mxu1  ;;  %v2588_v4 = vpop.f32.mrf.mxu0 }
 0x225   : > { %v2430_v20 = vadd.f32 %v2383_v38, %v7479_v29 }
 0x226   : > { %v5382_v60 = vpop.f32.mrf.mxu1  ;;  %v5424_v49 = vpop.f32.mrf.mxu0 }
 0x227   : > { %v7644_v54 = vadd.f32 %v2580_v13, %v2430_v20 }
 0x228   : > { %v2388_v9 = vpop.f32.mrf.mxu1  ;;  %5624 = vmatmul.mubr.msk.bf16.gmra.mxu1 %vm324_vm3, %v3396_v44  ;;  %v2593_v26 = vpop.f32.mrf.mxu0  ;;  %5666 = vmatmul.mubr.msk.bf16.gmra.mxu0 %vm324_vm3, %v7636_v34 }
 0x229   : > { %v2431_v14 = vadd.f32 %v2388_v9, %v7491_v59  ;;  %5627 = vmatprep.mubr.msk.bf16.mxu1 %vm5914_vm1, %v8010_v36  ;;  %5717 = vmatprep.mubr.msk.bf16.mxu0 %vm5914_vm1, %v8010_v36 }
 0x22a   : > { %v5385_v8 = vpop.f32.mrf.mxu1  ;;  %v5427_v22 = vpop.f32.mrf.mxu0 }
 0x22b   : > { %v7654_v33 = vadd.f32 %v2585_v24, %v2431_v14 }
 0x22c   : > { %v2391_v29 = vpop.f32.mrf.mxu1  ;;  %v2596_v27 = vpop.f32.mrf.mxu0 }
 0x22d   : > { %v2432_v1 = vadd.f32 %v2391_v29, %v7500_v25  ;;  %v8020_v29 = vld [vmem:[#allocation4_spill] sm:$0xff] }
 0x22e   : > { %v5386_v53 = vpop.f32.mrf.mxu1  ;;  %v5428_v56 = vpop.f32.mrf.mxu0 }
 0x22f   : > { %v7658_v59 = vadd.f32 %v2588_v4, %v2432_v1  ;;  %v8018_v4 = vld [vmem:[#allocation9_spill] sm:$0xff]  ;;  %v3900_v53 = vrot.slane %v7614_v42, 1 }
 0x230   : > { %v2396_v11 = vpop.f32.mrf.mxu1  ;;  %5628 = vmatmul.mubr.msk.bf16.gmra.mxu1 %vm324_vm3, %v3400_v41  ;;  %v2601_v50 = vpop.f32.mrf.mxu0  ;;  %5718 = vmatmul.mubr.msk.bf16.vlgmr.msra.gmra.mxu0 %vm324_vm3, %v8014_v52 }
 0x231   : > { %v2433_v61 = vadd.f32 %v2396_v11, %v7517_v10  ;;  %5679 = vmatprep.mubr.msk.bf16.mxu1 %vm5914_vm1, %v8010_v36  ;;  %5721 = vmatprep.mubr.msk.bf16.mxu0 %vm5914_vm1, %v8010_v36  ;;  %v8015_v10 = vld [vmem:[#allocation2_spill] sm:$0xff] }
 0x232   : > { %v5389_v25 = vpop.f32.mrf.mxu1  ;;  %v5431_v37 = vpop.f32.mrf.mxu0 }
 0x233   : > { %v7668_v21 = vadd.f32 %v2593_v26, %v2433_v61  ;;  %v8019_v26 = vld [vmem:[#allocation8_spill] sm:$0xff] }
 0x234   : > { %v2399_v0 = vpop.f32.mrf.mxu1  ;;  %v2604_v6 = vpop.f32.mrf.mxu0 }
 0x235   : > { %v2434_v40 = vadd.f32 %v2399_v0, %v7528_v35 }
 0x236   : > { %v5390_v19 = vpop.f32.mrf.mxu1  ;;  %v5432_v13 = vpop.f32.mrf.mxu0 }
 0x237   : > { %v7671_v32 = vadd.f32 %v2596_v27, %v2434_v40 }
 0x238   : > { %v2404_v2 = vpop.f32.mrf.mxu1  ;;  %5680 = vmatmul.mubr.msk.bf16.vlgmr.msra.gmra.mxu1 %vm324_vm3, %v8015_v10  ;;  %v2609_v63 = vpop.f32.mrf.mxu0  ;;  %5722 = vmatmul.mubr.msk.bf16.gmra.mxu0 %vm324_vm3, %v8016_v58 }
 0x239   : > { %v2435_v7 = vadd.f32 %v2404_v2, %v7545_v47  ;;  %5683 = vmatprep.mubr.msk.bf16.mxu1 %vm5914_vm1, %v8010_v36  ;;  %5725 = vmatprep.mubr.msk.bf16.mxu0 %vm5914_vm1, %v8010_v36  ;;  %v8017_v47 = vld [vmem:[#allocation3_spill] sm:$0xff] }
 0x23a   : > { %v5393_v35 = vpop.f32.mrf.mxu1  ;;  %v5435_v12 = vpop.f32.mrf.mxu0 }
 0x23b   : > { %v7682_v55 = vadd.f32 %v2601_v50, %v2435_v7  ;;  %v3902_v35 = vrot.slane %v7636_v34, 1 }
 0x23c   : > { %v2407_v16 = vpop.f32.mrf.mxu1  ;;  %v2612_v5 = vpop.f32.mrf.mxu0 }
 0x23d   : > { %v2436_v24 = vadd.f32 %v2407_v16, %v7559_v62  ;;  %v3898_v62 = vrot.slane %v6676_v17, 1 }
 0x23e   : > { %v5394_v51 = vpop.f32.mrf.mxu1  ;;  %v5436_v57 = vpop.f32.mrf.mxu0 }
 0x23f   : > { %v7685_v15 = vadd.f32 %v2604_v6, %v2436_v24  ;;  %v3899_v14 = vsel %vm582_vm5, %v8019_v26, %v3898_v62  ;;  %v3901_v0 = vsel %vm582_vm5, %v3898_v62, %v3900_v53  ;;  %v3724_v6 = vshll.u32 %v7614_v42, 16 }
 0x240   : > { %v2412_v48 = vpop.f32.mrf.mxu1  ;;  %5684 = vmatmul.mubr.msk.bf16.gmra.mxu1 %vm324_vm3, %v8017_v47  ;;  %v2617_v38 = vpop.f32.mrf.mxu0  ;;  %5726 = vmatmul.mubr.msk.bf16.gmra.mxu0 %vm324_vm3, %v8018_v4  ;;  %v3731_v57 = vshll.u32 %v7636_v34, 16  ;;  %v3903_v47 = vsel %vm582_vm5, %v3900_v53, %v3902_v35 }
 0x241   : > { %v2437_v20 = vadd.f32 %v2412_v48, %v7574_v28  ;;  %5687 = vmatprep.mubr.msk.bf16.mxu1 %vm5914_vm1, %v8010_v36  ;;  %5729 = vmatprep.mubr.msk.bf16.mxu0 %vm5914_vm1, %v8010_v36  ;;  %v3726_v7 = vrot.slane %v3724_v6, 1 }
 0x242   : > { %v5397_v44 = vpop.f32.mrf.mxu1  ;;  %v5439_v18 = vpop.f32.mrf.mxu0 }
 0x243   : > { %v7697_v31 = vadd.f32 %v2609_v63, %v2437_v20 }
 0x244   : > { %v2415_v60 = vpop.f32.mrf.mxu1  ;;  %v2620_v49 = vpop.f32.mrf.mxu0 }
 0x245   : > { %v2438_v9 = vadd.f32 %v2415_v60, %v7584_v23  ;;  %v8021_v23 = vshll.u32 %v6676_v17, 16  ;;  %v3733_v60 = vrot.slane %v3731_v57, 1 }
 0x246   : > { %v5398_v28 = vpop.f32.mrf.mxu1  ;;  %v5440_v43 = vpop.f32.mrf.mxu0 }
 0x247   : > { %v7702_v8 = vadd.f32 %v2612_v5, %v2438_v9  ;;  %v3721_v41 = vrot.slane %v8021_v23, 1 }
 0x248   : > { %v2420_v22 = vpop.f32.mrf.mxu1  ;;  %5688 = vmatmul.mubr.msk.bf16.gmra.mxu1 %vm324_vm3, %v8020_v29  ;;  %v2907_v27 = vpop.f32.mrf.mxu0  ;;  %5730 = vmatmul.mubr.msk.bf16.gmra.mxu0 %vm324_vm3, %v3899_v14 }
 0x249   : > { %v2439_v1 = vadd.f32 %v2420_v22, %v7594_v39  ;;  %5691 = vmatprep.mubr.msk.bf16.mxu1 %vm5914_vm1, %v8010_v36  ;;  %5733 = vmatprep.mubr.msk.bf16.mxu0 %vm5914_vm1, %v8010_v36  ;;  %v8022_v39 = vld [vmem:[#allocation5_spill] sm:$0xff] }
 0x24a   : > { %v5401_v56 = vpop.f32.mrf.mxu1  ;;  %v5491_v11 = vpop.f32.mrf.mxu0  ;;  %v3722_v37 = vsel %vm236_vm2, %v8022_v39, %v3721_v41 }
 0x24b   : > { %v7715_v50 = vadd.f32 %v2617_v38, %v2439_v1  ;;  %v5892_v38 = vld [vmem:[%s5968_s25 + $0x50] ss:$0 sps:$4 sm:$0xff]   ;;  %s146_s25 = smul.u32 14, %s4203_s13 }
 0x24c   : > { %v2423_v52 = vpop.f32.mrf.mxu1  ;;  %v2910_v61 = vpop.f32.mrf.mxu0  ;;  %v3739_v1 = vshll.u32 %v5892_v38, 16 }
 0x24d   : > { %v2440_v25 = vadd.f32 %v2423_v52, %v7600_v3  ;;  %v8023_v3 = vshrl.u32 %v6676_v17, 16  ;;  %p147_p3 = scmp.lt.s32.totalorder %s146_s25, 55 }
 0x24e   : > { %v5402_v40 = vpop.f32.mrf.mxu1  ;;  %v5492_v19 = vpop.f32.mrf.mxu0 }
 0x24f   : > { %v7722_v13 = vadd.f32 %v2620_v49, %v2440_v25  ;;  %v3723_v58 = vor.u32 %v3721_v41, %v8023_v3  ;;  %s8025_s25 = smov (!%p147_p3, %s146_s25), 55 }
 0x250   : > { %v2748_v2 = vpop.f32.mrf.mxu1  ;;  %5692 = vmatmul.mubr.msk.bf16.gmra.mxu1 %vm324_vm3, %v3722_v37  ;;  %v2915_v10 = vpop.f32.mrf.mxu0  ;;  %5734 = vmatmul.mubr.msk.bf16.gmra.mxu0 %vm324_vm3, %v3901_v0  ;;  %s4207_s14 = sshll.u32 %s8025_s25, 2 }
 0x251   : > { %v2803_v63 = vadd.f32 %v2748_v2, %v7610_v30  ;;  %5695 = vmatprep.mubr.msk.bf16.mxu1 %vm5914_vm1, %v8010_v36  ;;  %5737 = vmatprep.mubr.msk.bf16.mxu0 %vm5914_vm1, %v8010_v36  ;;  %v3728_v30 = vshrl.u32 %v7614_v42, 16  ;;  %v3727_v17 = vsel %vm236_vm2, %v3723_v58, %v3726_v7  ;;  %s7906_s17 = scalar_lea.vmem %s7986_s3, %s4207_s14 }
 0x252   : > { %v5453_v12 = vpop.f32.mrf.mxu1  ;;  %v5495_v16 = vpop.f32.mrf.mxu0 }
 0x253   : > { %v7734_v5 = vadd.f32 %v2907_v27, %v2803_v63  ;;  %v3730_v42 = vor.u32 %v3728_v30, %v3726_v7 }
 0x254   : > { %v2751_v24 = vpop.f32.mrf.mxu1  ;;  %v2918_v51 = vpop.f32.mrf.mxu0 }
 0x255   : > { %v2804_v48 = vadd.f32 %v2751_v24, %v7622_v46  ;;  %v3904_v46 = vrot.slane %v5892_v38, 1  ;;  %v3734_v43 = vsel %vm236_vm2, %v3730_v42, %v3733_v60 }
 0x256   : > { %v5454_v4 = vpop.f32.mrf.mxu1  ;;  %v5496_v20 = vpop.f32.mrf.mxu0 }
 0x257   : > { %v7742_v62 = vadd.f32 %v2910_v61, %v2804_v48  ;;  %v3905_v27 = vsel %vm582_vm5, %v3902_v35, %v3904_v46  ;;  %v3741_v61 = vrot.slane %v3739_v1, 1 }
 0x258   : > { %v2756_v44 = vpop.f32.mrf.mxu1  ;;  %5696 = vmatmul.mubr.msk.bf16.gmra.mxu1 %vm324_vm3, %v3727_v17  ;;  %v2923_v18 = vpop.f32.mrf.mxu0  ;;  %5738 = vmatmul.mubr.msk.bf16.gmra.mxu0 %vm324_vm3, %v3903_v47 }
 0x259   : > { %v2805_v49 = vadd.f32 %v2756_v44, %v7632_v45  ;;  %5699 = vmatprep.mubr.msk.bf16.mxu1 %vm5914_vm1, %v8010_v36  ;;  %5741 = vmatprep.mubr.msk.bf16.mxu0 %vm5914_vm1, %v8010_v36  ;;  %v3735_v45 = vshrl.u32 %v7636_v34, 16 }
 0x25a   : > { %v5457_v9 = vpop.f32.mrf.mxu1  ;;  %v5499_v26 = vpop.f32.mrf.mxu0 }
 0x25b   : > { %v7751_v14 = vadd.f32 %v2915_v10, %v2805_v49 }
 0x25c   : > { %v2759_v28 = vpop.f32.mrf.mxu1  ;;  %v2926_v22 = vpop.f32.mrf.mxu0 }
 0x25d   : > { %v2806_v29 = vadd.f32 %v2759_v28, %v7644_v54  ;;  %v3737_v54 = vor.u32 %v3735_v45, %v3733_v60 }
 0x25e   : > { %v5458_v23 = vpop.f32.mrf.mxu1  ;;  %v5500_v41 = vpop.f32.mrf.mxu0 }
 0x25f   : > { %v7757_v53 = vadd.f32 %v2918_v51, %v2806_v29  ;;  %v3742_v40 = vsel %vm236_vm2, %v3737_v54, %v3741_v61 }
 0x260   : > { %v2764_v56 = vpop.f32.mrf.mxu1  ;;  %5700 = vmatmul.mubr.msk.bf16.gmra.mxu1 %vm324_vm3, %v3734_v43  ;;  %v2931_v11 = vpop.f32.mrf.mxu0  ;;  %5742 = vmatmul.mubr.msk.bf16.gmra.mxu0 %vm324_vm3, %v3905_v27 }
 0x261   : > { %v2807_v52 = vadd.f32 %v2764_v56, %v7654_v33  ;;  %5703 = vmatprep.mubr.msk.bf16.mxu1 %vm5914_vm1, %v8010_v36 }
 0x262   : > { %v5461_v25 = vpop.f32.mrf.mxu1  ;;  %v5503_v34 = vpop.f32.mrf.mxu0 }
 0x263   : > { %v7764_v39 = vadd.f32 %v2923_v18, %v2807_v52 }
 0x264   : > { %v2767_v37 = vpop.f32.mrf.mxu1  ;;  %v2934_v0 = vpop.f32.mrf.mxu0 }
 0x265   : > { %v2808_v6 = vadd.f32 %v2767_v37, %v7658_v59 }
 0x266   : > { %v5462_v19 = vpop.f32.mrf.mxu1  ;;  %v5504_v2 = vpop.f32.mrf.mxu0 }
 0x267   : > { %v7768_v10 = vadd.f32 %v2926_v22, %v2808_v6 }
 0x268   : > { %v2772_v33 = vpop.f32.mrf.mxu1  ;;  %5704 = vmatmul.mubr.msk.bf16.gmra.mxu1 %vm324_vm3, %v3742_v40  ;;  %v2939_v36 = vpop.f32.mrf.mxu0 }
 0x269   : > { %v2809_v63 = vadd.f32 %v2772_v33, %v7668_v21 }
 0x26a   : > { %v5465_v3 = vpop.f32.mrf.mxu1  ;;  %v5507_v58 = vpop.f32.mrf.mxu0 }
 0x26b   : > { %v7772_v7 = vadd.f32 %v2931_v11, %v2809_v63 }
 0x26c   : > { %v2775_v35 = vpop.f32.mrf.mxu1  ;;  %v2942_v12 = vpop.f32.mrf.mxu0 }
 0x26d   : > { %v2810_v59 = vadd.f32 %v2775_v35, %v7671_v32 }
 0x26e   : > { %v5466_v16 = vpop.f32.mrf.mxu1  ;;  %v5508_v24 = vpop.f32.mrf.mxu0 }
 0x26f   : > { %v7775_v51 = vadd.f32 %v2934_v0, %v2810_v59 }
 0x270   : > { %v2780_v30 = vpop.f32.mrf.mxu1  ;;  %v2947_v57 = vpop.f32.mrf.mxu0 }
 0x271   : > { %v2811_v48 = vadd.f32 %v2780_v30, %v7682_v55 }
 0x272   : > { %v5469_v17 = vpop.f32.mrf.mxu1  ;;  %v5511_v47 = vpop.f32.mrf.mxu0 }
 0x273   : > { %v7778_v38 = vadd.f32 %v2939_v36, %v2811_v48 }
 0x274   : > { %v2783_v21 = vpop.f32.mrf.mxu1  ;;  %v2950_v4 = vpop.f32.mrf.mxu0 }
 0x275   : > { %v2812_v20 = vadd.f32 %v2783_v21, %v7685_v15 }
 0x276   : > { %v5470_v44 = vpop.f32.mrf.mxu1  ;;  %v5512_v18 = vpop.f32.mrf.mxu0 }
 0x277   : > { %v7781_v42 = vadd.f32 %v2942_v12, %v2812_v20 }
 0x278   : > { %v2788_v32 = vpop.f32.mrf.mxu1  ;;  %v2955_v60 = vpop.f32.mrf.mxu0 }
 0x279   : > { %v2813_v49 = vadd.f32 %v2788_v32, %v7697_v31 }
 0x27a   : > { %v5473_v46 = vpop.f32.mrf.mxu1  ;;  %v5515_v9 = vpop.f32.mrf.mxu0 }
 0x27b   : > { %v7784_v26 = vadd.f32 %v2947_v57, %v2813_v49 }
 0x27c   : > { %v2791_v55 = vpop.f32.mrf.mxu1  ;;  %v2958_v28 = vpop.f32.mrf.mxu0 }
 0x27d   : > { %v2814_v43 = vadd.f32 %v2791_v55, %v7702_v8 }
 0x27e   : > { %v5474_v22 = vpop.f32.mrf.mxu1  ;;  %v5516_v29 = vpop.f32.mrf.mxu0 }
 0x27f   : > { %v7787_v27 = vadd.f32 %v2950_v4, %v2814_v43 }
 0x280   : > { %v2796_v15 = vpop.f32.mrf.mxu1  ;;  %v3291_v45 = vpop.f32.mrf.mxu0 }
 0x281   : > { %v2815_v1 = vadd.f32 %v2796_v15, %v7715_v50 }
 0x282   : > { %v5477_v23 = vpop.f32.mrf.mxu1  ;;  %v5567_v41 = vpop.f32.mrf.mxu0 }
 0x283   : > { %v7790_v56 = vadd.f32 %v2955_v60, %v2815_v1 }
 0x284   : > { %v2799_v31 = vpop.f32.mrf.mxu1  ;;  %v3294_v11 = vpop.f32.mrf.mxu0 }
 0x285   : > { %v2816_v52 = vadd.f32 %v2799_v31, %v7722_v13 }
 0x286   : > { %v5478_v54 = vpop.f32.mrf.mxu1  ;;  %v5568_v61 = vpop.f32.mrf.mxu0 }
 0x287   : > { %v7793_v25 = vadd.f32 %v2958_v28, %v2816_v52 }
 0x288   : > { %v3112_v8 = vpop.f32.mrf.mxu1  ;;  %v3299_v34 = vpop.f32.mrf.mxu0 }
 0x289   : > { %v3167_v37 = vadd.f32 %v3112_v8, %v7734_v5 }
 0x28a   : > { %v5529_v0 = vpop.f32.mrf.mxu1  ;;  %v5571_v6 = vpop.f32.mrf.mxu0 }
 0x28b   : > { %v7796_v40 = vadd.f32 %v3291_v45, %v3167_v37 }
 0x28c   : > { %v3115_v50 = vpop.f32.mrf.mxu1  ;;  %v3302_v19 = vpop.f32.mrf.mxu0 }
 0x28d   : > { %v3168_v2 = vadd.f32 %v3115_v50, %v7742_v62 }
 0x28e   : > { %v5530_v33 = vpop.f32.mrf.mxu1  ;;  %v5572_v36 = vpop.f32.mrf.mxu0 }
 0x28f   : > { %v7799_v63 = vadd.f32 %v3294_v11, %v3168_v2 }
 0x290   : > { %v3120_v13 = vpop.f32.mrf.mxu1  ;;  %v3307_v3 = vpop.f32.mrf.mxu0 }
 0x291   : > { %v3169_v58 = vadd.f32 %v3120_v13, %v7751_v14 }
 0x292   : > { %v5533_v35 = vpop.f32.mrf.mxu1  ;;  %v5575_v12 = vpop.f32.mrf.mxu0 }
 0x293   : > { %v7802_v59 = vadd.f32 %v3299_v34, %v3169_v58 }
 0x294   : > { %v3123_v5 = vpop.f32.mrf.mxu1  ;;  %v3310_v16 = vpop.f32.mrf.mxu0 }
 0x295   : > { %v3170_v24 = vadd.f32 %v3123_v5, %v7757_v53 }
 0x296   : > { %v5534_v30 = vpop.f32.mrf.mxu1  ;;  %v5576_v57 = vpop.f32.mrf.mxu0 }
 0x297   : > { %v7805_v48 = vadd.f32 %v3302_v19, %v3170_v24 }
 0x298   : > { %v3128_v62 = vpop.f32.mrf.mxu1  ;;  %v3315_v17 = vpop.f32.mrf.mxu0 }
 0x299   : > { %v3171_v47 = vadd.f32 %v3128_v62, %v7764_v39 }
 0x29a   : > { %v5537_v21 = vpop.f32.mrf.mxu1  ;;  %v5579_v4 = vpop.f32.mrf.mxu0 }
 0x29b   : > { %v7808_v20 = vadd.f32 %v3307_v3, %v3171_v47 }
 0x29c   : > { %v3131_v14 = vpop.f32.mrf.mxu1  ;;  %v3318_v44 = vpop.f32.mrf.mxu0 }
 0x29d   : > { %v3172_v18 = vadd.f32 %v3131_v14, %v7768_v10 }
 0x29e   : > { %v5538_v32 = vpop.f32.mrf.mxu1  ;;  %v5580_v60 = vpop.f32.mrf.mxu0 }
 0x29f   : > { %v7811_v49 = vadd.f32 %v3310_v16, %v3172_v18 }
 0x2a0   : > { %v3136_v53 = vpop.f32.mrf.mxu1  ;;  %v3323_v46 = vpop.f32.mrf.mxu0 }
 0x2a1   : > { %v3173_v9 = vadd.f32 %v3136_v53, %v7772_v7 }
 0x2a2   : > { %v5541_v55 = vpop.f32.mrf.mxu1  ;;  %v5583_v28 = vpop.f32.mrf.mxu0 }
 0x2a3   : > { %v7814_v43 = vadd.f32 %v3315_v17, %v3173_v9 }
 0x2a4   : > { %v3139_v39 = vpop.f32.mrf.mxu1  ;;  %v3326_v22 = vpop.f32.mrf.mxu0 }
 0x2a5   : > { %v3174_v29 = vadd.f32 %v3139_v39, %v7775_v51 }
 0x2a6   : > { %v5542_v15 = vpop.f32.mrf.mxu1  ;;  %v5584_v45 = vpop.f32.mrf.mxu0 }
 0x2a7   : > { %v7817_v1 = vadd.f32 %v3318_v44, %v3174_v29 }
 0x2a8   : > { %v3144_v10 = vpop.f32.mrf.mxu1  ;;  %v3331_v23 = vpop.f32.mrf.mxu0 }
 0x2a9   : > { %v3175_v41 = vadd.f32 %v3144_v10, %v7778_v38 }
 0x2aa   : > { %v5545_v31 = vpop.f32.mrf.mxu1  ;;  %v5587_v11 = vpop.f32.mrf.mxu0 }
 0x2ab   : > { %v7820_v52 = vadd.f32 %v3323_v46, %v3175_v41 }
 0x2ac   : > { %v3147_v7 = vpop.f32.mrf.mxu1  ;;  %v3334_v54 = vpop.f32.mrf.mxu0 }
 0x2ad   : > { %v3176_v61 = vadd.f32 %v3147_v7, %v7781_v42 }
 0x2ae   : > { %v5546_v8 = vpop.f32.mrf.mxu1  ;;  %v5588_v34 = vpop.f32.mrf.mxu0 }
 0x2af   : > { %v7823_v37 = vadd.f32 %v3326_v22, %v3176_v61 }
 0x2b0   : > { %v3152_v51 = vpop.f32.mrf.mxu1  ;;  %v3339_v0 = vpop.f32.mrf.mxu0 }
 0x2b1   : > { %v3177_v6 = vadd.f32 %v3152_v51, %v7784_v26 }
 0x2b2   : > { %v5549_v50 = vpop.f32.mrf.mxu1  ;;  %v5591_v19 = vpop.f32.mrf.mxu0 }
 0x2b3   : > { %v7826_v2 = vadd.f32 %v3331_v23, %v3177_v6 }
 0x2b4   : > { %v3155_v38 = vpop.f32.mrf.mxu1  ;;  %v3342_v33 = vpop.f32.mrf.mxu0 }
 0x2b5   : > { %v3178_v36 = vadd.f32 %v3155_v38, %v7787_v27 }
 0x2b6   : > { %v5550_v13 = vpop.f32.mrf.mxu1  ;;  %v5592_v3 = vpop.f32.mrf.mxu0 }
 0x2b7   : > { %v7829_v58 = vadd.f32 %v3334_v54, %v3178_v36 }
 0x2b8   : > { %v3160_v42 = vpop.f32.mrf.mxu1  ;;  %v7831_v35 = vpop.f32.mrf.mxu0 }
 0x2b9   : > { %v3179_v12 = vadd.f32 %v3160_v42, %v7790_v56 }
 0x2ba   : > { %v5553_v5 = vpop.f32.mrf.mxu1  ;;  %v5643_v16 = vpop.f32.mrf.mxu0 }
 0x2bb   : > { %v7834_v26 = vadd.f32 %v3339_v0, %v3179_v12 }
 0x2bc   : > { %v3163_v24 = vpop.f32.mrf.mxu1  ;;  %v7836_v30 = vpop.f32.mrf.mxu0 }
 0x2bd   : > { %v3180_v57 = vadd.f32 %v3163_v24, %v7793_v25 }
 0x2be   : > { %v5554_v62 = vpop.f32.mrf.mxu1  ;;  %v5644_v27 = vpop.f32.mrf.mxu0 }
 0x2bf   : > { %v7839_v17 = vadd.f32 %v3342_v33, %v3180_v57 }
 0x2c0   : > { %v3486_v47 = vpop.f32.mrf.mxu1  ;;  %v7841_v21 = vpop.f32.mrf.mxu0 }
 0x2c2   : > { %v5605_v4 = vpop.f32.mrf.mxu1  ;;  %v5647_v14 = vpop.f32.mrf.mxu0 }
 0x2c4   : > { %v3489_v44 = vpop.f32.mrf.mxu1  ;;  %v7843_v56 = vpop.f32.mrf.mxu0 }
 0x2c6   : > { %v5606_v18 = vpop.f32.mrf.mxu1  ;;  %v5648_v32 = vpop.f32.mrf.mxu0 }
 0x2c8   : > { %v3494_v60 = vpop.f32.mrf.mxu1  ;;  %v7845_v53 = vpop.f32.mrf.mxu0 }
 0x2ca   : > { %v5609_v46 = vpop.f32.mrf.mxu1  ;;  %v5651_v9 = vpop.f32.mrf.mxu0 }
 0x2cb   : > { %v3541_v46 = vadd.f32 %v3486_v47, %v7796_v40 }
 0x2cc   : > { %v7847_v25 = vpop.f32.mrf.mxu1  ;;  %v7849_v55 = vpop.f32.mrf.mxu0 }
 0x2ce   : > { %v5610_v28 = vpop.f32.mrf.mxu1  ;;  %v5652_v39 = vpop.f32.mrf.mxu0 }
 0x2d0   : > { %v7851_v22 = vpop.f32.mrf.mxu1  ;;  %v7853_v29 = vpop.f32.mrf.mxu0 }
 0x2d2   : > { %v5613_v15 = vpop.f32.mrf.mxu1  ;;  %v5655_v45 = vpop.f32.mrf.mxu0 }
 0x2d3   : > { %v3542_v45 = vadd.f32 %v3489_v44, %v7799_v63 }
 0x2d4   : > { %v7855_v10 = vpop.f32.mrf.mxu1  ;;  %v7857_v23 = vpop.f32.mrf.mxu0 }
 0x2d6   : > { %v5614_v41 = vpop.f32.mrf.mxu1  ;;  %v5656_v31 = vpop.f32.mrf.mxu0 }
 0x2d7   : > { %v3694_v41 = vadd.f32 %v7831_v35, %v3541_v46 }
 0x2d8   : > { %v7859_v11 = vpop.f32.mrf.mxu1  ;;  %v7861_v7 = vpop.f32.mrf.mxu0 }
 0x2da   : > { %v5617_v54 = vpop.f32.mrf.mxu1  ;;  %v5659_v61 = vpop.f32.mrf.mxu0 }
 0x2dc   : > { %v7863_v8 = vpop.f32.mrf.mxu1  ;;  %v7865_v34 = vpop.f32.mrf.mxu0 }
 0x2de   : > { %v5618_v51 = vpop.f32.mrf.mxu1  ;;  %v5660_v0 = vpop.f32.mrf.mxu0 }
 0x2df   : > { %v7895_v51 = vld [vmem:[%s7985_s2] ss:$0 sm:$0xff]  ;;  %v3543_v0 = vadd.f32 %v3494_v60, %v7802_v59 }
 0x2e0   : > { %v7867_v6 = vpop.f32.mrf.mxu1  ;;  %v7869_v50 = vpop.f32.mrf.mxu0 }
 0x2e2   : > { %v5621_v19 = vpop.f32.mrf.mxu1  ;;  %v5663_v38 = vpop.f32.mrf.mxu0 }
 0x2e3   : > { %v3695_v38 = vadd.f32 %v7836_v30, %v3542_v45 }
 0x2e4   : > { %v7871_v33 = vpop.f32.mrf.mxu1  ;;  %v7873_v36 = vpop.f32.mrf.mxu0 }
 0x2e6   : > { %v5622_v13 = vpop.f32.mrf.mxu1  ;;  %v5664_v3 = vpop.f32.mrf.mxu0 }
 0x2e8   : > { %v7875_v42 = vpop.f32.mrf.mxu1  ;;  %v7877_v12 = vpop.f32.mrf.mxu0 }
 0x2ea   : > { %v5625_v5 = vpop.f32.mrf.mxu1  ;;  %v5667_v16 = vpop.f32.mrf.mxu0 }
 0x2eb   : > { %v3544_v16 = vadd.f32 %v7847_v25, %v7805_v48  ;;  %v3545_v25 = vadd.f32 %v7851_v22, %v7808_v20 }
 0x2ec   : > { %v7879_v24 = vpop.f32.mrf.mxu1  ;;  %v7881_v57 = vpop.f32.mrf.mxu0 }
 0x2ee   : > { %v5626_v62 = vpop.f32.mrf.mxu1  ;;  %v5668_v27 = vpop.f32.mrf.mxu0 }
 0x2f0   : > { %v7883_v4 = vpop.f32.mrf.mxu1  ;;  %v3982_v14 = vpop.f32.mrf.mxu0 }
 0x2f2   : > { %v5629_v18 = vpop.f32.mrf.mxu1  ;;  %v5719_v32 = vpop.f32.mrf.mxu0 }
 0x2f3   : > { %v3696_v18 = vadd.f32 %v7841_v21, %v3543_v0  ;;  %v3546_v0 = vadd.f32 %v7855_v10, %v7811_v49 }
 0x2f4   : > { %v7888_v9 = vpop.f32.mrf.mxu1  ;;  %v3985_v28 = vpop.f32.mrf.mxu0 }
 0x2f6   : > { %v5630_v39 = vpop.f32.mrf.mxu1  ;;  %v5720_v15 = vpop.f32.mrf.mxu0 }
 0x2f7   : > { %v3697_v39 = vadd.f32 %v7843_v56, %v3544_v16 }
 0x2f8   : > { %v3819_v31 = vpop.f32.mrf.mxu1  ;;  %v3990_v54 = vpop.f32.mrf.mxu0 }
 0x2f9   : > { %v3874_v61 = vadd.f32 %v3819_v31, %v3694_v41 }
 0x2fa   : > { %v5681_v40 = vpop.f32.mrf.mxu1  ;;  %v5723_v47 = vpop.f32.mrf.mxu0 }
 0x2fb   : > { %v4037_v19 = vadd.f32 %v3982_v14, %v3874_v61 }
 0x2fc   : > { %v3822_v13 = vpop.f32.mrf.mxu1  ;;  %v3993_v63 = vpop.f32.mrf.mxu0 }
 0x2fd   : > { %v4058_v35 = vadd.f32 %v7895_v51, %v4037_v19  ;;  %v3875_v44 = vadd.f32 %v3822_v13, %v3695_v38 }
 0x2fe   : > { %v5682_v3 = vpop.f32.mrf.mxu1  ;;  %v5724_v5 = vpop.f32.mrf.mxu0 }
 0x2ff   : > { %v4072_v62 = vmax.f32 %v4058_v35, 0.0  ;;  %v4038_v27 = vadd.f32 %v3985_v28, %v3875_v44  ;;  %v3547_v5 = vadd.f32 %v7859_v11, %v7814_v43 }
 0x300   : > { %v3827_v59 = vpop.f32.mrf.mxu1  ;;  %v3998_v30 = vpop.f32.mrf.mxu0 }
 0x301   : > { %v4681_v60 = vpack.c.bf16 %v4072_v62, %v4072_v62  ;;  %v4059_v14 = vadd.f32 %v7895_v51, %v4038_v27  ;;  %v3876_v32 = vadd.f32 %v3827_v59, %v3696_v18 }
 0x302   : > { %v5685_v46 = vpop.f32.mrf.mxu1  ;;  %v5727_v48 = vpop.f32.mrf.mxu0 }
 0x303   : > { %4143 = vst.msk [vmem:[%s7906_s17] sm:$0xf] %vm4142_vm10, %v4681_v60  ;;  %v4073_v21 = vmax.f32 %v4059_v14, 0.0  ;;  %v4039_v28 = vadd.f32 %v3990_v54, %v3876_v32  ;;  %v3698_v54 = vadd.f32 %v7845_v53, %v3545_v25  ;;  %v3548_v14 = vadd.f32 %v7863_v8, %v7817_v1 }
 0x304   : > { %v3830_v15 = vpop.f32.mrf.mxu1  ;;  %v4001_v45 = vpop.f32.mrf.mxu0 }
 0x305   : > { %v4682_v41 = vpack.c.bf16 %v4073_v21, %v4073_v21  ;;  %v4060_v31 = vadd.f32 %v7895_v51, %v4039_v28  ;;  %v3877_v61 = vadd.f32 %v3830_v15, %v3697_v39  ;;  %v3549_v39 = vadd.f32 %v7867_v6, %v7820_v52 }
 0x306   : > { %v5686_v40 = vpop.f32.mrf.mxu1  ;;  %v5728_v47 = vpop.f32.mrf.mxu0  ;;  %v3701_v15 = vadd.f32 %v7857_v23, %v3548_v14 }
 0x307   : > { %4144 = vst.msk [vmem:[%s7906_s17 + $0x4] sm:$0xf] %vm4142_vm10, %v4682_v41  ;;  %v4074_v20 = vmax.f32 %v4060_v31, 0.0  ;;  %v4040_v22 = vadd.f32 %v3993_v63, %v3877_v61  ;;  %v3699_v63 = vadd.f32 %v7849_v55, %v3546_v0  ;;  %v3550_v0 = vadd.f32 %v7871_v33, %v7823_v37 }
 0x308   : > { %v3835_v19 = vpop.f32.mrf.mxu1  ;;  %v4006_v56 = vpop.f32.mrf.mxu0 }
 0x309   : > { %v4683_v38 = vpack.c.bf16 %v4074_v20, %v4074_v20  ;;  %v4061_v13 = vadd.f32 %v7895_v51, %v4040_v22  ;;  %v3878_v35 = vadd.f32 %v3835_v19, %v3698_v54  ;;  %v3702_v20 = vadd.f32 %v7861_v7, %v3549_v39 }
 0x30a   : > { %v5689_v44 = vpop.f32.mrf.mxu1  ;;  %v5731_v3 = vpop.f32.mrf.mxu0 }
 0x30b   : > { %4145 = vst.msk [vmem:[%s7906_s17 + $0x8] sm:$0xf] %vm4142_vm10, %v4683_v38  ;;  %v4075_v49 = vmax.f32 %v4061_v13, 0.0  ;;  %v4041_v10 = vadd.f32 %v3998_v30, %v3878_v35  ;;  %v3700_v30 = vadd.f32 %v7853_v29, %v3547_v5  ;;  %v3551_v35 = vadd.f32 %v7875_v42, %v7826_v2 }
 0x30c   : > { %v3838_v16 = vpop.f32.mrf.mxu1  ;;  %v4009_v53 = vpop.f32.mrf.mxu0  ;;  %v3703_v44 = vadd.f32 %v7865_v34, %v3550_v0 }
 0x30d   : > { %v4684_v62 = vpack.c.bf16 %v4075_v49, %v4075_v49  ;;  %v4062_v27 = vadd.f32 %v7895_v51, %v4041_v10  ;;  %v3879_v18 = vadd.f32 %v3838_v16, %v3699_v63 }
 0x30e   : > { %v5690_v59 = vpop.f32.mrf.mxu1  ;;  %v5732_v60 = vpop.f32.mrf.mxu0 }
 0x30f   : > { %4146 = vst.msk [vmem:[%s7906_s17 + $0xc] sm:$0xf] %vm4142_vm10, %v4684_v62  ;;  %v4076_v43 = vmax.f32 %v4062_v27, 0.0  ;;  %v4042_v11 = vadd.f32 %v4001_v45, %v3879_v18  ;;  %v3704_v62 = vadd.f32 %v7869_v50, %v3551_v35 }
 0x310   : > { %v3843_v32 = vpop.f32.mrf.mxu1  ;;  %v4014_v55 = vpop.f32.mrf.mxu0 }
 0x311   : > { %v4685_v46 = vpack.c.bf16 %v4076_v43, %v4076_v43  ;;  %v4063_v48 = vadd.f32 %v7895_v51, %v4042_v11  ;;  %v3880_v25 = vadd.f32 %v3843_v32, %v3700_v30  ;;  %v3553_v11 = vadd.f32 %v7883_v4, %v7834_v26 }
 0x312   : > { %v5693_v21 = vpop.f32.mrf.mxu1  ;;  %v5735_v28 = vpop.f32.mrf.mxu0 }
 0x313   : > { %4147 = vst.msk [vmem:[%s7906_s17 + $0x10] sm:$0xf] %vm4142_vm10, %v4685_v46  ;;  %v4077_v1 = vmax.f32 %v4063_v48, 0.0  ;;  %v4043_v8 = vadd.f32 %v4006_v56, %v3880_v25  ;;  %v3554_v28 = vadd.f32 %v7888_v9, %v7839_v17  ;;  %v3706_v39 = vadd.f32 %v7877_v12, %v3553_v11 }
 0x314   : > { %v3846_v45 = vpop.f32.mrf.mxu1  ;;  %v4017_v29 = vpop.f32.mrf.mxu0 }
 0x315   : > { %v4686_v41 = vpack.c.bf16 %v4077_v1, %v4077_v1  ;;  %v4064_v31 = vadd.f32 %v7895_v51, %v4043_v8  ;;  %v3881_v61 = vadd.f32 %v3846_v45, %v3701_v15  ;;  %v3707_v17 = vadd.f32 %v7881_v57, %v3554_v28 }
 0x316   : > { %v5694_v40 = vpop.f32.mrf.mxu1  ;;  %v5736_v47 = vpop.f32.mrf.mxu0 }
 0x317   : > { %4148 = vst.msk [vmem:[%s7906_s17 + $0x14] sm:$0xf] %vm4142_vm10, %v4686_v41  ;;  %v4078_v52 = vmax.f32 %v4064_v31, 0.0  ;;  %v4044_v6 = vadd.f32 %v4009_v53, %v3881_v61  ;;  %v3552_v53 = vadd.f32 %v7879_v24, %v7829_v58 }
 0x318   : > { %v3851_v22 = vpop.f32.mrf.mxu1  ;;  %v4022_v23 = vpop.f32.mrf.mxu0 }
 0x319   : > { %v4687_v54 = vpack.c.bf16 %v4078_v52, %v4078_v52  ;;  %v4065_v19 = vadd.f32 %v7895_v51, %v4044_v6  ;;  %v3882_v56 = vadd.f32 %v3851_v22, %v3702_v20  ;;  %v3705_v30 = vadd.f32 %v7873_v36, %v3552_v53 }
 0x31a   : > { %v5697_v38 = vpop.f32.mrf.mxu1  ;;  %v5739_v13 = vpop.f32.mrf.mxu0 }
 0x31b   : > { %4149 = vst.msk [vmem:[%s7906_s17 + $0x18] sm:$0xf] %vm4142_vm10, %v4687_v54  ;;  %v4079_v37 = vmax.f32 %v4065_v19, 0.0  ;;  %v4045_v33 = vadd.f32 %v4014_v55, %v3882_v56 }
 0x31c   : > { %v3854_v3 = vpop.f32.mrf.mxu1  ;;  %v4025_v7 = vpop.f32.mrf.mxu0 }
 0x31d   : > { %v4688_v5 = vpack.c.bf16 %v4079_v37, %v4079_v37  ;;  %v4066_v49 = vadd.f32 %v7895_v51, %v4045_v33  ;;  %v3883_v10 = vadd.f32 %v3854_v3, %v3703_v44 }
 0x31e   : > { %v5698_v63 = vpop.f32.mrf.mxu1  ;;  %v5740_v16 = vpop.f32.mrf.mxu0 }
 0x31f   : > { %4150 = vst.msk [vmem:[%s7906_s17 + $0x1c] sm:$0xf] %vm4142_vm10, %v4688_v5  ;;  %v4080_v2 = vmax.f32 %v4066_v49, 0.0  ;;  %v4046_v42 = vadd.f32 %v4017_v29, %v3883_v10 }
 0x320   : > { %v3859_v27 = vpop.f32.mrf.mxu1  ;;  %v4030_v34 = vpop.f32.mrf.mxu0 }
 0x321   : > { %v4689_v18 = vpack.c.bf16 %v4080_v2, %v4080_v2  ;;  %v4067_v59 = vadd.f32 %v7895_v51, %v4046_v42  ;;  %v3884_v60 = vadd.f32 %v3859_v27, %v3704_v62 }
 0x322   : > { %v5701_v14 = vpop.f32.mrf.mxu1  ;;  %v5743_v43 = vpop.f32.mrf.mxu0 }
 0x323   : > { %4151 = vst.msk [vmem:[%s7906_s17 + $0x20] sm:$0xf] %vm4142_vm10, %v4689_v18  ;;  %v4081_v58 = vmax.f32 %v4067_v59, 0.0  ;;  %v4047_v24 = vadd.f32 %v4022_v23, %v3884_v60 }
 0x324   : > { %v3862_v32 = vpop.f32.mrf.mxu1  ;;  %v4033_v50 = vpop.f32.mrf.mxu0 }
 0x325   : > { %v4690_v55 = vpack.c.bf16 %v4081_v58, %v4081_v58  ;;  %v4068_v46 = vadd.f32 %v7895_v51, %v4047_v24  ;;  %v3885_v48 = vadd.f32 %v3862_v32, %v3705_v30 }
 0x326   : > { %v5702_v25 = vpop.f32.mrf.mxu1  ;;  %v5744_v21 = vpop.f32.mrf.mxu0 }
 0x327   : > { %4152 = vst.msk [vmem:[%s7906_s17 + $0x24] sm:$0xf] %vm4142_vm10, %v4690_v55  ;;  %v4082_v26 = vmax.f32 %v4068_v46, 0.0  ;;  %v4048_v4 = vadd.f32 %v4025_v7, %v3885_v48 }
 0x328   : > { %v3867_v36 = vpop.f32.mrf.mxu1 }
 0x329   : > { %v4691_v1 = vpack.c.bf16 %v4082_v26, %v4082_v26  ;;  %v4069_v8 = vadd.f32 %v7895_v51, %v4048_v4  ;;  %v3886_v15 = vadd.f32 %v3867_v36, %v3706_v39 }
 0x32a   : > { %v5705_v45 = vpop.f32.mrf.mxu1 }
 0x32b   : > { %4153 = vst.msk [vmem:[%s7906_s17 + $0x28] sm:$0xf] %vm4142_vm10, %v4691_v1  ;;  %v4083_v29 = vmax.f32 %v4069_v8, 0.0  ;;  %v4049_v41 = vadd.f32 %v4030_v34, %v3886_v15 }
 0x32c   : > { %v3870_v9 = vpop.f32.mrf.mxu1 }
 0x32d   : > { %v4692_v31 = vpack.c.bf16 %v4083_v29, %v4083_v29  ;;  %v4070_v61 = vadd.f32 %v7895_v51, %v4049_v41  ;;  %v3887_v40 = vadd.f32 %v3870_v9, %v3707_v17 }
 0x32e   : > { %v5706_v12 = vpop.f32.mrf.mxu1 }
 0x32f   : > { %4154 = vst.msk [vmem:[%s7906_s17 + $0x2c] sm:$0xf] %vm4142_vm10, %v4692_v31  ;;  %v4084_v47 = vmax.f32 %v4070_v61, 0.0  ;;  %v4050_v0 = vadd.f32 %v4033_v50, %v3887_v40 }
 0x331   : > { %v4693_v52 = vpack.c.bf16 %v4084_v47, %v4084_v47  ;;  %v4071_v6 = vadd.f32 %v7895_v51, %v4050_v0 }
 0x333   : > { %4155 = vst.msk [vmem:[%s7906_s17 + $0x30] sm:$0xf] %vm4142_vm10, %v4693_v52  ;;  %v4085_v20 = vmax.f32 %v4071_v6, 0.0 }
 0x335   : > { %v4694_v22 = vpack.c.bf16 %v4085_v20, %v4085_v20 }
 0x337   : > { %4156 = vst.msk [vmem:[%s7906_s17 + $0x34] sm:$0xf] %vm4142_vm10, %v4694_v22 }
 0x338 PF: > { %s13_s12 = sadd.s32 1, %s5911_s12  }
 0x339   : > { %p10_p4 = scmp.ge.s32.totalorder %s13_s12, 6  }
 0x33b   :  { %12 = sbr.rel (!%p10_p4) target bundleno = 1 (0x1), region = 80 }

// kernel: resnet_forward.3
= control target key start
LH: loop header
LB: loop body
LE: loop exit
PB: predicated region body
PF: predicated region fallthrough
CT: control target
= control target key end

     0   :  { %s2591_s0 = inlined_call_operand.vmem [shape: bf16[2,256], index: 0, kind: input, shape index: {}]   ;;  %s2592_s1 = inlined_call_operand.vmem [shape: bf16[256,256], index: 1, kind: input, shape index: {}]   ;;  %s2593_s2 = inlined_call_operand.vmem [shape: f32[1,256], index: 2, kind: input, shape index: {}]   ;;  %s2594_s3 = inlined_call_operand.vmem [shape: bf16[256,256], index: 3, kind: input, shape index: {}]   ;;  %s2595_s4 = inlined_call_operand.vmem [shape: f32[1,256], index: 4, kind: input, shape index: {}]   ;;  %s2596_s5 = inlined_call_operand.vmem [shape: bf16[256,64], index: 5, kind: input, shape index: {}]   ;;  %s2597_s6 = inlined_call_operand.vmem [shape: f32[1,64], index: 6, kind: input, shape index: {}]   ;;  %s2598_s7 = inlined_call_operand.vmem [shape: bf16[256,64], index: 7, kind: input, shape index: {}]   ;;  %s2599_s8 = inlined_call_operand.vmem [shape: f32[1,64], index: 8, kind: input, shape index: {}]   ;;  %s2600_s9 = inlined_call_operand.vmem [shape: bf16[64,64], index: 9, kind: input, shape index: {}]   ;;  %s2601_s10 = inlined_call_operand.vmem [shape: f32[1,64], index: 10, kind: input, shape index: {}]   ;;  %s2602_s11 = inlined_call_operand.vmem [shape: bf16[64,16], index: 11, kind: input, shape index: {}]   ;;  %s2603_s12 = inlined_call_operand.vmem [shape: f32[1,16], index: 12, kind: input, shape index: {}]   ;;  %s2604_s13 = inlined_call_operand.vmem [shape: bf16[64,16], index: 13, kind: input, shape index: {}]   ;;  %s2605_s14 = inlined_call_operand.vmem [shape: f32[1,16], index: 14, kind: input, shape index: {}]   ;;  %s2606_s15 = inlined_call_operand.vmem [shape: bf16[16,16], index: 15, kind: input, shape index: {}]   ;;  %s2607_s16 = inlined_call_operand.vmem [shape: f32[1,16], index: 16, kind: input, shape index: {}]   ;;  %s2608_s17 = inlined_call_operand.vmem [shape: bf16[16,32], index: 17, kind: input, shape index: {}]   ;;  %s2609_s18 = inlined_call_operand.vmem [shape: f32[1,32], index: 18, kind: input, shape index: {}]   ;;  %s2610_s19 = inlined_call_operand.vmem [shape: bf16[16,32], index: 19, kind: input, shape index: {}]   ;;  %s2611_s20 = inlined_call_operand.vmem [shape: f32[1,32], index: 20, kind: input, shape index: {}]   ;;  %s2612_s21 = inlined_call_operand.vmem [shape: bf16[32,32], index: 21, kind: input, shape index: {}]   ;;  %s2613_s22 = inlined_call_operand.vmem [shape: f32[1,32], index: 22, kind: input, shape index: {}]   ;;  %s2614_s23 = inlined_call_operand.vmem [shape: bf16[32,10], index: 23, kind: input, shape index: {}]   ;;  %s2615_s24 = inlined_call_operand.vmem [shape: f32[1,10], index: 24, kind: input, shape index: {}]   ;;  %s2616_s25 = inlined_call_operand.hbm [shape: f32[2,10], index: 25, kind: output, shape index: {}]  }
   0x1   :  { %2622 = sst [smem:[#allocation5_spill]] %s2591_s0 }
   0x2   :  { %2623 = sst [smem:[#allocation6_spill]] %s2592_s1 }
   0x3   :  { %2624 = sst [smem:[#allocation7_spill]] %s2593_s2 }
   0x4   :  { %2625 = sst [smem:[#allocation8_spill]] %s2594_s3 }
   0x5   :  { %2626 = sst [smem:[#allocation9_spill]] %s2595_s4 }
   0x6   :  { %2627 = sst [smem:[#allocation10_spill]] %s2596_s5 }
   0x7   :  { %2628 = sst [smem:[#allocation11_spill]] %s2597_s6 }
   0x8   :  { %2629 = sst [smem:[#allocation12_spill]] %s2598_s7 }
   0x9   :  { %2630 = sst [smem:[#allocation13_spill]] %s2599_s8 }
   0xa   :  { %2631 = sst [smem:[#allocation14_spill]] %s2600_s9 }
   0xb   :  { %s2632_s6 = sld [smem:[#allocation6_spill]]  ;;  %v118_v7 = vlaneseq  ;;  %v1998_v8 = vmov 1966171168  }
   0xc   :  { %v130_v9 = vunpack.c.l.s4 %v1998_v8  ;;  %s2633_s30 = sld [smem:[#allocation5_spill]] }
   0xd   :  { %v2160_v12 = vshrl.u32 %v118_v7, 7  ;;  %s2634_s26 = sld [smem:[#allocation8_spill]] }
   0xe   :  { %v131_v13 = vunpack.c.0.s8 %v130_v9 }
  0x10   :  { %v2169_v16 = vsub.s32 %v131_v13, %v2160_v12 }
  0x11   :  { %v1829_v0 = vld [vmem:[%s2632_s6 + $0x74] ss:$8 sps:$4 sm:$0xff]   ;;  %v1831_v1 = vld [vmem:[%s2632_s6 + $0x70] ss:$8 sps:$4 sm:$0xff]   ;;  %v1832_v2 = vld [vmem:[%s2632_s6 + $0x64] ss:$8 sps:$4 sm:$0xff]  }
  0x12   :  { %313 = vmatprep.subr.bf16.mxu0 %v1829_v0  ;;  %v1834_v3 = vld [vmem:[%s2632_s6 + $0x60] ss:$8 sps:$4 sm:$0xff]   ;;  %v1835_v4 = vld [vmem:[%s2632_s6 + $0x54] ss:$8 sps:$4 sm:$0xff]   ;;  %v1837_v5 = vld [vmem:[%s2632_s6 + $0x50] ss:$8 sps:$4 sm:$0xff]  }
  0x13   :  { %314 = vmatpush1.bf16.msra.mxu0 %v1831_v1  ;;  %v1838_v6 = vld [vmem:[%s2632_s6 + $0x44] ss:$8 sps:$4 sm:$0xff]   ;;  %v1840_v10 = vld [vmem:[%s2632_s6 + $0x40] ss:$8 sps:$4 sm:$0xff]   ;;  %v1841_v11 = vld [vmem:[%s2632_s6 + $0x34] ss:$8 sps:$4 sm:$0xff]  }
  0x14   :  { %315 = vmatprep.subr.bf16.mxu0 %v1832_v2  ;;  %v1843_v14 = vld [vmem:[%s2632_s6 + $0x30] ss:$8 sps:$4 sm:$0xff]   ;;  %v1844_v15 = vld [vmem:[%s2632_s6 + $0x24] ss:$8 sps:$4 sm:$0xff]   ;;  %v1846_v17 = vld [vmem:[%s2632_s6 + $0x20] ss:$8 sps:$4 sm:$0xff]  }
  0x15   :  { %v1847_v18 = vld [vmem:[%s2632_s6 + $0x14] ss:$8 sps:$4 sm:$0xff]   ;;  %v1849_v19 = vld [vmem:[%s2632_s6 + $0x10] ss:$8 sps:$4 sm:$0xff]   ;;  %v2183_v20 = vld [vmem:[%s2633_s30] sm:$0x3] }
  0x16   :  { %v2187_v21 = vrot.slane %v2183_v20, %v2169_v16  ;;  %v1877_v22 = vld [vmem:[%s2634_s26 + $0x74] ss:$8 sps:$4 sm:$0xff]   ;;  %v1879_v23 = vld [vmem:[%s2634_s26 + $0x70] ss:$8 sps:$4 sm:$0xff]   ;;  %v1880_v24 = vld [vmem:[%s2634_s26 + $0x64] ss:$8 sps:$4 sm:$0xff]  }
  0x17   :  { %316 = vmatpush1.bf16.msra.mxu0 %v1834_v3  ;;  %v1850_v25 = vld [vmem:[%s2632_s6 + $0x4] ss:$8 sps:$4 sm:$0xff]   ;;  %562 = vmatprep.subr.bf16.mxu1 %v1877_v22  ;;  %v1882_v27 = vld [vmem:[%s2634_s26 + $0x60] ss:$8 sps:$4 sm:$0xff]   ;;  %v1883_v29 = vld [vmem:[%s2634_s26 + $0x54] ss:$8 sps:$4 sm:$0xff]  }
  0x18   :  { %317 = vmatprep.subr.bf16.mxu0 %v1835_v4  ;;  %v136_v26 = vcombine.high %v2187_v21, %v2187_v21  ;;  %563 = vmatpush1.bf16.msra.mxu1 %v1879_v23  ;;  %v1852_v30 = vld [vmem:[%s2632_s6] ss:$8 sps:$4 sm:$0xff]   ;;  %v1853_v31 = vld [vmem:[%s2632_s6 + $0xf4] ss:$8 sps:$4 sm:$0xff]   ;;  %v1885_v32 = vld [vmem:[%s2634_s26 + $0x50] ss:$8 sps:$4 sm:$0xff]   ;;  %v143_v1 = vrot.slane %v2187_v21, %v2169_v16 }
  0x19   :  { %564 = vmatprep.subr.bf16.mxu1 %v1880_v24  ;;  %v1886_v33 = vld [vmem:[%s2634_s26 + $0x44] ss:$8 sps:$4 sm:$0xff]   ;;  %v1855_v34 = vld [vmem:[%s2632_s6 + $0xf0] ss:$8 sps:$4 sm:$0xff]   ;;  %v1888_v36 = vld [vmem:[%s2634_s26 + $0x40] ss:$8 sps:$4 sm:$0xff]  }
  0x1a   :  { %v150_v28 = vrot.slane %v136_v26, %v2169_v16  ;;  %v1856_v35 = vld [vmem:[%s2632_s6 + $0xe4] ss:$8 sps:$4 sm:$0xff]   ;;  %v1889_v37 = vld [vmem:[%s2634_s26 + $0x34] ss:$8 sps:$4 sm:$0xff]   ;;  %v1858_v38 = vld [vmem:[%s2632_s6 + $0xe0] ss:$8 sps:$4 sm:$0xff]  }
  0x1b   :  { %318 = vmatpush1.bf16.msra.mxu0 %v1837_v5  ;;  %v1859_v39 = vld [vmem:[%s2632_s6 + $0xd4] ss:$8 sps:$4 sm:$0xff]   ;;  %v1891_v40 = vld [vmem:[%s2634_s26 + $0x30] ss:$8 sps:$4 sm:$0xff]   ;;  %v1892_v42 = vld [vmem:[%s2634_s26 + $0x24] ss:$8 sps:$4 sm:$0xff]  }
  0x1c   :  { %319 = vmatprep.subr.bf16.mxu0 %v1838_v6  ;;  %345 = vmatprep.mubr.bf16.mxu0 %v150_v28  ;;  %v1861_v41 = vld [vmem:[%s2632_s6 + $0xd0] ss:$8 sps:$4 sm:$0xff]   ;;  %v1862_v43 = vld [vmem:[%s2632_s6 + $0xc4] ss:$8 sps:$4 sm:$0xff]   ;;  %v1894_v44 = vld [vmem:[%s2634_s26 + $0x20] ss:$8 sps:$4 sm:$0xff]  }
  0x1d   :  { %565 = vmatpush1.bf16.msra.mxu1 %v1882_v27  ;;  %v1895_v45 = vld [vmem:[%s2634_s26 + $0x14] ss:$8 sps:$4 sm:$0xff]   ;;  %v1864_v46 = vld [vmem:[%s2632_s6 + $0xc0] ss:$8 sps:$4 sm:$0xff]   ;;  %v1897_v48 = vld [vmem:[%s2634_s26 + $0x10] ss:$8 sps:$4 sm:$0xff]  }
  0x1e   :  { %566 = vmatprep.subr.bf16.mxu1 %v1883_v29  ;;  %v1865_v47 = vld [vmem:[%s2632_s6 + $0xb4] ss:$8 sps:$4 sm:$0xff]   ;;  %v1898_v49 = vld [vmem:[%s2634_s26 + $0x4] ss:$8 sps:$4 sm:$0xff]   ;;  %v1867_v50 = vld [vmem:[%s2632_s6 + $0xb0] ss:$8 sps:$4 sm:$0xff]  }
  0x1f   :  { %320 = vmatpush1.bf16.msra.mxu0 %v1840_v10  ;;  %v1868_v51 = vld [vmem:[%s2632_s6 + $0xa4] ss:$8 sps:$4 sm:$0xff]   ;;  %v1900_v52 = vld [vmem:[%s2634_s26] ss:$8 sps:$4 sm:$0xff]   ;;  %v1901_v53 = vld [vmem:[%s2634_s26 + $0xf4] ss:$8 sps:$4 sm:$0xff]  }
  0x20   :  { %321 = vmatprep.subr.bf16.mxu0 %v1841_v11  ;;  %v1870_v54 = vld [vmem:[%s2632_s6 + $0xa0] ss:$8 sps:$4 sm:$0xff]   ;;  %v1871_v55 = vld [vmem:[%s2632_s6 + $0x94] ss:$8 sps:$4 sm:$0xff]   ;;  %v1903_v56 = vld [vmem:[%s2634_s26 + $0xf0] ss:$8 sps:$4 sm:$0xff]  }
  0x21   :  { %567 = vmatpush1.bf16.msra.mxu1 %v1885_v32  ;;  %v1904_v57 = vld [vmem:[%s2634_s26 + $0xe4] ss:$8 sps:$4 sm:$0xff]   ;;  %v1873_v58 = vld [vmem:[%s2632_s6 + $0x90] ss:$8 sps:$4 sm:$0xff]   ;;  %v1906_v60 = vld [vmem:[%s2634_s26 + $0xe0] ss:$8 sps:$4 sm:$0xff]  }
  0x22   :  { %568 = vmatprep.subr.bf16.mxu1 %v1886_v33  ;;  %v1874_v59 = vld [vmem:[%s2632_s6 + $0x84] ss:$8 sps:$4 sm:$0xff]   ;;  %v1907_v61 = vld [vmem:[%s2634_s26 + $0xd4] ss:$8 sps:$4 sm:$0xff]   ;;  %v1876_v62 = vld [vmem:[%s2632_s6 + $0x80] ss:$8 sps:$4 sm:$0xff]  }
  0x23   :  { %322 = vmatpush1.bf16.msra.mxu0 %v1843_v14  ;;  %v1909_v63 = vld [vmem:[%s2634_s26 + $0xd0] ss:$8 sps:$4 sm:$0xff]   ;;  %v1910_v0 = vld [vmem:[%s2634_s26 + $0xc4] ss:$8 sps:$4 sm:$0xff]   ;;  %v1912_v2 = vld [vmem:[%s2634_s26 + $0xc0] ss:$8 sps:$4 sm:$0xff]  }
  0x24   :  { %323 = vmatprep.subr.bf16.mxu0 %v1844_v15  ;;  %v1913_v3 = vld [vmem:[%s2634_s26 + $0xb4] ss:$8 sps:$4 sm:$0xff]   ;;  %v1915_v4 = vld [vmem:[%s2634_s26 + $0xb0] ss:$8 sps:$4 sm:$0xff]   ;;  %v1916_v5 = vld [vmem:[%s2634_s26 + $0xa4] ss:$8 sps:$4 sm:$0xff]  }
  0x25   :  { %569 = vmatpush1.bf16.msra.mxu1 %v1888_v36  ;;  %v1918_v6 = vld [vmem:[%s2634_s26 + $0xa0] ss:$8 sps:$4 sm:$0xff]  }
  0x26   :  { %570 = vmatprep.subr.bf16.mxu1 %v1889_v37 }
  0x27   :  { %324 = vmatpush1.bf16.msra.mxu0 %v1846_v17 }
  0x28   :  { %325 = vmatprep.subr.bf16.mxu0 %v1847_v18 }
  0x29   :  { %571 = vmatpush1.bf16.msra.mxu1 %v1891_v40 }
  0x2a   :  { %572 = vmatprep.subr.bf16.mxu1 %v1892_v42 }
  0x2b   :  { %326 = vmatpush1.bf16.msra.mxu0 %v1849_v19 }
  0x2c   :  { %327 = vmatprep.subr.bf16.mxu0 %v1850_v25 }
  0x2d   :  { %573 = vmatpush1.bf16.msra.mxu1 %v1894_v44 }
  0x2e   :  { %574 = vmatprep.subr.bf16.mxu1 %v1895_v45 }
  0x2f   :  { %328 = vmatpush1.bf16.msra.mxu0 %v1852_v30 }
  0x30   :  { %329 = vmatprep.subr.bf16.mxu0 %v1853_v31 }
  0x31   :  { %575 = vmatpush1.bf16.msra.mxu1 %v1897_v48 }
  0x32   :  { %576 = vmatprep.subr.bf16.mxu1 %v1898_v49 }
  0x33   :  { %330 = vmatpush2.bf16.msra.mxu0 %v1855_v34 }
  0x34   :  { %331 = vmatprep.subr.bf16.mxu0 %v1856_v35 }
  0x35   :  { %577 = vmatpush1.bf16.msra.mxu1 %v1900_v52 }
  0x36   :  { %578 = vmatprep.subr.bf16.mxu1 %v1901_v53 }
  0x37   :  { %332 = vmatpush2.bf16.msra.mxu0 %v1858_v38 }
  0x38   :  { %333 = vmatprep.subr.bf16.mxu0 %v1859_v39 }
  0x39   :  { %579 = vmatpush2.bf16.msra.mxu1 %v1903_v56 }
  0x3a   :  { %580 = vmatprep.subr.bf16.mxu1 %v1904_v57 }
  0x3b   :  { %334 = vmatpush2.bf16.msra.mxu0 %v1861_v41 }
  0x3c   :  { %335 = vmatprep.subr.bf16.mxu0 %v1862_v43 }
  0x3d   :  { %581 = vmatpush2.bf16.msra.mxu1 %v1906_v60 }
  0x3e   :  { %582 = vmatprep.subr.bf16.mxu1 %v1907_v61 }
  0x3f   :  { %336 = vmatpush2.bf16.msra.mxu0 %v1864_v46 }
  0x40   :  { %337 = vmatprep.subr.bf16.mxu0 %v1865_v47 }
  0x41   :  { %583 = vmatpush2.bf16.msra.mxu1 %v1909_v63 }
  0x42   :  { %584 = vmatprep.subr.bf16.mxu1 %v1910_v0 }
  0x43   :  { %338 = vmatpush2.bf16.msra.mxu0 %v1867_v50 }
  0x44   :  { %339 = vmatprep.subr.bf16.mxu0 %v1868_v51 }
  0x45   :  { %585 = vmatpush2.bf16.msra.mxu1 %v1912_v2 }
  0x46   :  { %586 = vmatprep.subr.bf16.mxu1 %v1913_v3 }
  0x47   :  { %340 = vmatpush2.bf16.msra.mxu0 %v1870_v54 }
  0x48   :  { %341 = vmatprep.subr.bf16.mxu0 %v1871_v55 }
  0x49   :  { %587 = vmatpush2.bf16.msra.mxu1 %v1915_v4 }
  0x4a   :  { %588 = vmatprep.subr.bf16.mxu1 %v1916_v5 }
  0x4b   :  { %342 = vmatpush2.bf16.msra.mxu0 %v1873_v58 }
  0x4c   :  { %343 = vmatprep.subr.bf16.mxu0 %v1874_v59 }
  0x4f   :  { %344 = vmatpush2.bf16.msra.mxu0 %v1876_v62 }
  0x52   :  { %346 = vmatmul.mubr.bf16.vlgmr.msra.gmra.mxu0 %v143_v1 }
  0x53   :  { %30 = vsyncpa [#allocation3], 0  ;;  %589 = vmatpush2.bf16.msra.mxu1 %v1918_v6  ;;  %v1919_v7 = vld [vmem:[%s2634_s26 + $0x94] ss:$8 sps:$4 sm:$0xff]   ;;  %v1921_v8 = vld [vmem:[%s2634_s26 + $0x90] ss:$8 sps:$4 sm:$0xff]   ;;  %v83_v0 = vunpack.c.l.bf16 %v2183_v20 }
  0x54   :  { %590 = vmatprep.subr.bf16.mxu1 %v1919_v7  ;;  %v1922_v9 = vld [vmem:[%s2634_s26 + $0x84] ss:$8 sps:$4 sm:$0xff]   ;;  %v1924_v10 = vld [vmem:[%s2634_s26 + $0x80] ss:$8 sps:$4 sm:$0xff]   ;;  %s2635_s0 = sld [smem:[#allocation10_spill]]  ;;  %v120_v24 = vsub.s32 0, %v2160_v12 }
  0x55   :  { %s2636_s30 = sld [smem:[#allocation12_spill]]  ;;  %v124_v26 = vsub.s32 1, %v2160_v12  ;;  %v1999_v60 = vmov 0.0   ;;  %v2000_v61 = vmov 1983009808   ;;  %vm2001_vm0 = vmmov 0  }
  0x56   :  { %s2637_s4 = sld [smem:[#allocation7_spill]]  ;;  %v605_v62 = vunpack.c.l.s4 %v2000_v61  ;;  %vm1011_vm1 = vcmask 523264   ;;  %vm1236_vm2 = vcmask 130048   ;;  %vm1421_vm3 = vcmask 261120  }
  0x57   :  { %591 = vmatpush2.bf16.msra.mxu1 %v1921_v8  ;;  %s2638_s2 = sld [smem:[#allocation9_spill]]  ;;  %vm1534_vm4 = vcmask 74752  }
  0x58   :  { %592 = vmatprep.subr.bf16.mxu1 %v1922_v9  ;;  %v606_v63 = vunpack.c.0.s8 %v605_v62  ;;  %s2639_s3 = sld [smem:[#allocation14_spill]] }
  0x5a   :  { %v1925_v11 = vld [vmem:[%s2635_s0 + $0x78] sm:$0xff]   ;;  %v1929_v15 = vld [vmem:[%s2635_s0 + $0x70] sm:$0xff]   ;;  %v1933_v17 = vld [vmem:[%s2635_s0 + $0x68] sm:$0xff]   ;;  %v609_v1 = vsub.s32 %v606_v63, %v2160_v12 }
  0x5b   :  { %593 = vmatpush2.bf16.msra.mxu1 %v1924_v10  ;;  %v1926_v13 = vld [vmem:[%s2636_s30 + $0x78] sm:$0xff]   ;;  %1683 = vmatprep.subr.bf16.mxu0 %v1925_v11  ;;  %v1931_v16 = vld [vmem:[%s2635_s0 + $0x30] sm:$0xff]   ;;  %v1935_v18 = vld [vmem:[%s2635_s0 + $0x28] sm:$0xff]  }
  0x5c   :  { %v1927_v14 = vld [vmem:[%s2635_s0 + $0x38] sm:$0xff]   ;;  %1705 = vmatprep.subr.bf16.mxu1 %v1926_v13  ;;  %v1937_v19 = vld [vmem:[%s2635_s0 + $0x60] sm:$0xff]   ;;  %v1930_v40 = vld [vmem:[%s2636_s30 + $0x70] sm:$0xff]   ;;  %v610_v4 = vrot.slane %v83_v0, %v609_v1 }
  0x5d   :  { %1684 = vmatpush3.bf16.msra.mxu0 %v1927_v14  ;;  %v1939_v21 = vld [vmem:[%s2635_s0 + $0x20] sm:$0xff]   ;;  %v1941_v22 = vld [vmem:[%s2635_s0 + $0x58] sm:$0xff]   ;;  %v1932_v41 = vld [vmem:[%s2636_s30 + $0x30] sm:$0xff]  }
  0x5e   :  { %1685 = vmatprep.subr.bf16.mxu0 %v1929_v15  ;;  %v1943_v23 = vld [vmem:[%s2635_s0 + $0x18] sm:$0xff]   ;;  %v116_v25 = vld [vmem:[%s2637_s4] sm:$0x3]  ;;  %v1934_v42 = vld [vmem:[%s2636_s30 + $0x68] sm:$0xff]   ;;  %v611_v8 = vcombine.high %v610_v4, %v610_v4 }
  0x5f   :  { %v121_v27 = vrot.slane %v116_v25, %v120_v24  ;;  %v125_v28 = vrot.slane %v116_v25, %v124_v26  ;;  %v1928_v38 = vld [vmem:[%s2636_s30 + $0x38] sm:$0xff]   ;;  %v1936_v43 = vld [vmem:[%s2636_s30 + $0x28] sm:$0xff]   ;;  %v1938_v44 = vld [vmem:[%s2636_s30 + $0x60] sm:$0xff]  }
  0x60   :  { %v1940_v45 = vld [vmem:[%s2636_s30 + $0x20] sm:$0xff]   ;;  %v1942_v46 = vld [vmem:[%s2636_s30 + $0x58] sm:$0xff]   ;;  %v1945_v48 = vld [vmem:[%s2635_s0 + $0x50] sm:$0xff]  }
  0x61   :  { %1686 = vmatpush3.bf16.msra.mxu0 %v1931_v16  ;;  %v1944_v47 = vld [vmem:[%s2636_s30 + $0x18] sm:$0xff]   ;;  %v1946_v49 = vld [vmem:[%s2636_s30 + $0x50] sm:$0xff]   ;;  %v1949_v52 = vld [vmem:[%s2635_s0 + $0x48] sm:$0xff]  }
  0x62   :  { %1687 = vmatprep.subr.bf16.mxu0 %v1933_v17  ;;  %v1947_v50 = vld [vmem:[%s2635_s0 + $0x10] sm:$0xff]   ;;  %v1950_v53 = vld [vmem:[%s2636_s30 + $0x48] sm:$0xff]   ;;  %v1953_v56 = vld [vmem:[%s2635_s0 + $0x40] sm:$0xff]  }
  0x63   :  { %v1948_v51 = vld [vmem:[%s2636_s30 + $0x10] sm:$0xff]   ;;  %v1951_v54 = vld [vmem:[%s2635_s0 + $0x8] sm:$0xff]   ;;  %v1954_v57 = vld [vmem:[%s2636_s30 + $0x40] sm:$0xff]  }
  0x64   :  { %v1952_v55 = vld [vmem:[%s2636_s30 + $0x8] sm:$0xff]   ;;  %v1955_v58 = vld [vmem:[%s2635_s0] sm:$0xff]   ;;  %v1958_v12 = vld [vmem:[%s2639_s3 + $0x10] sm:$0xff]  }
  0x65   :  { %1688 = vmatpush3.bf16.msra.mxu0 %v1935_v18  ;;  %v1956_v59 = vld [vmem:[%s2636_s30] sm:$0xff]   ;;  %v1957_v18 = vld [vmem:[%s2639_s3 + $0x18] sm:$0xff]   ;;  %s2640_s30 = sld [smem:[#allocation11_spill]] }
  0x66   :  { %1689 = vmatprep.subr.bf16.mxu0 %v1937_v19  ;;  %v390_v2 = vld [vmem:[%s2638_s2] sm:$0x3] }
  0x67   :  { %v395_v3 = vrot.slane %v390_v2, %v120_v24  ;;  %v399_v5 = vrot.slane %v390_v2, %v124_v26  ;;  %v1963_v24 = vld [vmem:[%s2602_s11 + $0x10] sm:$0xff]  }
  0x69   :  { %1690 = vmatpush3.bf16.msra.mxu0 %v1939_v21  ;;  %v1959_v21 = vld [vmem:[%s2639_s3 + $0x8] sm:$0xff]  }
  0x6a   :  { %1691 = vmatprep.subr.bf16.mxu0 %v1941_v22  ;;  %v1960_v22 = vld [vmem:[%s2639_s3] sm:$0xff]  }
  0x6d   :  { %1692 = vmatpush3.bf16.msra.mxu0 %v1943_v23  ;;  %v1961_v23 = vld [vmem:[%s2602_s11 + $0x18] sm:$0xff]  }
  0x6e   :  { %1693 = vmatprep.subr.bf16.mxu0 %v1945_v48 }
  0x71   :  { %1694 = vmatpush3.bf16.msra.mxu0 %v1947_v50 }
  0x72   :  { %1695 = vmatprep.subr.bf16.mxu0 %v1949_v52 }
  0x75   :  { %1696 = vmatpush3.bf16.msra.mxu0 %v1951_v54 }
  0x76   :  { %1697 = vmatprep.subr.bf16.mxu0 %v1953_v56 }
  0x79   :  { %1698 = vmatpush3.bf16.msra.mxu0 %v1955_v58 }
  0x7a   :  { %1754 = vmatprep.subr.bf16.mxu0 %v1999_v60 }
 0x112   :  { %v347_v29 = vpop.f32.mrf.mxu0 }
 0x113   :  { %v348_v30 = vadd.f32 %v347_v29, %v121_v27  ;;  %v1614_v27 = vld [vmem:[%s2640_s30] ss:$0 sm:$0xff]  ;;  %s2641_s30 = sld [smem:[#allocation13_spill]] }
 0x114   :  { %v349_v31 = vpop.f32.mrf.mxu0 }
 0x115   :  { %v350_v32 = vadd.f32 %v349_v31, %v125_v28  ;;  %v354_v33 = vmax.f32 %v348_v30, 0.0 }
 0x116   :  { %v351_v34 = vpop.f32.mrf.mxu0 }
 0x117   :  { %v355_v35 = vmax.f32 %v350_v32, 0.0  ;;  %v356_v39 = vpack.c.bf16 %v354_v33, %v354_v33 }
 0x118   :  { %v352_v36 = vpop.f32.mrf.mxu0 }
 0x119   :  { %v357_v37 = vpack.c.bf16 %v355_v35, %v355_v35 }
 0x11b   :  { %594 = vmatprep.mubr.bf16.mxu1 %v357_v37 }
 0x11c   :  { %595 = vmatmul.mubr.bf16.vlgmr.msra.gmra.mxu1 %v356_v39 }
 0x11d   :  { %1706 = vmatpush3.bf16.msra.mxu1 %v1928_v38  ;;  %v1962_v38 = vld [vmem:[%s2604_s13 + $0x18] sm:$0xff]  }
 0x11e   :  { %1707 = vmatprep.subr.bf16.mxu1 %v1930_v40  ;;  %v1964_v40 = vld [vmem:[%s2604_s13 + $0x10] sm:$0xff]  }
 0x121   :  { %1708 = vmatpush3.bf16.msra.mxu1 %v1932_v41  ;;  %v1965_v41 = vld [vmem:[%s2602_s11 + $0x8] sm:$0xff]  }
 0x122   :  { %1709 = vmatprep.subr.bf16.mxu1 %v1934_v42  ;;  %v1966_v42 = vld [vmem:[%s2604_s13 + $0x8] sm:$0xff]  }
 0x125   :  { %1710 = vmatpush3.bf16.msra.mxu1 %v1936_v43  ;;  %v1967_v43 = vld [vmem:[%s2602_s11] sm:$0xff]  }
 0x126   :  { %1711 = vmatprep.subr.bf16.mxu1 %v1938_v44  ;;  %v1968_v44 = vld [vmem:[%s2604_s13] sm:$0xff]  }
 0x129   :  { %1712 = vmatpush3.bf16.msra.mxu1 %v1940_v45  ;;  %v1631_v45 = vld [vmem:[%s2641_s30] ss:$0 sm:$0xff] }
 0x12a   :  { %1713 = vmatprep.subr.bf16.mxu1 %v1942_v46  ;;  %v1648_v46 = vld [vmem:[%s2601_s10] ss:$0 sm:$0xff] }
 0x12d   :  { %1714 = vmatpush3.bf16.msra.mxu1 %v1944_v47 }
 0x12e   :  { %1715 = vmatprep.subr.bf16.mxu1 %v1946_v49 }
 0x131   :  { %1716 = vmatpush3.bf16.msra.mxu1 %v1948_v51 }
 0x132   :  { %1717 = vmatprep.subr.bf16.mxu1 %v1950_v53 }
 0x135   :  { %1718 = vmatpush3.bf16.msra.mxu1 %v1952_v55  ;;  %v1969_v55 = vld [vmem:[%s2606_s15] sm:$0xff]  }
 0x136   :  { %1719 = vmatprep.subr.bf16.mxu1 %v1954_v57  ;;  %v1654_v57 = vld [vmem:[%s2603_s12] ss:$0 sm:$0xff] }
 0x139   :  { %1720 = vmatpush3.bf16.msra.mxu1 %v1956_v59 }
 0x13a   :  { %1766 = vmatprep.subr.bf16.mxu1 %v1999_v60 }
 0x1dc   :  { %v596_v6 = vpop.f32.mrf.mxu1 }
 0x1dd   :  { %v597_v7 = vadd.f32 %v596_v6, %v395_v3  ;;  %v1970_v6 = vld [vmem:[%s2608_s17] sm:$0xff]  }
 0x1de   :  { %v598_v9 = vpop.f32.mrf.mxu1 }
 0x1df   :  { %v614_v10 = vadd.f32 %v610_v4, %v597_v7  ;;  %v599_v11 = vadd.f32 %v598_v9, %v399_v5  ;;  %v1971_v7 = vld [vmem:[%s2610_s19] sm:$0xff]  }
 0x1e0   :  { %v600_v20 = vpop.f32.mrf.mxu1  ;;  %v1666_v9 = vld [vmem:[%s2607_s16] ss:$0 sm:$0xff] }
 0x1e1   :  { %v615_v13 = vadd.f32 %v611_v8, %v599_v11  ;;  %v616_v14 = vmax.f32 %v614_v10, 0.0  ;;  %v1660_v8 = vld [vmem:[%s2605_s14] ss:$0 sm:$0xff] }
 0x1e2   :  { %v601_v15 = vpop.f32.mrf.mxu1 }
 0x1e3   :  { %v617_v16 = vmax.f32 %v615_v13, 0.0  ;;  %v618_v19 = vpack.c.bf16 %v616_v14, %v616_v14 }
 0x1e5   :  { %v619_v17 = vpack.c.bf16 %v617_v16, %v617_v16 }
 0x1e7   :  { %787 = vmatprep.mubr.bf16.mxu0 %v619_v17  ;;  %963 = vmatprep.mubr.bf16.mxu1 %v619_v17 }
 0x1e8   :  { %788 = vmatmul.mubr.bf16.vlgmr.msra.gmra.mxu0 %v618_v19  ;;  %964 = vmatmul.mubr.bf16.vlgmr.msra.gmra.mxu1 %v618_v19 }
 0x1e9   :  { %1755 = vmatpush3.bf16.msra.mxu0 %v1957_v18  ;;  %1762 = vmatprep.mubr.msk.bf16.mxu0 %vm2001_vm0, %v1999_v60  ;;  %v1972_v18 = vld [vmem:[%s2612_s21 + $0x8] sm:$0xff]  }
 0x1ea   :  { %1756 = vmatprep.subr.bf16.mxu0 %v1999_v60  ;;  %1774 = vmatprep.mubr.msk.bf16.mxu1 %vm2001_vm0, %v1999_v60 }
 0x1eb   :  { %1767 = vmatpush3.bf16.msra.mxu1 %v1961_v23 }
 0x1ec   :  { %1768 = vmatprep.subr.bf16.mxu1 %v1999_v60 }
 0x1ed   :  { %1757 = vmatpush3.bf16.msra.mxu0 %v1958_v12  ;;  %v1973_v12 = vld [vmem:[%s2612_s21] sm:$0xff]  }
 0x1ee   :  { %1758 = vmatprep.subr.bf16.mxu0 %v1999_v60 }
 0x1ef   :  { %1769 = vmatpush3.bf16.msra.mxu1 %v1963_v24 }
 0x1f0   :  { %1770 = vmatprep.subr.bf16.mxu1 %v1999_v60 }
 0x1f1   :  { %1759 = vmatpush3.bf16.msra.mxu0 %v1959_v21  ;;  %v1669_v21 = vld [vmem:[%s2609_s18] ss:$0 sm:$0xff] }
 0x1f2   :  { %1760 = vmatprep.subr.bf16.mxu0 %v1999_v60 }
 0x1f3   :  { %1771 = vmatpush3.bf16.msra.mxu1 %v1965_v41 }
 0x1f4   :  { %1772 = vmatprep.subr.bf16.mxu1 %v1999_v60 }
 0x1f5   :  { %1761 = vmatpush3.bf16.msra.mxu0 %v1960_v22 }
 0x1f6   :  { %1778 = vmatprep.subr.bf16.mxu0 %v1999_v60 }
 0x1f7   :  { %1773 = vmatpush3.bf16.msra.mxu1 %v1967_v43 }
 0x1f8   :  { %1790 = vmatprep.subr.bf16.mxu1 %v1999_v60 }
 0x2a8   :  { %v1699_v25 = vpop.f32.mrf.mxu0  ;;  %v1721_v26 = vpop.f32.mrf.mxu1 }
 0x2aa   :  { %v1700_v28 = vpop.f32.mrf.mxu0  ;;  %v1722_v29 = vpop.f32.mrf.mxu1 }
 0x2ab   :  { %v1701_v30 = vadd.f32 %v1700_v28, %v1699_v25  ;;  %v1723_v31 = vadd.f32 %v1722_v29, %v1721_v26 }
 0x2ac   :  { %v1702_v32 = vpop.f32.mrf.mxu0  ;;  %v1724_v33 = vpop.f32.mrf.mxu1 }
 0x2ad   :  { %v790_v34 = vadd.f32 %v1701_v30, %v1614_v27  ;;  %v966_v48 = vadd.f32 %v1723_v31, %v1631_v45  ;;  %v1974_v33 = vld [vmem:[%s2614_s23 + $0x8] sm:$0xff]   ;;  %v1679_v45 = vld [vmem:[%s2615_s24] ss:$0 sm:$0xff] }
 0x2ae   :  { %v1703_v35 = vpop.f32.mrf.mxu0  ;;  %v1725_v36 = vpop.f32.mrf.mxu1 }
 0x2af   :  { %v795_v37 = vmax.f32 %v790_v34, 0.0  ;;  %v1975_v34 = vld [vmem:[%s2614_s23] sm:$0xff]  }
 0x2b0   :  { %v1672_v35 = vld [vmem:[%s2611_s20] ss:$0 sm:$0xff]  ;;  %s2002_s20 = smov [#allocation2]  }
 0x2b1   :  { %v971_v39 = vpack.c.bf16 %v795_v37, %v795_v37  ;;  %v1675_v36 = vld [vmem:[%s2613_s22] ss:$0 sm:$0xff]  ;;  %s1542_s13 = sshll.u32 %s2002_s20, 4  ;;  %s1543_s13 = int_to_ptr.vmem [resolvable:$true] %s1542_s13 }
 0x2b2   :  { %s1976_s22 = scalar_lea.vmem %s1543_s13, 32  ;;  %p1981_p1 = scmp.lt.s32.totalorder %s1543_s13, %s1543_s13 }
 0x2b3   :  { %1763 = vmatmul.mubr.msk.bf16.vlgmr.msra.gmra.mxu0 %vm1011_vm1, %v971_v39  ;;  %p1977_p0 = scmp.ne.s32.totalorder %s1543_s13, %s1976_s22  ;;  %p1982_p2 = scmp.lt.s32.totalorder %s1976_s22, %s1976_s22 }
 0x2b4   :  { %1779 = vmatpush3.bf16.msra.mxu0 %v1962_v38  ;;  %1786 = vmatprep.mubr.msk.bf16.mxu0 %vm2001_vm0, %v1999_v60 }
 0x2b5   :  { %1780 = vmatprep.subr.bf16.mxu0 %v1999_v60  ;;  %p1983_p3 = por %p1982_p2, %p1981_p1 }
 0x2b7   :  { %p1984_p4 = pnand %p1983_p3, %p1977_p0 }
 0x2b8   :  { %1781 = vmatpush3.bf16.msra.mxu0 %v1964_v40 }
 0x2b9   :  { %1782 = vmatprep.subr.bf16.mxu0 %v1999_v60 }
 0x2bc   :  { %1783 = vmatpush3.bf16.msra.mxu0 %v1966_v42 }
 0x2bd   :  { %1784 = vmatprep.subr.bf16.mxu0 %v1999_v60 }
 0x2c0   :  { %1785 = vmatpush3.bf16.msra.mxu0 %v1968_v44 }
 0x2c1   :  { %1802 = vmatprep.subr.bf16.mxu0 %v1999_v60 }
 0x373   :  { %v1049_v47 = vpop.f32.mrf.mxu0 }
 0x374   :  { %v1050_v49 = vadd.f32 %v1648_v46, %v1049_v47 }
 0x375   :  { %v1764_v50 = vpop.f32.mrf.mxu0 }
 0x376   :  { %v1055_v51 = vadd.f32 %v1050_v49, %v966_v48 }
 0x377   :  { %v1052_v52 = vpop.f32.mrf.mxu0 }
 0x378   :  { %v1056_v53 = vmax.f32 %v1055_v51, 0.0 }
 0x379   :  { %v1765_v54 = vpop.f32.mrf.mxu0 }
 0x37a   :  { %v1057_v56 = vpack.c.bf16 %v1056_v53, %v1056_v53 }
 0x37c   :  { %1775 = vmatmul.mubr.msk.bf16.vlgmr.msra.gmra.mxu1 %vm1011_vm1, %v1057_v56  ;;  %1787 = vmatmul.mubr.msk.bf16.vlgmr.msra.gmra.mxu0 %vm1011_vm1, %v1057_v56 }
 0x37d   :  { %1791 = vmatpush3.bf16.msra.mxu1 %v1969_v55  ;;  %1792 = vmatprep.mubr.msk.bf16.mxu1 %vm2001_vm0, %v1999_v60 }
 0x37e   :  { %1796 = vmatprep.subr.bf16.mxu1 %v1999_v60  ;;  %1804 = vmatprep.mubr.msk.bf16.mxu0 %vm2001_vm0, %v1999_v60 }
 0x37f   :  { %1803 = vmatpush3.bf16.msra.mxu0 %v1971_v7 }
 0x380   :  { %1816 = vmatprep.subr.bf16.mxu0 %v1999_v60 }
 0x43c   :  { %v1134_v58 = vpop.f32.mrf.mxu1  ;;  %v1214_v59 = vpop.f32.mrf.mxu0 }
 0x43d   :  { %v1135_v61 = vadd.f32 %v1654_v57, %v1134_v58  ;;  %v1215_v11 = vadd.f32 %v1660_v8, %v1214_v59 }
 0x43e   :  { %v1776_v62 = vpop.f32.mrf.mxu1  ;;  %v1788_v63 = vpop.f32.mrf.mxu0 }
 0x43f   :  { %v1140_v0 = vmax.f32 %v1135_v61, 0.0 }
 0x440   :  { %v1137_v1 = vpop.f32.mrf.mxu1  ;;  %v1217_v2 = vpop.f32.mrf.mxu0 }
 0x441   :  { %v1220_v3 = vpack.c.bf16 %v1140_v0, %v1140_v0 }
 0x442   :  { %v1777_v4 = vpop.f32.mrf.mxu1  ;;  %v1789_v5 = vpop.f32.mrf.mxu0 }
 0x443   :  { %1793 = vmatmul.mubr.msk.bf16.vlgmr.msra.gmra.mxu1 %vm1236_vm2, %v1220_v3 }
 0x444   :  { %1798 = vmatprep.mubr.msk.bf16.mxu1 %vm2001_vm0, %v1999_v60  ;;  %1797 = vmatpush3.bf16.msra.mxu1 %v1970_v6 }
 0x445   :  { %1808 = vmatprep.subr.bf16.mxu1 %v1999_v60 }
 0x503   :  { %v1274_v10 = vpop.f32.mrf.mxu1 }
 0x504   :  { %v1275_v20 = vadd.f32 %v1666_v9, %v1274_v10 }
 0x505   :  { %v1794_v13 = vpop.f32.mrf.mxu1 }
 0x506   :  { %v1280_v14 = vadd.f32 %v1275_v20, %v1215_v11 }
 0x507   :  { %v1277_v15 = vpop.f32.mrf.mxu1 }
 0x508   :  { %v1281_v16 = vmax.f32 %v1280_v14, 0.0 }
 0x509   :  { %v1795_v17 = vpop.f32.mrf.mxu1 }
 0x50a   :  { %v1282_v19 = vpack.c.bf16 %v1281_v16, %v1281_v16 }
 0x50c   :  { %1799 = vmatmul.mubr.msk.bf16.vlgmr.msra.gmra.mxu1 %vm1236_vm2, %v1282_v19  ;;  %1805 = vmatmul.mubr.msk.bf16.vlgmr.msra.gmra.mxu0 %vm1236_vm2, %v1282_v19 }
 0x50d   :  { %1809 = vmatpush3.bf16.msra.mxu1 %v1972_v18  ;;  %1812 = vmatprep.mubr.msk.bf16.mxu1 %vm2001_vm0, %v1999_v60 }
 0x50e   :  { %1810 = vmatprep.subr.bf16.mxu1 %v1999_v60  ;;  %1820 = vmatprep.mubr.msk.bf16.mxu0 %vm2001_vm0, %v1999_v60 }
 0x50f   :  { %1817 = vmatpush3.bf16.msra.mxu0 %v1974_v33 }
 0x510   :  { %1818 = vmatprep.subr.bf16.mxu0 %v1999_v60 }
 0x511   :  { %1811 = vmatpush3.bf16.msra.mxu1 %v1973_v12 }
 0x513   :  { %1819 = vmatpush3.bf16.msra.mxu0 %v1975_v34 }
 0x5cc   :  { %v1335_v22 = vpop.f32.mrf.mxu1  ;;  %v1391_v23 = vpop.f32.mrf.mxu0 }
 0x5cd   :  { %v1336_v24 = vadd.f32 %v1669_v21, %v1335_v22  ;;  %v1392_v38 = vadd.f32 %v1672_v35, %v1391_v23 }
 0x5ce   :  { %v1800_v25 = vpop.f32.mrf.mxu1  ;;  %v1806_v26 = vpop.f32.mrf.mxu0 }
 0x5cf   :  { %v1341_v27 = vmax.f32 %v1336_v24, 0.0 }
 0x5d0   :  { %v1338_v28 = vpop.f32.mrf.mxu1  ;;  %v1394_v29 = vpop.f32.mrf.mxu0 }
 0x5d1   :  { %v1397_v30 = vpack.c.bf16 %v1341_v27, %v1341_v27 }
 0x5d2   :  { %v1801_v31 = vpop.f32.mrf.mxu1  ;;  %v1807_v32 = vpop.f32.mrf.mxu0 }
 0x5d3   :  { %1813 = vmatmul.mubr.msk.bf16.vlgmr.msra.gmra.mxu1 %vm1421_vm3, %v1397_v30 }
 0x693   :  { %v1459_v37 = vpop.f32.mrf.mxu1 }
 0x694   :  { %v1460_v39 = vadd.f32 %v1675_v36, %v1459_v37 }
 0x695   :  { %v1814_v40 = vpop.f32.mrf.mxu1 }
 0x696   :  { %v1465_v41 = vadd.f32 %v1460_v39, %v1392_v38 }
 0x697   :  { %v1462_v42 = vpop.f32.mrf.mxu1 }
 0x698   :  { %v1466_v60 = vmax.f32 %v1465_v41, 0.0 }
 0x699   :  { %v1815_v43 = vpop.f32.mrf.mxu1 }
 0x69a   :  { %v1467_v44 = vpack.c.bf16 %v1466_v60, %v1466_v60 }
 0x69c   :  { %1821 = vmatmul.mubr.msk.bf16.vlgmr.msra.gmra.mxu0 %vm1421_vm3, %v1467_v44 }
 0x75c   :  { %v1528_v46 = vpop.f32.mrf.mxu0 }
 0x75d   :  { %v1529_v47 = vadd.f32 %v1679_v45, %v1528_v46 }
 0x75e   :  { %v1822_v48 = vpop.f32.mrf.mxu0 }
 0x75f   :  { %1535 = vst.msk [vmem:[#allocation2] sm:$0x3] %vm1534_vm4, %v1529_v47 }
 0x760   :  { %v1531_v49 = vpop.f32.mrf.mxu0 }
 0x761   :  { %1987 = shalt.err (!%p1984_p4)
}
 0x762   :  { %1545 = dma.vmem_to_hbm [thread:$0]  %s1543_s13, 32, %s2616_s25, [#allocation3]   ;;  %v1823_v50 = vpop.f32.mrf.mxu0 }
 0x763   :  { %1996 = dma.done.wait [#allocation3], 32  }
 0x764   :  { %1997 = vsyncadd [#allocation3], 4294967264 }
 0x765   :  { %1549 = vsyncpa [#allocation3], 1 }

</bundles_post_ra>
